<compile_context>
chip_gen: v7x
topology: tpu7x:2x2x1
jax: 0.10.0
libtpu: 0.0.40
codegen_flags: <defaults>
</compile_context>

<pallas_src>
import functools

import jax
import jax.numpy as jnp
from jax.experimental import pallas as pl
from jax.experimental.pallas import tpu as pltpu

_LANE = 128


def _round_up(a, b):
    return (a + b - 1) // b * b


def _unet_conv_kernel(x_ref, w1_ref, s1_ref, w2_ref, s2_ref, o_ref, h_ref, *,
                      W, K, M1, M2):
    """Fused (conv1+BN1+ReLU) -> (conv2+BN2+ReLU) for one batch element.

    Row-flattened formulation: spatial (H, W) is flattened into one row axis,
    so every (kh, kw) tap of the KxK conv is a contiguous row slice and the
    conv is K*K lane-dense MXU matmuls. Wrap-around columns / trailing halo
    rows are garbage that the wrapper slices away.

    x_ref : (1, Rx, Cpi)    bf16  flattened, zero-padded input
    w1_ref: (K*K, Cpi, Cpo) bf16  conv1 weights with BN1 scale folded in
    s1_ref: (1, Cpo)        f32   folded conv1-bias/BN1 shift
    w2_ref: (K*K, Cpo, Cpo) bf16  conv2 weights with BN2 scale folded in
    s2_ref: (1, Cpo)        f32   folded conv2-bias/BN2 shift
    o_ref : (1, M2, Cpo)          flattened stage-2 output
    h_ref : (M1, Cpo)       bf16  VMEM scratch: stage-1 activation (stays on chip)
    """
    x = x_ref[0]                                    # (Rx, Cpi)
    Cpo = o_ref.shape[-1]

    # ---- stage 1: conv1 (BN1 scale pre-folded) + shift + ReLU -> VMEM ----
    acc = jnp.zeros((M1, Cpo), jnp.float32)
    for kh in range(K):
        for kw in range(K):
            s = kh * W + kw                          # static row offset
            acc = acc + jnp.dot(x[s:s + M1], w1_ref[kh * K + kw],
                                preferred_element_type=jnp.float32)
    h_ref[...] = jnp.maximum(acc + s1_ref[...], 0.0).astype(h_ref.dtype)

    # ---- stage 2: conv2 (BN2 scale pre-folded) + shift + ReLU -> output ----
    h = h_ref[...]
    acc = jnp.zeros((M2, Cpo), jnp.float32)
    for kh in range(K):
        for kw in range(K):
            s = kh * W + kw
            acc = acc + jnp.dot(h[s:s + M2], w2_ref[kh * K + kw],
                                preferred_element_type=jnp.float32)
    o_ref[0] = jnp.maximum(acc + s2_ref[...], 0.0).astype(o_ref.dtype)


def unet_conv_forward(x, params, *, eps=1e-5, compute_dtype=jnp.bfloat16):
    """Pallas implementation of UnetConv.forward (eval mode), NHWC layout.

    x: (N, H, W, Cin) f32.  Returns (N, H-2*(K-1), W-2*(K-1), Cout) f32.
    """
    N, H, W, Cin = x.shape
    KH, KW, _, Cout = params["w1"].shape
    assert KH == KW, "square kernels only"
    K = KH
    Ho1, Wo1 = H - K + 1, W - K + 1
    Ho2, Wo2 = Ho1 - K + 1, Wo1 - K + 1

    Cpi = _round_up(Cin, _LANE)          # lane-dense padded channel dims
    Cpo = _round_up(Cout, _LANE)

    # Row-flattened sizing.  halo = max static tap offset kh*W + kw.
    halo = (K - 1) * (W + 1)
    M2 = _round_up(Ho2 * W, 8)           # stage-2 rows computed (>= valid rows)
    M1 = _round_up(halo + M2, 8)         # stage-1 rows computed (covers stage-2 reads)
    Rx = _round_up(halo + M1, 8)         # flattened input rows needed

    # Flatten + zero-pad the input once in XLA: (N, H*W, Cin) -> (N, Rx, Cpi).
    x2 = x.reshape(N, H * W, Cin)
    x2 = jnp.pad(x2, ((0, 0), (0, Rx - H * W), (0, Cpi - Cin))).astype(compute_dtype)

    # Fold conv bias + BN (eval-mode running stats) into weights / shift (f32).
    def _fold(w, b, g, beta, mean, var):
        scale = g / jnp.sqrt(var + eps)                       # (Cout,)
        w_fold = (w * scale).reshape(K * K, w.shape[2], Cout)  # (K*K, Cin_, Cout)
        shift = b * scale + beta - mean * scale                # (Cout,)
        return w_fold, shift

    w1f, s1 = _fold(params["w1"], params["b1"], params["g1"], params["be1"],
                    params["m1"], params["v1"])
    w2f, s2 = _fold(params["w2"], params["b2"], params["g2"], params["be2"],
                    params["m2"], params["v2"])

    w1p = jnp.pad(w1f, ((0, 0), (0, Cpi - Cin), (0, Cpo - Cout))).astype(compute_dtype)
    w2p = jnp.pad(w2f, ((0, 0), (0, Cpo - Cout), (0, Cpo - Cout))).astype(compute_dtype)
    s1p = jnp.pad(s1, (0, Cpo - Cout)).reshape(1, Cpo).astype(jnp.float32)
    s2p = jnp.pad(s2, (0, Cpo - Cout)).reshape(1, Cpo).astype(jnp.float32)

    kernel = functools.partial(_unet_conv_kernel, W=W, K=K, M1=M1, M2=M2)

    flops = 2 * N * (Ho1 * Wo1 * K * K * Cin * Cout
                     + Ho2 * Wo2 * K * K * Cout * Cout)
    bytes_accessed = (x2.size * x2.dtype.itemsize
                      + w1p.size * w1p.dtype.itemsize
                      + w2p.size * w2p.dtype.itemsize
                      + s1p.size * 4 + s2p.size * 4
                      + N * M2 * Cpo * 4)

    y_full = pl.pallas_call(
        kernel,
        out_shape=jax.ShapeDtypeStruct((N, M2, Cpo), x.dtype),
        grid_spec=pltpu.PrefetchScalarGridSpec(
            num_scalar_prefetch=0,
            grid=(N,),
            in_specs=[
                pl.BlockSpec((1, Rx, Cpi), lambda n: (n, 0, 0)),
                pl.BlockSpec((K * K, Cpi, Cpo), lambda n: (0, 0, 0)),
                pl.BlockSpec((1, Cpo), lambda n: (0, 0)),
                pl.BlockSpec((K * K, Cpo, Cpo), lambda n: (0, 0, 0)),
                pl.BlockSpec((1, Cpo), lambda n: (0, 0)),
            ],
            out_specs=pl.BlockSpec((1, M2, Cpo), lambda n: (n, 0, 0)),
            scratch_shapes=[pltpu.VMEM((M1, Cpo), compute_dtype)],
        ),
        compiler_params=pltpu.CompilerParams(
            dimension_semantics=("parallel",)),
        cost_estimate=pl.CostEstimate(flops=flops, transcendentals=0,
                                      bytes_accessed=bytes_accessed),
    )(x2, w1p, s1p, w2p, s2p)

    # Drop wrap-around columns / halo rows / padded channels (free in XLA).
    y = y_full[:, :Ho2 * W, :Cout].reshape(N, Ho2, W, Cout)[:, :, :Wo2, :]
    return y


# ----------------------------- references -----------------------------------

def _ref_forward(x, params, eps=1e-5):
    """Pure-JAX f32 reference (NHWC), exact module semantics."""
    def block(x, w, b, g, be, m, v):
        y = jax.lax.conv_general_dilated(
            x, w, window_strides=(1, 1), padding="VALID",
            dimension_numbers=("NHWC", "HWIO", "NHWC"),
            precision=jax.lax.Precision.HIGHEST)
        y = y + b
        y = (y - m) / jnp.sqrt(v + eps) * g + be
        return jnp.maximum(y, 0.0)

    y = block(x, params["w1"], params["b1"], params["g1"], params["be1"],
              params["m1"], params["v1"])
    y = block(y, params["w2"], params["b2"], params["g2"], params["be2"],
              params["m2"], params["v2"])
    return y


def _ref_forward_bf16_folded(x, params, eps=1e-5, compute_dtype=jnp.bfloat16):
    """Reference that mirrors the kernel numerics (BN folded, bf16 inputs,
    f32 accumulation, bf16 intermediate) — used for a tight correctness check."""
    def block(x, w, b, g, be, m, v):
        scale = g / jnp.sqrt(v + eps)
        wf = (w * scale).astype(compute_dtype)
        shift = b * scale + be - m * scale
        y = jax.lax.conv_general_dilated(
            x.astype(compute_dtype), wf, window_strides=(1, 1), padding="VALID",
            dimension_numbers=("NHWC", "HWIO", "NHWC"),
            preferred_element_type=jnp.float32)
        return jnp.maximum(y + shift, 0.0)

    h = block(x, params["w1"], params["b1"], params["g1"], params["be1"],
              params["m1"], params["v1"]).astype(compute_dtype)
    y = block(h, params["w2"], params["b2"], params["g2"], params["be2"],
              params["m2"], params["v2"])
    return y.astype(x.dtype)


def make_params(key, in_channels, out_channels, kernel_size):
    ks = jax.random.split(key, 12)
    k = kernel_size
    std1 = (2.0 / (k * k * in_channels)) ** 0.5
    std2 = (2.0 / (k * k * out_channels)) ** 0.5
    fan1 = in_channels * k * k
    fan2 = out_channels * k * k
    return {
        # conv weights in (KH, KW, Cin, Cout)
        "w1": jax.random.normal(ks[0], (k, k, in_channels, out_channels),
                                jnp.float32) * std1,
        "b1": jax.random.uniform(ks[1], (out_channels,), jnp.float32,
                                 -1.0 / fan1 ** 0.5, 1.0 / fan1 ** 0.5),
        "g1": 1.0 + 0.1 * jax.random.normal(ks[2], (out_channels,), jnp.float32),
        "be1": 0.1 * jax.random.normal(ks[3], (out_channels,), jnp.float32),
        "m1": 0.1 * jax.random.normal(ks[4], (out_channels,), jnp.float32),
        "v1": jax.random.uniform(ks[5], (out_channels,), jnp.float32, 0.5, 1.5),
        "w2": jax.random.normal(ks[6], (k, k, out_channels, out_channels),
                                jnp.float32) * std2,
        "b2": jax.random.uniform(ks[7], (out_channels,), jnp.float32,
                                 -1.0 / fan2 ** 0.5, 1.0 / fan2 ** 0.5),
        "g2": 1.0 + 0.1 * jax.random.normal(ks[8], (out_channels,), jnp.float32),
        "be2": 0.1 * jax.random.normal(ks[9], (out_channels,), jnp.float32),
        "m2": 0.1 * jax.random.normal(ks[10], (out_channels,), jnp.float32),
        "v2": jax.random.uniform(ks[11], (out_channels,), jnp.float32, 0.5, 1.5),
    }


if __name__ == "__main__":
    key = jax.random.PRNGKey(0)
    k_x, k_p = jax.random.split(key)

    N, Cin, Cout, H, W, K = 2, 4, 8, 16, 16, 3
    # NHWC input (equivalent to torch NCHW (2, 4, 16, 16) transposed).
    x = jax.random.normal(k_x, (N, H, W, Cin), jnp.float32)
    params = make_params(k_p, Cin, Cout, K)

    y = jax.jit(unet_conv_forward)(x, params)
    y = jax.block_until_ready(y)

    Ho2, Wo2 = H - 2 * (K - 1), W - 2 * (K - 1)
    assert y.shape == (N, Ho2, Wo2, Cout), y.shape

    # Tight check: reference that mirrors the kernel's bf16/folded numerics.
    y_tight = _ref_forward_bf16_folded(x, params)
    max_err = float(jnp.max(jnp.abs(y - y_tight)))
    assert max_err < 2e-2, f"kernel vs bf16-mirrored reference: max err {max_err}"

    # Semantic check: pure-f32 reference; bf16 MXU inputs bound the deviation.
    y_ref = _ref_forward(x, params)
    rel_l2 = float(jnp.linalg.norm(y - y_ref) / (jnp.linalg.norm(y_ref) + 1e-12))
    assert rel_l2 < 4e-2, f"kernel vs f32 reference: rel L2 {rel_l2}"

    print("KERNEL_OK")
</pallas_src>

<mosaic_0001>
module attributes {stable_mosaic.version = 11 : i64} {
  func.func @_unet_conv_kernel(%arg0: i32, %arg1: memref<1x272x128xbf16, #tpu.memory_space<vmem>>, %arg2: memref<9x128x128xbf16, #tpu.memory_space<vmem>>, %arg3: memref<1x128xf32, #tpu.memory_space<vmem>>, %arg4: memref<9x128x128xbf16, #tpu.memory_space<vmem>>, %arg5: memref<1x128xf32, #tpu.memory_space<vmem>>, %arg6: memref<1x192x128xf32, #tpu.memory_space<vmem>>, %arg7: memref<232x128xbf16, #tpu.memory_space<vmem>>) attributes {dimension_semantics = [#tpu.dimension_semantics<parallel>], iteration_bounds = array<i64: 2>, scalar_prefetch = 0 : i64, scratch_operands = 1 : i64, tpu.core_type = #tpu.core_type<tc>, window_params = [{transform_indices = @transform_0, window_bounds = array<i64: 1, 272, 128>}, {pipeline_mode = #tpu.pipeline_mode<synchronous>, transform_indices = @transform_1, window_bounds = array<i64: 9, 128, 128>}, {pipeline_mode = #tpu.pipeline_mode<synchronous>, transform_indices = @transform_2, window_bounds = array<i64: 1, 128>}, {pipeline_mode = #tpu.pipeline_mode<synchronous>, transform_indices = @transform_3, window_bounds = array<i64: 9, 128, 128>}, {pipeline_mode = #tpu.pipeline_mode<synchronous>, transform_indices = @transform_4, window_bounds = array<i64: 1, 128>}, {transform_indices = @transform_5, window_bounds = array<i64: 1, 192, 128>}]} {
    %c0 = arith.constant 0 : index
    %c0_0 = arith.constant 0 : index
    %c0_1 = arith.constant 0 : index
    %0 = vector.load %arg1[%c0, %c0_0, %c0_1] : memref<1x272x128xbf16, #tpu.memory_space<vmem>>, vector<1x272x128xbf16>
    %1 = vector.shape_cast %0 : vector<1x272x128xbf16> to vector<272x128xbf16>
    %cst = arith.constant 0.000000e+00 : f32
    %2 = vector.broadcast %cst : f32 to vector<232x128xf32>
    %3 = vector.extract_strided_slice %1 {offsets = [0, 0], sizes = [232, 128], strides = [1, 1]} : vector<272x128xbf16> to vector<232x128xbf16>
    %c0_2 = arith.constant 0 : index
    %c0_3 = arith.constant 0 : index
    %c0_4 = arith.constant 0 : index
    %4 = vector.load %arg2[%c0_2, %c0_3, %c0_4] : memref<9x128x128xbf16, #tpu.memory_space<vmem>>, vector<1x128x128xbf16>
    %5 = vector.shape_cast %4 : vector<1x128x128xbf16> to vector<128x128xbf16>
    %cst_5 = arith.constant dense<0.000000e+00> : vector<232x128xf32>
    %6 = tpu.matmul %3, %5, %cst_5 {dimension_numbers = #tpu.dot_dimension_numbers<[1], [0], [0], [1], [0, 0, 1, 1], [], []>} : vector<232x128xbf16>, vector<128x128xbf16>, vector<232x128xf32> -> vector<232x128xf32>
    %7 = arith.addf %2, %6 : vector<232x128xf32>
    %8 = vector.extract_strided_slice %1 {offsets = [1, 0], sizes = [232, 128], strides = [1, 1]} : vector<272x128xbf16> to vector<232x128xbf16>
    %c1 = arith.constant 1 : index
    %c0_6 = arith.constant 0 : index
    %c0_7 = arith.constant 0 : index
    %9 = vector.load %arg2[%c1, %c0_6, %c0_7] : memref<9x128x128xbf16, #tpu.memory_space<vmem>>, vector<1x128x128xbf16>
    %10 = vector.shape_cast %9 : vector<1x128x128xbf16> to vector<128x128xbf16>
    %cst_8 = arith.constant dense<0.000000e+00> : vector<232x128xf32>
    %11 = tpu.matmul %8, %10, %cst_8 {dimension_numbers = #tpu.dot_dimension_numbers<[1], [0], [0], [1], [0, 0, 1, 1], [], []>} : vector<232x128xbf16>, vector<128x128xbf16>, vector<232x128xf32> -> vector<232x128xf32>
    %12 = arith.addf %7, %11 : vector<232x128xf32>
    %13 = vector.extract_strided_slice %1 {offsets = [2, 0], sizes = [232, 128], strides = [1, 1]} : vector<272x128xbf16> to vector<232x128xbf16>
    %c2 = arith.constant 2 : index
    %c0_9 = arith.constant 0 : index
    %c0_10 = arith.constant 0 : index
    %14 = vector.load %arg2[%c2, %c0_9, %c0_10] : memref<9x128x128xbf16, #tpu.memory_space<vmem>>, vector<1x128x128xbf16>
    %15 = vector.shape_cast %14 : vector<1x128x128xbf16> to vector<128x128xbf16>
    %cst_11 = arith.constant dense<0.000000e+00> : vector<232x128xf32>
    %16 = tpu.matmul %13, %15, %cst_11 {dimension_numbers = #tpu.dot_dimension_numbers<[1], [0], [0], [1], [0, 0, 1, 1], [], []>} : vector<232x128xbf16>, vector<128x128xbf16>, vector<232x128xf32> -> vector<232x128xf32>
    %17 = arith.addf %12, %16 : vector<232x128xf32>
    %18 = vector.extract_strided_slice %1 {offsets = [16, 0], sizes = [232, 128], strides = [1, 1]} : vector<272x128xbf16> to vector<232x128xbf16>
    %c3 = arith.constant 3 : index
    %c0_12 = arith.constant 0 : index
    %c0_13 = arith.constant 0 : index
    %19 = vector.load %arg2[%c3, %c0_12, %c0_13] : memref<9x128x128xbf16, #tpu.memory_space<vmem>>, vector<1x128x128xbf16>
    %20 = vector.shape_cast %19 : vector<1x128x128xbf16> to vector<128x128xbf16>
    %cst_14 = arith.constant dense<0.000000e+00> : vector<232x128xf32>
    %21 = tpu.matmul %18, %20, %cst_14 {dimension_numbers = #tpu.dot_dimension_numbers<[1], [0], [0], [1], [0, 0, 1, 1], [], []>} : vector<232x128xbf16>, vector<128x128xbf16>, vector<232x128xf32> -> vector<232x128xf32>
    %22 = arith.addf %17, %21 : vector<232x128xf32>
    %23 = vector.extract_strided_slice %1 {offsets = [17, 0], sizes = [232, 128], strides = [1, 1]} : vector<272x128xbf16> to vector<232x128xbf16>
    %c4 = arith.constant 4 : index
    %c0_15 = arith.constant 0 : index
    %c0_16 = arith.constant 0 : index
    %24 = vector.load %arg2[%c4, %c0_15, %c0_16] : memref<9x128x128xbf16, #tpu.memory_space<vmem>>, vector<1x128x128xbf16>
    %25 = vector.shape_cast %24 : vector<1x128x128xbf16> to vector<128x128xbf16>
    %cst_17 = arith.constant dense<0.000000e+00> : vector<232x128xf32>
    %26 = tpu.matmul %23, %25, %cst_17 {dimension_numbers = #tpu.dot_dimension_numbers<[1], [0], [0], [1], [0, 0, 1, 1], [], []>} : vector<232x128xbf16>, vector<128x128xbf16>, vector<232x128xf32> -> vector<232x128xf32>
    %27 = arith.addf %22, %26 : vector<232x128xf32>
    %28 = vector.extract_strided_slice %1 {offsets = [18, 0], sizes = [232, 128], strides = [1, 1]} : vector<272x128xbf16> to vector<232x128xbf16>
    %c5 = arith.constant 5 : index
    %c0_18 = arith.constant 0 : index
    %c0_19 = arith.constant 0 : index
    %29 = vector.load %arg2[%c5, %c0_18, %c0_19] : memref<9x128x128xbf16, #tpu.memory_space<vmem>>, vector<1x128x128xbf16>
    %30 = vector.shape_cast %29 : vector<1x128x128xbf16> to vector<128x128xbf16>
    %cst_20 = arith.constant dense<0.000000e+00> : vector<232x128xf32>
    %31 = tpu.matmul %28, %30, %cst_20 {dimension_numbers = #tpu.dot_dimension_numbers<[1], [0], [0], [1], [0, 0, 1, 1], [], []>} : vector<232x128xbf16>, vector<128x128xbf16>, vector<232x128xf32> -> vector<232x128xf32>
    %32 = arith.addf %27, %31 : vector<232x128xf32>
    %33 = vector.extract_strided_slice %1 {offsets = [32, 0], sizes = [232, 128], strides = [1, 1]} : vector<272x128xbf16> to vector<232x128xbf16>
    %c6 = arith.constant 6 : index
    %c0_21 = arith.constant 0 : index
    %c0_22 = arith.constant 0 : index
    %34 = vector.load %arg2[%c6, %c0_21, %c0_22] : memref<9x128x128xbf16, #tpu.memory_space<vmem>>, vector<1x128x128xbf16>
    %35 = vector.shape_cast %34 : vector<1x128x128xbf16> to vector<128x128xbf16>
    %cst_23 = arith.constant dense<0.000000e+00> : vector<232x128xf32>
    %36 = tpu.matmul %33, %35, %cst_23 {dimension_numbers = #tpu.dot_dimension_numbers<[1], [0], [0], [1], [0, 0, 1, 1], [], []>} : vector<232x128xbf16>, vector<128x128xbf16>, vector<232x128xf32> -> vector<232x128xf32>
    %37 = arith.addf %32, %36 : vector<232x128xf32>
    %38 = vector.extract_strided_slice %1 {offsets = [33, 0], sizes = [232, 128], strides = [1, 1]} : vector<272x128xbf16> to vector<232x128xbf16>
    %c7 = arith.constant 7 : index
    %c0_24 = arith.constant 0 : index
    %c0_25 = arith.constant 0 : index
    %39 = vector.load %arg2[%c7, %c0_24, %c0_25] : memref<9x128x128xbf16, #tpu.memory_space<vmem>>, vector<1x128x128xbf16>
    %40 = vector.shape_cast %39 : vector<1x128x128xbf16> to vector<128x128xbf16>
    %cst_26 = arith.constant dense<0.000000e+00> : vector<232x128xf32>
    %41 = tpu.matmul %38, %40, %cst_26 {dimension_numbers = #tpu.dot_dimension_numbers<[1], [0], [0], [1], [0, 0, 1, 1], [], []>} : vector<232x128xbf16>, vector<128x128xbf16>, vector<232x128xf32> -> vector<232x128xf32>
    %42 = arith.addf %37, %41 : vector<232x128xf32>
    %43 = vector.extract_strided_slice %1 {offsets = [34, 0], sizes = [232, 128], strides = [1, 1]} : vector<272x128xbf16> to vector<232x128xbf16>
    %c8 = arith.constant 8 : index
    %c0_27 = arith.constant 0 : index
    %c0_28 = arith.constant 0 : index
    %44 = vector.load %arg2[%c8, %c0_27, %c0_28] : memref<9x128x128xbf16, #tpu.memory_space<vmem>>, vector<1x128x128xbf16>
    %45 = vector.shape_cast %44 : vector<1x128x128xbf16> to vector<128x128xbf16>
    %cst_29 = arith.constant dense<0.000000e+00> : vector<232x128xf32>
    %46 = tpu.matmul %43, %45, %cst_29 {dimension_numbers = #tpu.dot_dimension_numbers<[1], [0], [0], [1], [0, 0, 1, 1], [], []>} : vector<232x128xbf16>, vector<128x128xbf16>, vector<232x128xf32> -> vector<232x128xf32>
    %47 = arith.addf %42, %46 : vector<232x128xf32>
    %c0_30 = arith.constant 0 : index
    %c0_31 = arith.constant 0 : index
    %48 = vector.load %arg3[%c0_30, %c0_31] : memref<1x128xf32, #tpu.memory_space<vmem>>, vector<1x128xf32>
    %49 = vector.broadcast %48 : vector<1x128xf32> to vector<232x128xf32>
    %50 = arith.addf %47, %49 : vector<232x128xf32>
    %cst_32 = arith.constant 0.000000e+00 : f32
    %51 = vector.broadcast %cst_32 : f32 to vector<232x128xf32>
    %52 = arith.maximumf %50, %51 : vector<232x128xf32>
    %53 = arith.truncf %52 : vector<232x128xf32> to vector<232x128xbf16>
    %c0_33 = arith.constant 0 : index
    %c0_34 = arith.constant 0 : index
    %54 = vector.load %arg7[%c0_33, %c0_34] : memref<232x128xbf16, #tpu.memory_space<vmem>>, vector<232x128xbf16>
    tpu.vector_store %arg7[%c0_33, %c0_34], %53 {strides = array<i32>} : memref<232x128xbf16, #tpu.memory_space<vmem>>, vector<232x128xbf16>,
    %c0_35 = arith.constant 0 : index
    %c0_36 = arith.constant 0 : index
    %55 = vector.load %arg7[%c0_35, %c0_36] : memref<232x128xbf16, #tpu.memory_space<vmem>>, vector<232x128xbf16>
    %cst_37 = arith.constant 0.000000e+00 : f32
    %56 = vector.broadcast %cst_37 : f32 to vector<192x128xf32>
    %57 = vector.extract_strided_slice %55 {offsets = [0, 0], sizes = [192, 128], strides = [1, 1]} : vector<232x128xbf16> to vector<192x128xbf16>
    %c0_38 = arith.constant 0 : index
    %c0_39 = arith.constant 0 : index
    %c0_40 = arith.constant 0 : index
    %58 = vector.load %arg4[%c0_38, %c0_39, %c0_40] : memref<9x128x128xbf16, #tpu.memory_space<vmem>>, vector<1x128x128xbf16>
    %59 = vector.shape_cast %58 : vector<1x128x128xbf16> to vector<128x128xbf16>
    %cst_41 = arith.constant dense<0.000000e+00> : vector<192x128xf32>
    %60 = tpu.matmul %57, %59, %cst_41 {dimension_numbers = #tpu.dot_dimension_numbers<[1], [0], [0], [1], [0, 0, 1, 1], [], []>} : vector<192x128xbf16>, vector<128x128xbf16>, vector<192x128xf32> -> vector<192x128xf32>
    %61 = arith.addf %56, %60 : vector<192x128xf32>
    %62 = vector.extract_strided_slice %55 {offsets = [1, 0], sizes = [192, 128], strides = [1, 1]} : vector<232x128xbf16> to vector<192x128xbf16>
    %c1_42 = arith.constant 1 : index
    %c0_43 = arith.constant 0 : index
    %c0_44 = arith.constant 0 : index
    %63 = vector.load %arg4[%c1_42, %c0_43, %c0_44] : memref<9x128x128xbf16, #tpu.memory_space<vmem>>, vector<1x128x128xbf16>
    %64 = vector.shape_cast %63 : vector<1x128x128xbf16> to vector<128x128xbf16>
    %cst_45 = arith.constant dense<0.000000e+00> : vector<192x128xf32>
    %65 = tpu.matmul %62, %64, %cst_45 {dimension_numbers = #tpu.dot_dimension_numbers<[1], [0], [0], [1], [0, 0, 1, 1], [], []>} : vector<192x128xbf16>, vector<128x128xbf16>, vector<192x128xf32> -> vector<192x128xf32>
    %66 = arith.addf %61, %65 : vector<192x128xf32>
    %67 = vector.extract_strided_slice %55 {offsets = [2, 0], sizes = [192, 128], strides = [1, 1]} : vector<232x128xbf16> to vector<192x128xbf16>
    %c2_46 = arith.constant 2 : index
    %c0_47 = arith.constant 0 : index
    %c0_48 = arith.constant 0 : index
    %68 = vector.load %arg4[%c2_46, %c0_47, %c0_48] : memref<9x128x128xbf16, #tpu.memory_space<vmem>>, vector<1x128x128xbf16>
    %69 = vector.shape_cast %68 : vector<1x128x128xbf16> to vector<128x128xbf16>
    %cst_49 = arith.constant dense<0.000000e+00> : vector<192x128xf32>
    %70 = tpu.matmul %67, %69, %cst_49 {dimension_numbers = #tpu.dot_dimension_numbers<[1], [0], [0], [1], [0, 0, 1, 1], [], []>} : vector<192x128xbf16>, vector<128x128xbf16>, vector<192x128xf32> -> vector<192x128xf32>
    %71 = arith.addf %66, %70 : vector<192x128xf32>
    %72 = vector.extract_strided_slice %55 {offsets = [16, 0], sizes = [192, 128], strides = [1, 1]} : vector<232x128xbf16> to vector<192x128xbf16>
    %c3_50 = arith.constant 3 : index
    %c0_51 = arith.constant 0 : index
    %c0_52 = arith.constant 0 : index
    %73 = vector.load %arg4[%c3_50, %c0_51, %c0_52] : memref<9x128x128xbf16, #tpu.memory_space<vmem>>, vector<1x128x128xbf16>
    %74 = vector.shape_cast %73 : vector<1x128x128xbf16> to vector<128x128xbf16>
    %cst_53 = arith.constant dense<0.000000e+00> : vector<192x128xf32>
    %75 = tpu.matmul %72, %74, %cst_53 {dimension_numbers = #tpu.dot_dimension_numbers<[1], [0], [0], [1], [0, 0, 1, 1], [], []>} : vector<192x128xbf16>, vector<128x128xbf16>, vector<192x128xf32> -> vector<192x128xf32>
    %76 = arith.addf %71, %75 : vector<192x128xf32>
    %77 = vector.extract_strided_slice %55 {offsets = [17, 0], sizes = [192, 128], strides = [1, 1]} : vector<232x128xbf16> to vector<192x128xbf16>
    %c4_54 = arith.constant 4 : index
    %c0_55 = arith.constant 0 : index
    %c0_56 = arith.constant 0 : index
    %78 = vector.load %arg4[%c4_54, %c0_55, %c0_56] : memref<9x128x128xbf16, #tpu.memory_space<vmem>>, vector<1x128x128xbf16>
    %79 = vector.shape_cast %78 : vector<1x128x128xbf16> to vector<128x128xbf16>
    %cst_57 = arith.constant dense<0.000000e+00> : vector<192x128xf32>
    %80 = tpu.matmul %77, %79, %cst_57 {dimension_numbers = #tpu.dot_dimension_numbers<[1], [0], [0], [1], [0, 0, 1, 1], [], []>} : vector<192x128xbf16>, vector<128x128xbf16>, vector<192x128xf32> -> vector<192x128xf32>
    %81 = arith.addf %76, %80 : vector<192x128xf32>
    %82 = vector.extract_strided_slice %55 {offsets = [18, 0], sizes = [192, 128], strides = [1, 1]} : vector<232x128xbf16> to vector<192x128xbf16>
    %c5_58 = arith.constant 5 : index
    %c0_59 = arith.constant 0 : index
    %c0_60 = arith.constant 0 : index
    %83 = vector.load %arg4[%c5_58, %c0_59, %c0_60] : memref<9x128x128xbf16, #tpu.memory_space<vmem>>, vector<1x128x128xbf16>
    %84 = vector.shape_cast %83 : vector<1x128x128xbf16> to vector<128x128xbf16>
    %cst_61 = arith.constant dense<0.000000e+00> : vector<192x128xf32>
    %85 = tpu.matmul %82, %84, %cst_61 {dimension_numbers = #tpu.dot_dimension_numbers<[1], [0], [0], [1], [0, 0, 1, 1], [], []>} : vector<192x128xbf16>, vector<128x128xbf16>, vector<192x128xf32> -> vector<192x128xf32>
    %86 = arith.addf %81, %85 : vector<192x128xf32>
    %87 = vector.extract_strided_slice %55 {offsets = [32, 0], sizes = [192, 128], strides = [1, 1]} : vector<232x128xbf16> to vector<192x128xbf16>
    %c6_62 = arith.constant 6 : index
    %c0_63 = arith.constant 0 : index
    %c0_64 = arith.constant 0 : index
    %88 = vector.load %arg4[%c6_62, %c0_63, %c0_64] : memref<9x128x128xbf16, #tpu.memory_space<vmem>>, vector<1x128x128xbf16>
    %89 = vector.shape_cast %88 : vector<1x128x128xbf16> to vector<128x128xbf16>
    %cst_65 = arith.constant dense<0.000000e+00> : vector<192x128xf32>
    %90 = tpu.matmul %87, %89, %cst_65 {dimension_numbers = #tpu.dot_dimension_numbers<[1], [0], [0], [1], [0, 0, 1, 1], [], []>} : vector<192x128xbf16>, vector<128x128xbf16>, vector<192x128xf32> -> vector<192x128xf32>
    %91 = arith.addf %86, %90 : vector<192x128xf32>
    %92 = vector.extract_strided_slice %55 {offsets = [33, 0], sizes = [192, 128], strides = [1, 1]} : vector<232x128xbf16> to vector<192x128xbf16>
    %c7_66 = arith.constant 7 : index
    %c0_67 = arith.constant 0 : index
    %c0_68 = arith.constant 0 : index
    %93 = vector.load %arg4[%c7_66, %c0_67, %c0_68] : memref<9x128x128xbf16, #tpu.memory_space<vmem>>, vector<1x128x128xbf16>
    %94 = vector.shape_cast %93 : vector<1x128x128xbf16> to vector<128x128xbf16>
    %cst_69 = arith.constant dense<0.000000e+00> : vector<192x128xf32>
    %95 = tpu.matmul %92, %94, %cst_69 {dimension_numbers = #tpu.dot_dimension_numbers<[1], [0], [0], [1], [0, 0, 1, 1], [], []>} : vector<192x128xbf16>, vector<128x128xbf16>, vector<192x128xf32> -> vector<192x128xf32>
    %96 = arith.addf %91, %95 : vector<192x128xf32>
    %97 = vector.extract_strided_slice %55 {offsets = [34, 0], sizes = [192, 128], strides = [1, 1]} : vector<232x128xbf16> to vector<192x128xbf16>
    %c8_70 = arith.constant 8 : index
    %c0_71 = arith.constant 0 : index
    %c0_72 = arith.constant 0 : index
    %98 = vector.load %arg4[%c8_70, %c0_71, %c0_72] : memref<9x128x128xbf16, #tpu.memory_space<vmem>>, vector<1x128x128xbf16>
    %99 = vector.shape_cast %98 : vector<1x128x128xbf16> to vector<128x128xbf16>
    %cst_73 = arith.constant dense<0.000000e+00> : vector<192x128xf32>
    %100 = tpu.matmul %97, %99, %cst_73 {dimension_numbers = #tpu.dot_dimension_numbers<[1], [0], [0], [1], [0, 0, 1, 1], [], []>} : vector<192x128xbf16>, vector<128x128xbf16>, vector<192x128xf32> -> vector<192x128xf32>
    %101 = arith.addf %96, %100 : vector<192x128xf32>
    %c0_74 = arith.constant 0 : index
    %c0_75 = arith.constant 0 : index
    %102 = vector.load %arg5[%c0_74, %c0_75] : memref<1x128xf32, #tpu.memory_space<vmem>>, vector<1x128xf32>
    %103 = vector.broadcast %102 : vector<1x128xf32> to vector<192x128xf32>
    %104 = arith.addf %101, %103 : vector<192x128xf32>
    %cst_76 = arith.constant 0.000000e+00 : f32
    %105 = vector.broadcast %cst_76 : f32 to vector<192x128xf32>
    %106 = arith.maximumf %104, %105 : vector<192x128xf32>
    %c0_77 = arith.constant 0 : index
    %c0_78 = arith.constant 0 : index
    %c0_79 = arith.constant 0 : index
    %107 = vector.load %arg6[%c0_77, %c0_78, %c0_79] : memref<1x192x128xf32, #tpu.memory_space<vmem>>, vector<1x192x128xf32>
    %108 = vector.shape_cast %107 : vector<1x192x128xf32> to vector<192x128xf32>
    %109 = vector.shape_cast %106 : vector<192x128xf32> to vector<1x192x128xf32>
    tpu.vector_store %arg6[%c0_77, %c0_78, %c0_79], %109 {strides = array<i32>} : memref<1x192x128xf32, #tpu.memory_space<vmem>>, vector<1x192x128xf32>,
    return
  }
  func.func @transform_0(%arg0: i32) -> (i32, i32, i32) {
    %c0_i32 = arith.constant 0 : i32
    %c0_i32_0 = arith.constant 0 : i32
    %c0_i32_1 = arith.constant 0 : i32
    return %arg0, %c0_i32, %c0_i32_0 : i32, i32, i32
  }
  func.func @transform_1(%arg0: i32) -> (i32, i32, i32) {
    %c0_i32 = arith.constant 0 : i32
    %c0_i32_0 = arith.constant 0 : i32
    %c0_i32_1 = arith.constant 0 : i32
    %c0_i32_2 = arith.constant 0 : i32
    return %c0_i32, %c0_i32_0, %c0_i32_1 : i32, i32, i32
  }
  func.func @transform_2(%arg0: i32) -> (i32, i32) {
    %c0_i32 = arith.constant 0 : i32
    %c0_i32_0 = arith.constant 0 : i32
    %c0_i32_1 = arith.constant 0 : i32
    return %c0_i32, %c0_i32_0 : i32, i32
  }
  func.func @transform_3(%arg0: i32) -> (i32, i32, i32) {
    %c0_i32 = arith.constant 0 : i32
    %c0_i32_0 = arith.constant 0 : i32
    %c0_i32_1 = arith.constant 0 : i32
    %c0_i32_2 = arith.constant 0 : i32
    return %c0_i32, %c0_i32_0, %c0_i32_1 : i32, i32, i32
  }
  func.func @transform_4(%arg0: i32) -> (i32, i32) {
    %c0_i32 = arith.constant 0 : i32
    %c0_i32_0 = arith.constant 0 : i32
    %c0_i32_1 = arith.constant 0 : i32
    return %c0_i32, %c0_i32_0 : i32, i32
  }
  func.func @transform_5(%arg0: i32) -> (i32, i32, i32) {
    %c0_i32 = arith.constant 0 : i32
    %c0_i32_0 = arith.constant 0 : i32
    %c0_i32_1 = arith.constant 0 : i32
    return %arg0, %c0_i32, %c0_i32_0 : i32, i32, i32
  }
}

</mosaic_0001>

<bundles_post_ra>
// kernel: unet_conv_forward.1
= control target key start
LH: loop header
LB: loop body
LE: loop exit
PB: predicated region body
PF: predicated region fallthrough
CT: control target
= control target key end

     0   :  { %s7781_s18 = smov 0   ;;  %s10005_s0 = inlined_call_operand.vmem [shape: bf16[2,272,128], index: 0, kind: input, shape index: {}]   ;;  %s10006_s1 = inlined_call_operand.vmem [shape: bf16[9,128,128], index: 1, kind: input, shape index: {}]   ;;  %s10007_s2 = inlined_call_operand.vmem [shape: f32[1,128], index: 2, kind: input, shape index: {}]   ;;  %s10008_s3 = inlined_call_operand.vmem [shape: bf16[9,128,128], index: 3, kind: input, shape index: {}]   ;;  %s10009_s4 = inlined_call_operand.vmem [shape: f32[1,128], index: 4, kind: input, shape index: {}]   ;;  %s10010_s5 = inlined_call_operand.vmem [shape: f32[2,192,128], index: 5, kind: output, shape index: {}]  }
   0x1 LB: > { %s5297_s19 = sadd.s32 4294967295, %s7747_s18   ;;  %p5301_p0 = scmp.ge.s32.totalorder %s7747_s18, 1  ;;  %s7747_s18 = sphi %s7781_s18, %s15_s18  }
   0x2   : > { %p187_p1 = scmp.lt.s32.totalorder %s7747_s18, 3 }
   0x4   : > { %p188_p2 = pnand %p5301_p0, %p187_p1 }
   0x6   : > { %191 = sbr.rel (%p188_p2) target bundleno = 1615 (0x64f), region = 40 }
   0xd   : > { %v7537_v0 = vld [vmem:[%s10006_s1 + $0x40] sm:$0xff]   ;;  %v10028_v1 = vmov 0.0   ;;  %v7538_v2 = vld [vmem:[%s10006_s1 + $0x48] sm:$0xff]   ;;  %vm7750_vm0 = vmmov 0   ;;  %p215_p3 = scmp.lt.s32.totalorder %s5297_s19, 1  ;;  %v7539_v3 = vld [vmem:[%s10006_s1 + $0x50] sm:$0xff]  }
   0xe   : > { %6273 = vmatprep.subr.bf16.mxu0 %v10028_v1  ;;  %7317 = vmatprep.subr.bf16.mxu1 %v10028_v1  ;;  %v7540_v4 = vld [vmem:[%s10006_s1 + $0x58] sm:$0xff]   ;;  %v7541_v5 = vld [vmem:[%s10006_s1 + $0x60] sm:$0xff]   ;;  %v7542_v7 = vld [vmem:[%s10006_s1 + $0x68] sm:$0xff]   ;;  %vm368_vm1 = vsmask.f32 7424  ;;  %vm936_vm2 = vcmask 1046528  }
   0xf   : > { %6274 = vmatpush3.bf16.msra.mxu0 %v7537_v0  ;;  %6289 = vmatprep.mubr.msk.bf16.mxu0 %vm7750_vm0, %v10028_v1  ;;  %s10117_s19 = smov (!%p215_p3, %s5297_s19), 1  ;;  %v7543_v10 = vld [vmem:[%s10006_s1 + $0x70] sm:$0xff]   ;;  %v7544_v16 = vld [vmem:[%s10006_s1 + $0x78] sm:$0xff]   ;;  %v7547_v27 = vld [vmem:[%s10006_s1] sm:$0xff]  }
  0x10   : > { %6275 = vmatprep.subr.bf16.mxu0 %v10028_v1  ;;  %6533 = vmatprep.mubr.msk.bf16.mxu1 %vm7750_vm0, %v10028_v1  ;;  %s7525_s26 = smul.u32 136, %s10117_s19  ;;  %v7550_v34 = vld [vmem:[%s10006_s1 + $0x8] sm:$0xff]   ;;  %v7552_v48 = vld [vmem:[%s10006_s1 + $0x10] sm:$0xff]   ;;  %v7555_v56 = vld [vmem:[%s10006_s1 + $0x18] sm:$0xff]  }
  0x11   : > { %v7558_v60 = vld [vmem:[%s10006_s1 + $0x20] sm:$0xff]   ;;  %v7561_v62 = vld [vmem:[%s10006_s1 + $0x28] sm:$0xff]   ;;  %s7526_s20 = smul.u32 192, %s10117_s19 }
  0x12   : > { %s7812_s29 = scalar_lea.vmem %s10005_s0, %s7525_s26 }
  0x13   : > { %6276 = vmatpush3.bf16.msra.mxu0 %v7538_v2  ;;  %v7822_v6 = vld [vmem:[%s7812_s29] sm:$0xff]   ;;  %v7829_v8 = vld [vmem:[%s7812_s29 + $0x8] sm:$0xff]   ;;  %v7840_v14 = vld [vmem:[%s7812_s29 + $0x10] sm:$0xff]   ;;  %s9953_s25 = scalar_lea.vmem %s10010_s5, %s7526_s20 }
  0x14   : > { %6277 = vmatprep.subr.bf16.mxu0 %v10028_v1  ;;  %v372_v9 = vshll.u32 %v7822_v6, 16  ;;  %v370_v11 = vshrl.u32 %v7822_v6, 16  ;;  %v377_v13 = vshll.u32 %v7829_v8, 16  ;;  %v7843_v15 = vld [vmem:[%s7812_s29 + $0x18] sm:$0xff]   ;;  %v7849_v17 = vld [vmem:[%s7812_s29 + $0x20] sm:$0xff]   ;;  %v7852_v18 = vld [vmem:[%s7812_s29 + $0x28] sm:$0xff]  }
  0x15   : > { %v7855_v21 = vld [vmem:[%s7812_s29 + $0x30] sm:$0xff]   ;;  %v385_v22 = vshll.u32 %v7840_v14, 16  ;;  %v7860_v23 = vld [vmem:[%s7812_s29 + $0x38] sm:$0xff]   ;;  %v381_v24 = vshrl.u32 %v7829_v8, 16  ;;  %v393_v25 = vshll.u32 %v7843_v15, 16  ;;  %v401_v28 = vshll.u32 %v7849_v17, 16 }
  0x16   : > { %v374_v12 = vrot.slane %v372_v9, 1  ;;  %v379_v20 = vrot.slane %v377_v13, 1  ;;  %v409_v29 = vshll.u32 %v7852_v18, 16  ;;  %v417_v30 = vshll.u32 %v7855_v21, 16  ;;  %v7874_v32 = vld [vmem:[%s7812_s29 + $0x40] sm:$0xff]   ;;  %v7884_v41 = vld [vmem:[%s7812_s29 + $0x48] sm:$0xff]  }
  0x17   : > { %6278 = vmatpush3.bf16.msra.mxu0 %v7539_v3  ;;  %v389_v31 = vshrl.u32 %v7840_v14, 16  ;;  %v387_v33 = vrot.slane %v385_v22, 1  ;;  %v397_v35 = vshrl.u32 %v7843_v15, 16  ;;  %v425_v36 = vshll.u32 %v7860_v23, 16  ;;  %v7898_v52 = vld [vmem:[%s7812_s29 + $0x50] sm:$0xff]   ;;  %v7942_v9 = vld [vmem:[%s7812_s29 + $0x58] sm:$0xff]  }
  0x18   : > { %6279 = vmatprep.subr.bf16.mxu0 %v10028_v1  ;;  %v375_v19 = vor.u32 %v374_v12, %v370_v11  ;;  %v383_v37 = vor.u32 %v381_v24, %v379_v20  ;;  %v395_v38 = vrot.slane %v393_v25, 1  ;;  %v405_v39 = vshrl.u32 %v7849_v17, 16  ;;  %v7564_v3 = vld [vmem:[%s10006_s1 + $0x30] sm:$0xff]  }
  0x19   : > { %v413_v40 = vshrl.u32 %v7852_v18, 16  ;;  %v403_v42 = vrot.slane %v401_v28, 1  ;;  %v411_v43 = vrot.slane %v409_v29, 1  ;;  %v419_v44 = vrot.slane %v417_v30, 1  ;;  %v7977_v29 = vld [vmem:[%s7812_s29 + $0x68] sm:$0xff]  }
  0x1a   : > { %v380_v26 = vsel %vm368_vm1, %v375_v19, %v379_v20  ;;  %v421_v45 = vshrl.u32 %v7855_v21, 16  ;;  %v429_v46 = vshrl.u32 %v7860_v23, 16  ;;  %v433_v47 = vshll.u32 %v7874_v32, 16  ;;  %v7961_v20 = vld [vmem:[%s7812_s29 + $0x60] sm:$0xff]  }
  0x1b   : > { %6280 = vmatpush3.bf16.msra.mxu0 %v7540_v4  ;;  %v427_v49 = vrot.slane %v425_v36, 1  ;;  %v437_v50 = vshrl.u32 %v7874_v32, 16  ;;  %v441_v51 = vshll.u32 %v7884_v41, 16  ;;  %v7901_v53 = vsel %vm368_vm1, %v383_v37, %v387_v33 }
  0x1c   : > { %6281 = vmatprep.subr.bf16.mxu0 %v10028_v1  ;;  %v435_v54 = vrot.slane %v433_v47, 1  ;;  %v445_v55 = vshrl.u32 %v7884_v41, 16  ;;  %v449_v58 = vshll.u32 %v7898_v52, 16  ;;  %v391_v59 = vor.u32 %v389_v31, %v387_v33 }
  0x1d   : > { %v443_v57 = vrot.slane %v441_v51, 1  ;;  %v399_v63 = vor.u32 %v397_v35, %v395_v38  ;;  %v453_v2 = vshrl.u32 %v7898_v52, 16  ;;  %v457_v11 = vshll.u32 %v7942_v9, 16 }
  0x1e   : > { %v7917_v61 = vsel %vm368_vm1, %v391_v59, %v395_v38  ;;  %v451_v0 = vrot.slane %v449_v58, 1  ;;  %v461_v12 = vshrl.u32 %v7942_v9, 16  ;;  %v415_v13 = vor.u32 %v413_v40, %v411_v43  ;;  %v7568_v58 = vld [vmem:[%s10006_s1 + $0x80] sm:$0xff]   ;;  %v8045_v59 = vld [vmem:[%s10006_s1 + $0xc8] sm:$0xff]  }
  0x1f   : > { %6282 = vmatpush3.bf16.msra.mxu0 %v7541_v5  ;;  %v7932_v4 = vsel %vm368_vm1, %v399_v63, %v403_v42  ;;  %v7567_v5 = vld [vmem:[%s10006_s1 + $0x38] sm:$0xff]   ;;  %v423_v19 = vor.u32 %v421_v45, %v419_v44  ;;  %v459_v24 = vrot.slane %v457_v11, 1  ;;  %v465_v25 = vshll.u32 %v7961_v20, 16 }
  0x20   : > { %6283 = vmatprep.subr.bf16.mxu0 %v10028_v1  ;;  %v439_v28 = vor.u32 %v437_v50, %v435_v54  ;;  %v473_v33 = vshll.u32 %v7977_v29, 16  ;;  %v455_v36 = vor.u32 %v453_v2, %v451_v0  ;;  %v8069_v63 = vld [vmem:[%s10006_s1 + $0xd8] sm:$0xff]   ;;  %v8083_v2 = vld [vmem:[%s10006_s1 + $0xe0] sm:$0xff]  }
  0x21   : > { %v7964_v22 = vsel %vm368_vm1, %v423_v19, %v427_v49  ;;  %v467_v31 = vrot.slane %v465_v25, 1  ;;  %v463_v38 = vor.u32 %v461_v12, %v459_v24  ;;  %v8119_v11 = vld [vmem:[%s10006_s1 + $0xf8] sm:$0xff]  }
  0x22   : > { %v7980_v30 = vsel %vm368_vm1, %v439_v28, %v443_v57  ;;  %v7993_v37 = vsel %vm368_vm1, %v455_v36, %v459_v24  ;;  %v475_v40 = vrot.slane %v473_v33, 1  ;;  %v7575_v12 = vld [vmem:[%s10006_s1 + $0xb8] sm:$0xff]   ;;  %v7718_v33 = vld [vmem:[%s7812_s29] sm:$0xff]   ;;  %v8217_v36 = vld [vmem:[%s7812_s29 + $0x8] sm:$0xff]  }
  0x23   : > { %6284 = vmatpush3.bf16.msra.mxu0 %v7542_v7  ;;  %v407_v7 = vor.u32 %v405_v39, %v403_v42  ;;  %v469_v39 = vshrl.u32 %v7961_v20, 16  ;;  %v8000_v42 = vld [vmem:[%s7812_s29 + $0x70] sm:$0xf] }
  0x24   : > { %6285 = vmatprep.subr.bf16.mxu0 %v10028_v1 }
  0x25   : > { %v471_v45 = vor.u32 %v469_v39, %v467_v31  ;;  %v7588_v39 = vld [vmem:[%s10006_s1 + $0x140] sm:$0xff]  }
  0x27   : > { %6286 = vmatpush3.bf16.msra.mxu0 %v7543_v10  ;;  %v7946_v10 = vsel %vm368_vm1, %v407_v7, %v411_v43  ;;  %v255_v43 = vld [vmem:[%s7812_s29 + $0x74] sm:$0xf]  ;;  %v8013_v47 = vsel %vm368_vm1, %v471_v45, %v475_v40 }
  0x28   : > { %6287 = vmatprep.subr.bf16.mxu0 %v10028_v1  ;;  %v8108_v7 = vld [vmem:[%s10006_s1 + $0xf0] sm:$0xff]  }
  0x2b   : > { %6288 = vmatpush3.bf16.msra.mxu0 %v7544_v16  ;;  %v7955_v16 = vsel %vm368_vm1, %v415_v13, %v419_v44  ;;  %v8004_v44 = vsel %vm368_vm1, %v463_v38, %v467_v31  ;;  %v8198_v13 = vld [vmem:[%s7812_s29 + $0x78] sm:$0xf]  ;;  %v938_v38 = vrot.slane %v8217_v36, 1 }
  0x2c   : > { %6349 = vmatprep.subr.bf16.mxu0 %v10028_v1  ;;  %v5392_v19 = vcombine.low %v8198_v13, %v8198_v13 }
  0x2e   : > { %6290 = vmatmul.mubr.bf16.vlgmr.msra.gmra.mrb[0].mxu0 %v380_v26  ;;  %v431_v26 = vor.u32 %v429_v46, %v427_v49  ;;  %v8010_v46 = vcombine.low %v8000_v42, %v255_v43 }
  0x2f   : > { %6350 = vmatpush3.bf16.msra.mxu0 %v7547_v27  ;;  %6293 = vmatprep.mubr.msk.bf16.mxu0 %vm7750_vm0, %v10028_v1 }
  0x30   : > { %6351 = vmatprep.subr.bf16.mxu0 %v10028_v1  ;;  %v7971_v27 = vsel %vm368_vm1, %v431_v26, %v435_v54  ;;  %10031 = vst [vmem:[#allocation3_spill] sm:$0xff] %v8010_v46  ;;  %v481_v49 = vshll.u32 %v8010_v46, 16  ;;  %v5343_v26 = vcombine.low %v8000_v42, %v8000_v42 }
  0x32   : > { %v483_v51 = vrot.slane %v481_v49, 1 }
  0x33   : > { %6352 = vmatpush3.bf16.msra.mxu0 %v7550_v34  ;;  %v447_v34 = vor.u32 %v445_v55, %v443_v57  ;;  %v485_v55 = vshrl.u32 %v8010_v46, 16  ;;  %v8033_v57 = vld [vmem:[%s10006_s1 + $0xc0] sm:$0xff]  }
  0x34   : > { %6353 = vmatprep.subr.bf16.mxu0 %v10028_v1  ;;  %7325 = vmatpush3.bf16.msra.mxu1 %v8033_v57 }
  0x35   : > { %v7987_v35 = vsel %vm368_vm1, %v447_v34, %v451_v0  ;;  %7318 = vmatprep.subr.bf16.mxu1 %v10028_v1  ;;  %v7571_v0 = vld [vmem:[%s10006_s1 + $0x98] sm:$0xff]   ;;  %v937_v34 = vrot.slane %v7718_v33, 1 }
  0x36   : > { %6294 = vmatmul.mubr.bf16.gmra.mrb[4].mxu0 %v7901_v53 }
  0x37   : > { %6297 = vmatprep.mubr.msk.bf16.mxu0 %vm7750_vm0, %v10028_v1  ;;  %6354 = vmatpush3.bf16.msra.mxu0 %v7552_v48  ;;  %v477_v48 = vshrl.u32 %v7977_v29, 16  ;;  %v939_v45 = vsel %vm936_vm2, %v937_v34, %v938_v38 }
  0x38   : > { %6355 = vmatprep.subr.bf16.mxu0 %v10028_v1  ;;  %7326 = vmatpush3.bf16.msra.mxu1 %v8045_v59 }
  0x39   : > { %v479_v50 = vor.u32 %v477_v48, %v475_v40  ;;  %7319 = vmatprep.subr.bf16.mxu1 %v10028_v1  ;;  %v7590_v48 = vld [vmem:[%s10006_s1 + $0x148] sm:$0xff]  }
  0x3b   : > { %6356 = vmatpush3.bf16.msra.mxu0 %v7555_v56  ;;  %v8021_v54 = vsel %vm368_vm1, %v479_v50, %v483_v51  ;;  %v8027_v56 = vor.u32 %v485_v55, %v483_v51  ;;  %v8237_v50 = vld [vmem:[%s7812_s29 + $0x10] sm:$0xff]  }
  0x3c   : > { %6357 = vmatprep.subr.bf16.mxu0 %v10028_v1  ;;  %v940_v51 = vrot.slane %v8237_v50, 1  ;;  %v7592_v55 = vld [vmem:[%s10006_s1 + $0x150] sm:$0xff]  }
  0x3e   : > { %6298 = vmatmul.mubr.bf16.gmra.mrb[8].mxu0 %v7917_v61 }
  0x3f   : > { %6301 = vmatprep.mubr.msk.bf16.mxu0 %vm7750_vm0, %v10028_v1  ;;  %6358 = vmatpush3.bf16.msra.mxu0 %v7558_v60  ;;  %v7569_v60 = vld [vmem:[%s10006_s1 + $0x88] sm:$0xff]  }
  0x40   : > { %6359 = vmatprep.subr.bf16.mxu0 %v10028_v1 }
  0x43   : > { %6360 = vmatpush3.bf16.msra.mxu0 %v7561_v62  ;;  %v8058_v62 = vld [vmem:[%s10006_s1 + $0xd0] sm:$0xff]  }
  0x44   : > { %6361 = vmatprep.subr.bf16.mxu0 %v10028_v1  ;;  %7327 = vmatpush3.bf16.msra.mxu1 %v8058_v62 }
  0x45   : > { %7320 = vmatprep.subr.bf16.mxu1 %v10028_v1 }
  0x46   : > { %6302 = vmatmul.mubr.bf16.gmra.mrb[12].mxu0 %v7932_v4 }
  0x47   : > { %6305 = vmatprep.mubr.msk.bf16.mxu0 %vm7750_vm0, %v10028_v1  ;;  %6362 = vmatpush3.bf16.msra.mxu0 %v7564_v3  ;;  %v8094_v3 = vld [vmem:[%s10006_s1 + $0xe8] sm:$0xff]  }
  0x48   : > { %6363 = vmatprep.subr.bf16.mxu0 %v10028_v1  ;;  %7328 = vmatpush3.bf16.msra.mxu1 %v8069_v63 }
  0x49   : > { %7321 = vmatprep.subr.bf16.mxu1 %v10028_v1 }
  0x4b   : > { %6364 = vmatpush3.bf16.msra.mxu0 %v7567_v5  ;;  %v7573_v5 = vld [vmem:[%s10006_s1 + $0xa8] sm:$0xff]  }
  0x4c   : > { %6425 = vmatprep.subr.bf16.mxu0 %v10028_v1  ;;  %7329 = vmatpush3.bf16.msra.mxu1 %v8083_v2 }
  0x4d   : > { %7322 = vmatprep.subr.bf16.mxu1 %v10028_v1 }
  0x4e   : > { %6306 = vmatmul.mubr.bf16.gmra.mrb[16].mxu0 %v7946_v10 }
  0x4f   : > { %6309 = vmatprep.mubr.msk.bf16.mxu0 %vm7750_vm0, %v10028_v1 }
  0x50   : > { %7330 = vmatpush3.bf16.msra.mxu1 %v8094_v3 }
  0x51   : > { %7323 = vmatprep.subr.bf16.mxu1 %v10028_v1 }
  0x54   : > { %7331 = vmatpush3.bf16.msra.mxu1 %v8108_v7 }
  0x55   : > { %7324 = vmatprep.subr.bf16.mxu1 %v10028_v1 }
  0x56   : > { %6310 = vmatmul.mubr.bf16.gmra.mrb[20].mxu0 %v7955_v16 }
  0x57   : > { %6313 = vmatprep.mubr.msk.bf16.mxu0 %vm7750_vm0, %v10028_v1 }
  0x58   : > { %7332 = vmatpush3.bf16.msra.mxu1 %v8119_v11 }
  0x59   : > { %6653 = vmatprep.subr.bf16.mxu1 %v10028_v1 }
  0x5b   : > { %6534 = vmatmul.mubr.bf16.vlgmr.msra.gmra.mrb[0].mxu1 %v7852_v18 }
  0x5c   : > { %6537 = vmatprep.mubr.msk.bf16.mxu1 %vm7750_vm0, %v10028_v1  ;;  %6654 = vmatpush3.bf16.msra.mxu1 %v7588_v39  ;;  %v7723_v39 = vld [vmem:[%s7812_s29 + $0x28] sm:$0xff]  }
  0x5d   : > { %6655 = vmatprep.subr.bf16.mxu1 %v10028_v1 }
  0x5e   : > { %6314 = vmatmul.mubr.bf16.gmra.mrb[24].mxu0 %v7964_v22 }
  0x5f   : > { %6317 = vmatprep.mubr.msk.bf16.mxu0 %vm7750_vm0, %v10028_v1 }
  0x60   : > { %6656 = vmatpush3.bf16.msra.mxu1 %v7590_v48 }
  0x61   : > { %6657 = vmatprep.subr.bf16.mxu1 %v10028_v1 }
  0x63   : > { %6538 = vmatmul.mubr.bf16.gmra.mrb[4].mxu1 %v7855_v21 }
  0x64   : > { %6541 = vmatprep.mubr.msk.bf16.mxu1 %vm7750_vm0, %v10028_v1  ;;  %6658 = vmatpush3.bf16.msra.mxu1 %v7592_v55 }
  0x65   : > { %6659 = vmatprep.subr.bf16.mxu1 %v10028_v1 }
  0x66   : > { %6318 = vmatmul.mubr.bf16.gmra.mrb[28].mxu0 %v7971_v27 }
  0x67   : > { %6321 = vmatprep.mubr.msk.bf16.mxu0 %vm7750_vm0, %v10028_v1 }
  0x6b   : > { %6542 = vmatmul.mubr.bf16.gmra.mrb[8].mxu1 %v7860_v23 }
  0x6c   : > { %6545 = vmatprep.mubr.msk.bf16.mxu1 %vm7750_vm0, %v10028_v1 }
  0x6e   : > { %6322 = vmatmul.mubr.bf16.gmra.mrb[32].mxu0 %v7980_v30 }
  0x6f   : > { %6325 = vmatprep.mubr.msk.bf16.mxu0 %vm7750_vm0, %v10028_v1 }
  0x73   : > { %6546 = vmatmul.mubr.bf16.gmra.mrb[12].mxu1 %v7874_v32 }
  0x74   : > { %6549 = vmatprep.mubr.msk.bf16.mxu1 %vm7750_vm0, %v10028_v1 }
  0x76   : > { %6326 = vmatmul.mubr.bf16.gmra.mrb[36].mxu0 %v7987_v35 }
  0x77   : > { %6329 = vmatprep.mubr.msk.bf16.mxu0 %vm7750_vm0, %v10028_v1 }
  0x7b   : > { %6550 = vmatmul.mubr.bf16.gmra.mrb[16].mxu1 %v7884_v41 }
  0x7c   : > { %6553 = vmatprep.mubr.msk.bf16.mxu1 %vm7750_vm0, %v10028_v1 }
  0x7e   : > { %6330 = vmatmul.mubr.bf16.gmra.mrb[40].mxu0 %v7993_v37 }
  0x7f   : > { %6333 = vmatprep.mubr.msk.bf16.mxu0 %vm7750_vm0, %v10028_v1 }
  0x83   : > { %6554 = vmatmul.mubr.bf16.gmra.mrb[20].mxu1 %v7898_v52 }
  0x84   : > { %6557 = vmatprep.mubr.msk.bf16.mxu1 %vm7750_vm0, %v10028_v1 }
  0x86   : > { %6334 = vmatmul.mubr.bf16.gmra.mrb[44].mxu0 %v8004_v44 }
  0x87   : > { %6337 = vmatprep.mubr.msk.bf16.mxu0 %vm7750_vm0, %v10028_v1 }
  0x8b   : > { %6558 = vmatmul.mubr.bf16.gmra.mrb[24].mxu1 %v7942_v9 }
  0x8c   : > { %6561 = vmatprep.mubr.msk.bf16.mxu1 %vm7750_vm0, %v10028_v1 }
  0x8e   : > { %6338 = vmatmul.mubr.bf16.gmra.mrb[48].mxu0 %v8013_v47 }
  0x8f   : > { %6341 = vmatprep.mubr.msk.bf16.mxu0 %vm7750_vm0, %v10028_v1 }
  0x93   : > { %6562 = vmatmul.mubr.bf16.gmra.mrb[28].mxu1 %v7961_v20 }
  0x94   : > { %6565 = vmatprep.mubr.msk.bf16.mxu1 %vm7750_vm0, %v10028_v1 }
  0x96   : > { %6342 = vmatmul.mubr.bf16.gmra.mrb[52].mxu0 %v8021_v54 }
  0x97   : > { %6345 = vmatprep.mubr.msk.bf16.mxu0 %vm7750_vm0, %v10028_v1 }
  0x9b   : > { %6566 = vmatmul.mubr.bf16.gmra.mrb[32].mxu1 %v7977_v29 }
  0x9c   : > { %6569 = vmatprep.mubr.msk.bf16.mxu1 %vm7750_vm0, %v10028_v1 }
  0x9e   : > { %6346 = vmatmul.mubr.bf16.gmra.mrb[56].mxu0 %v8027_v56 }
  0x9f   : > { %6365 = vmatprep.mubr.msk.bf16.mxu0 %vm7750_vm0, %v10028_v1 }
  0xa3   : > { %6570 = vmatmul.mubr.bf16.gmra.mrb[36].mxu1 %v8010_v46 }
  0xa4   : > { %6573 = vmatprep.mubr.msk.bf16.mxu1 %vm7750_vm0, %v10028_v1 }
  0xa6   : > { %6366 = vmatmul.mubr.bf16.vlgmr.msra.gmra.mrb[60].mxu0 %v7822_v6  ;;  %v7570_v6 = vld [vmem:[%s10006_s1 + $0x90] sm:$0xff]  }
  0xa7   : > { %6426 = vmatpush3.bf16.msra.mxu0 %v7568_v58  ;;  %6369 = vmatprep.mubr.msk.bf16.mxu0 %vm7750_vm0, %v10028_v1 }
  0xa8   : > { %6427 = vmatprep.subr.bf16.mxu0 %v10028_v1 }
  0xab   : > { %6428 = vmatpush3.bf16.msra.mxu0 %v7569_v60  ;;  %6574 = vmatmul.mubr.bf16.gmra.mrb[40].mxu1 %v5392_v19  ;;  %v8285_v19 = vld [vmem:[%s7812_s29 + $0x20] sm:$0xff]  }
  0xac   : > { %6429 = vmatprep.subr.bf16.mxu0 %v10028_v1  ;;  %6669 = vmatprep.mubr.msk.bf16.mxu1 %vm7750_vm0, %v10028_v1 }
  0xae   : > { %6370 = vmatmul.mubr.bf16.gmra.mrb[64].mxu0 %v7829_v8  ;;  %v7572_v8 = vld [vmem:[%s10006_s1 + $0xa0] sm:$0xff]  }
  0xaf   : > { %6373 = vmatprep.mubr.msk.bf16.mxu0 %vm7750_vm0, %v10028_v1  ;;  %6430 = vmatpush3.bf16.msra.mxu0 %v7570_v6  ;;  %v941_v6 = vsel %vm936_vm2, %v938_v38, %v940_v51 }
  0xb0   : > { %6431 = vmatprep.subr.bf16.mxu0 %v10028_v1 }
  0xb3   : > { %6432 = vmatpush3.bf16.msra.mxu0 %v7571_v0  ;;  %v7594_v0 = vld [vmem:[%s10006_s1 + $0x158] sm:$0xff]  }
  0xb4   : > { %6433 = vmatprep.subr.bf16.mxu0 %v10028_v1  ;;  %6660 = vmatpush3.bf16.msra.mxu1 %v7594_v0 }
  0xb5   : > { %6661 = vmatprep.subr.bf16.mxu1 %v10028_v1 }
  0xb6   : > { %6374 = vmatmul.mubr.bf16.gmra.mrb[68].mxu0 %v7840_v14  ;;  %v7574_v14 = vld [vmem:[%s10006_s1 + $0xb0] sm:$0xff]  }
  0xb7   : > { %6377 = vmatprep.mubr.msk.bf16.mxu0 %vm7750_vm0, %v10028_v1  ;;  %6434 = vmatpush3.bf16.msra.mxu0 %v7572_v8 }
  0xb8   : > { %6435 = vmatprep.subr.bf16.mxu0 %v10028_v1 }
  0xbb   : > { %6436 = vmatpush3.bf16.msra.mxu0 %v7573_v5  ;;  %v8259_v5 = vld [vmem:[%s7812_s29 + $0x18] sm:$0xff]  }
  0xbc   : > { %6437 = vmatprep.subr.bf16.mxu0 %v10028_v1 }
  0xbe   : > { %6378 = vmatmul.mubr.bf16.gmra.mrb[72].mxu0 %v7843_v15 }
  0xbf   : > { %6381 = vmatprep.mubr.msk.bf16.mxu0 %vm7750_vm0, %v10028_v1  ;;  %6438 = vmatpush3.bf16.msra.mxu0 %v7574_v14  ;;  %v942_v14 = vrot.slane %v8259_v5, 1 }
  0xc0   : > { %6439 = vmatprep.subr.bf16.mxu0 %v10028_v1 }
  0xc3   : > { %6440 = vmatpush3.bf16.msra.mxu0 %v7575_v12 }
  0xc4   : > { %6501 = vmatprep.subr.bf16.mxu0 %v10028_v1 }
  0xc6   : > { %6382 = vmatmul.mubr.bf16.gmra.mrb[76].mxu0 %v7849_v17 }
  0xc7   : > { %6385 = vmatprep.mubr.msk.bf16.mxu0 %vm7750_vm0, %v10028_v1 }
  0xce   : > { %6386 = vmatmul.mubr.bf16.gmra.mrb[80].mxu0 %v7852_v18 }
  0xcf   : > { %6389 = vmatprep.mubr.msk.bf16.mxu0 %vm7750_vm0, %v10028_v1 }
  0xd6   : > { %6390 = vmatmul.mubr.bf16.gmra.mrb[84].mxu0 %v7855_v21 }
  0xd7   : > { %6393 = vmatprep.mubr.msk.bf16.mxu0 %vm7750_vm0, %v10028_v1 }
  0xde   : > { %6394 = vmatmul.mubr.bf16.gmra.mrb[88].mxu0 %v7860_v23 }
  0xdf   : > { %6397 = vmatprep.mubr.msk.bf16.mxu0 %vm7750_vm0, %v10028_v1 }
  0xe6   : > { %6398 = vmatmul.mubr.bf16.gmra.mrb[92].mxu0 %v7874_v32 }
  0xe7   : > { %6401 = vmatprep.mubr.msk.bf16.mxu0 %vm7750_vm0, %v10028_v1 }
  0xee   : > { %6402 = vmatmul.mubr.bf16.gmra.mrb[96].mxu0 %v7884_v41 }
  0xef   : > { %6405 = vmatprep.mubr.msk.bf16.mxu0 %vm7750_vm0, %v10028_v1 }
  0xf6   : > { %6406 = vmatmul.mubr.bf16.gmra.mrb[100].mxu0 %v7898_v52 }
  0xf7   : > { %6409 = vmatprep.mubr.msk.bf16.mxu0 %vm7750_vm0, %v10028_v1 }
  0xfe   : > { %6410 = vmatmul.mubr.bf16.gmra.mrb[104].mxu0 %v7942_v9 }
  0xff   : > { %6413 = vmatprep.mubr.msk.bf16.mxu0 %vm7750_vm0, %v10028_v1 }
 0x101   : > { %v8181_v15 = vpop.f32.mrb[0].mxu0 }
 0x102   : > { %v6291_v17 = vpop.f32.mrb[1].mxu0 }
 0x103   : > { %v8185_v18 = vpop.f32.mrb[2].mxu0 }
 0x104   : > { %v6292_v21 = vpop.f32.mrb[3].mxu0 }
 0x106   : > { %6414 = vmatmul.mubr.bf16.gmra.mrb[108].mxu0 %v7961_v20 }
 0x107   : > { %6417 = vmatprep.mubr.msk.bf16.mxu0 %vm7750_vm0, %v10028_v1 }
 0x109   : > { %v8191_v23 = vpop.f32.mrb[4].mxu0 }
 0x10a   : > { %v6295_v32 = vpop.f32.mrb[5].mxu0 }
 0x10b   : > { %v8195_v41 = vpop.f32.mrb[6].mxu0  ;;  %v8273_v32 = vsel %vm936_vm2, %v940_v51, %v942_v14 }
 0x10c   : > { %v6296_v52 = vpop.f32.mrb[7].mxu0  ;;  %10032 = vst [vmem:[#allocation4_spill] sm:$0xff] %v8273_v32 }
 0x10e   : > { %6418 = vmatmul.mubr.bf16.gmra.mrb[112].mxu0 %v7977_v29 }
 0x10f   : > { %6421 = vmatprep.mubr.msk.bf16.mxu0 %vm7750_vm0, %v10028_v1 }
 0x111   : > { %v8205_v24 = vpop.f32.mrb[8].mxu0 }
 0x112   : > { %v6299_v25 = vpop.f32.mrb[9].mxu0 }
 0x113   : > { %v8211_v28 = vpop.f32.mrb[10].mxu0  ;;  %v944_v25 = vrot.slane %v8285_v19, 1 }
 0x114   : > { %v6300_v31 = vpop.f32.mrb[11].mxu0 }
 0x115   : > { %v8299_v34 = vsel %vm936_vm2, %v942_v14, %v944_v25  ;;  %v7725_v14 = vld [vmem:[%s7812_s29 + $0x38] sm:$0xff]  }
 0x116   : > { %6422 = vmatmul.mubr.bf16.gmra.mrb[116].mxu0 %v5343_v26  ;;  %10033 = vst [vmem:[#allocation5_spill] sm:$0xff] %v8299_v34 }
 0x117   : > { %6441 = vmatprep.mubr.msk.bf16.mxu0 %vm7750_vm0, %v10028_v1 }
 0x119   : > { %v8223_v40 = vpop.f32.mrb[12].mxu0 }
 0x11a   : > { %v6303_v42 = vpop.f32.mrb[13].mxu0 }
 0x11b   : > { %v8226_v43 = vpop.f32.mrb[14].mxu0  ;;  %v946_v42 = vrot.slane %v7723_v39, 1 }
 0x11c   : > { %v6304_v49 = vpop.f32.mrb[15].mxu0 }
 0x11d   : > { %v8320_v49 = vsel %vm936_vm2, %v944_v25, %v946_v42 }
 0x11e   : > { %6442 = vmatmul.mubr.bf16.vlgmr.msra.gmra.mrb[120].mxu0 %v939_v45  ;;  %10034 = vst [vmem:[#allocation6_spill] sm:$0xff] %v8320_v49 }
 0x11f   : > { %6502 = vmatpush3.bf16.msra.mxu0 %v8033_v57  ;;  %6445 = vmatprep.mubr.msk.bf16.mxu0 %vm7750_vm0, %v10028_v1 }
 0x120   : > { %6503 = vmatprep.subr.bf16.mxu0 %v10028_v1 }
 0x121   : > { %v8244_v58 = vpop.f32.mrb[16].mxu0 }
 0x122   : > { %v6307_v60 = vpop.f32.mrb[17].mxu0 }
 0x123   : > { %v8247_v57 = vpop.f32.mrb[18].mxu0  ;;  %6504 = vmatpush3.bf16.msra.mxu0 %v8045_v59  ;;  %v7596_v59 = vld [vmem:[%s10006_s1 + $0x160] sm:$0xff]  }
 0x124   : > { %v6308_v8 = vpop.f32.mrb[19].mxu0  ;;  %6505 = vmatprep.subr.bf16.mxu0 %v10028_v1  ;;  %6662 = vmatpush3.bf16.msra.mxu1 %v7596_v59  ;;  %v950_v59 = vrot.slane %v7725_v14, 1 }
 0x125   : > { %6663 = vmatprep.subr.bf16.mxu1 %v10028_v1 }
 0x126   : > { %6446 = vmatmul.mubr.bf16.gmra.mrb[124].mxu0 %v941_v6 }
 0x127   : > { %6449 = vmatprep.mubr.msk.bf16.mxu0 %vm7750_vm0, %v10028_v1  ;;  %6506 = vmatpush3.bf16.msra.mxu0 %v8058_v62  ;;  %v7598_v62 = vld [vmem:[%s10006_s1 + $0x168] sm:$0xff]  }
 0x128   : > { %6507 = vmatprep.subr.bf16.mxu0 %v10028_v1  ;;  %6664 = vmatpush3.bf16.msra.mxu1 %v7598_v62 }
 0x129   : > { %v8267_v12 = vpop.f32.mrb[20].mxu0  ;;  %6665 = vmatprep.subr.bf16.mxu1 %v10028_v1 }
 0x12a   : > { %v6311_v17 = vpop.f32.mrb[21].mxu0 }
 0x12b   : > { %v8270_v21 = vpop.f32.mrb[22].mxu0  ;;  %6508 = vmatpush3.bf16.msra.mxu0 %v8069_v63  ;;  %v7600_v63 = vld [vmem:[%s10006_s1 + $0x170] sm:$0xff]  }
 0x12c   : > { %v6312_v52 = vpop.f32.mrb[23].mxu0  ;;  %6509 = vmatprep.subr.bf16.mxu0 %v10028_v1  ;;  %6666 = vmatpush3.bf16.msra.mxu1 %v7600_v63 }
 0x12d   : > { %6667 = vmatprep.subr.bf16.mxu1 %v10028_v1 }
 0x12e   : > { %6450 = vmatmul.mubr.bf16.gmra.mrb[128].mxu0 %v8273_v32 }
 0x12f   : > { %6453 = vmatprep.mubr.msk.bf16.mxu0 %vm7750_vm0, %v10028_v1  ;;  %6510 = vmatpush3.bf16.msra.mxu0 %v8083_v2  ;;  %v7602_v2 = vld [vmem:[%s10006_s1 + $0x178] sm:$0xff]  }
 0x130   : > { %6511 = vmatprep.subr.bf16.mxu0 %v10028_v1  ;;  %6668 = vmatpush3.bf16.msra.mxu1 %v7602_v2 }
 0x131   : > { %v8293_v26 = vpop.f32.mrb[24].mxu0  ;;  %6805 = vmatprep.subr.bf16.mxu1 %v10028_v1 }
 0x132   : > { %v6315_v31 = vpop.f32.mrb[25].mxu0 }
 0x133   : > { %v8296_v33 = vpop.f32.mrb[26].mxu0  ;;  %6512 = vmatpush3.bf16.msra.mxu0 %v8094_v3  ;;  %6670 = vmatmul.mubr.bf16.vlgmr.msra.gmra.mrb[44].mxu1 %v941_v6  ;;  %v7726_v31 = vld [vmem:[%s7812_s29 + $0x40] sm:$0xff]  }
 0x134   : > { %v6316_v38 = vpop.f32.mrb[27].mxu0  ;;  %6513 = vmatprep.subr.bf16.mxu0 %v10028_v1  ;;  %6673 = vmatprep.mubr.msk.bf16.mxu1 %vm7750_vm0, %v10028_v1  ;;  %v952_v2 = vrot.slane %v7726_v31, 1 }
 0x136   : > { %6454 = vmatmul.mubr.bf16.gmra.mrb[132].mxu0 %v8299_v34 }
 0x137   : > { %6457 = vmatprep.mubr.msk.bf16.mxu0 %vm7750_vm0, %v10028_v1  ;;  %6514 = vmatpush3.bf16.msra.mxu0 %v8108_v7  ;;  %v7724_v7 = vld [vmem:[%s7812_s29 + $0x30] sm:$0xff]  }
 0x138   : > { %6515 = vmatprep.subr.bf16.mxu0 %v10028_v1  ;;  %v948_v55 = vrot.slane %v7724_v7, 1  ;;  %v7727_v7 = vld [vmem:[%s7812_s29 + $0x48] sm:$0xff]  }
 0x139   : > { %v8313_v3 = vpop.f32.mrb[28].mxu0 }
 0x13a   : > { %v6319_v45 = vpop.f32.mrb[29].mxu0  ;;  %v8336_v0 = vsel %vm936_vm2, %v946_v42, %v948_v55  ;;  %v8350_v25 = vsel %vm936_vm2, %v948_v55, %v950_v59  ;;  %v954_v55 = vrot.slane %v7727_v7, 1 }
 0x13b   : > { %v8317_v48 = vpop.f32.mrb[30].mxu0  ;;  %6516 = vmatpush3.bf16.msra.mxu0 %v8119_v11  ;;  %6674 = vmatmul.mubr.bf16.gmra.mrb[48].mxu1 %v8273_v32  ;;  %10035 = vst [vmem:[#allocation7_spill] sm:$0xff] %v8336_v0  ;;  %10036 = vst [vmem:[#allocation8_spill] sm:$0xff] %v8350_v25  ;;  %v8364_v45 = vsel %vm936_vm2, %v950_v59, %v952_v2 }
 0x13c   : > { %v6320_v51 = vpop.f32.mrb[31].mxu0  ;;  %6577 = vmatprep.subr.bf16.mxu0 %v10028_v1  ;;  %6677 = vmatprep.mubr.msk.bf16.mxu1 %vm7750_vm0, %v10028_v1  ;;  %10037 = vst [vmem:[#allocation9_spill] sm:$0xff] %v8364_v45  ;;  %v8378_v59 = vsel %vm936_vm2, %v952_v2, %v954_v55 }
 0x13d   : > { %10038 = vst [vmem:[#allocation10_spill] sm:$0xff] %v8378_v59 }
 0x13e   : > { %6458 = vmatmul.mubr.bf16.gmra.mrb[136].mxu0 %v8320_v49 }
 0x13f   : > { %6461 = vmatprep.mubr.msk.bf16.mxu0 %vm7750_vm0, %v10028_v1 }
 0x141   : > { %v8329_v60 = vpop.f32.mrb[32].mxu0 }
 0x142   : > { %v6323_v6 = vpop.f32.mrb[33].mxu0 }
 0x143   : > { %v8333_v11 = vpop.f32.mrb[34].mxu0  ;;  %6678 = vmatmul.mubr.bf16.gmra.mrb[52].mxu1 %v8299_v34 }
 0x144   : > { %v6324_v8 = vpop.f32.mrb[35].mxu0  ;;  %6681 = vmatprep.mubr.msk.bf16.mxu1 %vm7750_vm0, %v10028_v1 }
 0x146   : > { %6462 = vmatmul.mubr.bf16.gmra.mrb[140].mxu0 %v8336_v0 }
 0x147   : > { %6465 = vmatprep.mubr.msk.bf16.mxu0 %vm7750_vm0, %v10028_v1 }
 0x149   : > { %v8343_v17 = vpop.f32.mrb[36].mxu0 }
 0x14a   : > { %v6327_v62 = vpop.f32.mrb[37].mxu0 }
 0x14b   : > { %v8347_v52 = vpop.f32.mrb[38].mxu0  ;;  %6682 = vmatmul.mubr.bf16.gmra.mrb[56].mxu1 %v8320_v49 }
 0x14c   : > { %v6328_v63 = vpop.f32.mrb[39].mxu0  ;;  %6685 = vmatprep.mubr.msk.bf16.mxu1 %vm7750_vm0, %v10028_v1 }
 0x14d   : > { %v7728_v63 = vld [vmem:[%s7812_s29 + $0x50] sm:$0xff]  }
 0x14e   : > { %6466 = vmatmul.mubr.bf16.gmra.mrb[144].mxu0 %v8350_v25  ;;  %v956_v31 = vrot.slane %v7728_v63, 1 }
 0x14f   : > { %6469 = vmatprep.mubr.msk.bf16.mxu0 %vm7750_vm0, %v10028_v1 }
 0x150   : > { %v8392_v2 = vsel %vm936_vm2, %v954_v55, %v956_v31 }
 0x151   : > { %v8357_v38 = vpop.f32.mrb[40].mxu0  ;;  %10039 = vst [vmem:[#allocation11_spill] sm:$0xff] %v8392_v2 }
 0x152   : > { %v6331_v39 = vpop.f32.mrb[41].mxu0 }
 0x153   : > { %v8361_v42 = vpop.f32.mrb[42].mxu0  ;;  %6686 = vmatmul.mubr.bf16.gmra.mrb[60].mxu1 %v8336_v0 }
 0x154   : > { %v6332_v51 = vpop.f32.mrb[43].mxu0  ;;  %6689 = vmatprep.mubr.msk.bf16.mxu1 %vm7750_vm0, %v10028_v1 }
 0x156   : > { %6470 = vmatmul.mubr.bf16.gmra.mrb[148].mxu0 %v8364_v45 }
 0x157   : > { %6473 = vmatprep.mubr.msk.bf16.mxu0 %vm7750_vm0, %v10028_v1 }
 0x159   : > { %v8371_v6 = vpop.f32.mrb[44].mxu0 }
 0x15a   : > { %v6335_v8 = vpop.f32.mrb[45].mxu0 }
 0x15b   : > { %v8375_v14 = vpop.f32.mrb[46].mxu0  ;;  %6690 = vmatmul.mubr.bf16.gmra.mrb[64].mxu1 %v8350_v25 }
 0x15c   : > { %v6336_v62 = vpop.f32.mrb[47].mxu0  ;;  %6693 = vmatprep.mubr.msk.bf16.mxu1 %vm7750_vm0, %v10028_v1 }
 0x15d   : > { %v958_v62 = vrot.slane %v7942_v9, 1  ;;  %v960_v9 = vrot.slane %v7961_v20, 1  ;;  %v962_v20 = vrot.slane %v7977_v29, 1  ;;  %v8440_v29 = vrot.slane %v8010_v46, 1 }
 0x15e   : > { %6474 = vmatmul.mubr.bf16.gmra.mrb[152].mxu0 %v8378_v59 }
 0x15f   : > { %6477 = vmatprep.mubr.msk.bf16.mxu0 %vm7750_vm0, %v10028_v1  ;;  %v8406_v55 = vsel %vm936_vm2, %v956_v31, %v958_v62  ;;  %v8418_v31 = vsel %vm936_vm2, %v958_v62, %v960_v9 }
 0x160   : > { %10040 = vst [vmem:[#allocation12_spill] sm:$0xff] %v8406_v55  ;;  %10041 = vst [vmem:[#allocation13_spill] sm:$0xff] %v8418_v31 }
 0x161   : > { %v8385_v39 = vpop.f32.mrb[48].mxu0 }
 0x162   : > { %v6339_v51 = vpop.f32.mrb[49].mxu0 }
 0x163   : > { %v8389_v7 = vpop.f32.mrb[50].mxu0  ;;  %6694 = vmatmul.mubr.bf16.gmra.mrb[68].mxu1 %v8364_v45 }
 0x164   : > { %v6340_v8 = vpop.f32.mrb[51].mxu0  ;;  %6697 = vmatprep.mubr.msk.bf16.mxu1 %vm7750_vm0, %v10028_v1 }
 0x166   : > { %6478 = vmatmul.mubr.bf16.gmra.mrb[156].mxu0 %v8392_v2 }
 0x167   : > { %6481 = vmatprep.mubr.msk.bf16.mxu0 %vm7750_vm0, %v10028_v1 }
 0x169   : > { %v8399_v63 = vpop.f32.mrb[52].mxu0 }
 0x16a   : > { %v6343_v51 = vpop.f32.mrb[53].mxu0 }
 0x16b   : > { %v8403_v25 = vpop.f32.mrb[54].mxu0  ;;  %6698 = vmatmul.mubr.bf16.gmra.mrb[72].mxu1 %v8378_v59 }
 0x16c   : > { %v6344_v8 = vpop.f32.mrb[55].mxu0  ;;  %6701 = vmatprep.mubr.msk.bf16.mxu1 %vm7750_vm0, %v10028_v1 }
 0x16e   : > { %6482 = vmatmul.mubr.bf16.gmra.mrb[160].mxu0 %v8406_v55 }
 0x16f   : > { %6485 = vmatprep.mubr.msk.bf16.mxu0 %vm7750_vm0, %v10028_v1 }
 0x171   : > { %v8413_v45 = vpop.f32.mrb[56].mxu0 }
 0x172   : > { %v6347_v51 = vpop.f32.mrb[57].mxu0 }
 0x173   : > { %v700_v0 = vpop.f32.mrb[58].mxu0  ;;  %6702 = vmatmul.mubr.bf16.gmra.mrb[76].mxu1 %v8392_v2  ;;  %v8431_v51 = vsel %vm936_vm2, %v960_v9, %v962_v20  ;;  %v8450_v9 = vsel %vm936_vm2, %v962_v20, %v8440_v29  ;;  %v7597_v2 = vld [vmem:[%s10006_s1 + $0x128] sm:$0xff]  }
 0x174   : > { %v6348_v8 = vpop.f32.mrb[59].mxu0  ;;  %6705 = vmatprep.mubr.msk.bf16.mxu1 %vm7750_vm0, %v10028_v1  ;;  %10042 = vst [vmem:[#allocation14_spill] sm:$0xff] %v8431_v51  ;;  %10043 = vst [vmem:[#allocation15_spill] sm:$0xff] %v8450_v9 }
 0x176   : > { %6486 = vmatmul.mubr.bf16.gmra.mrb[164].mxu0 %v8418_v31 }
 0x177   : > { %6489 = vmatprep.mubr.msk.bf16.mxu0 %vm7750_vm0, %v10028_v1 }
 0x179   : > { %v801_v59 = vpop.f32.mrb[60].mxu0 }
 0x17a   : > { %v6367_v49 = vpop.f32.mrb[61].mxu0  ;;  %v8428_v0 = vadd.f32 %v801_v59, %v8181_v15 }
 0x17b   : > { %v804_v62 = vpop.f32.mrb[62].mxu0  ;;  %6706 = vmatmul.mubr.bf16.gmra.mrb[80].mxu1 %v8406_v55  ;;  %v7589_v55 = vld [vmem:[%s10006_s1 + $0x108] sm:$0xff]  }
 0x17c   : > { %v6368_v8 = vpop.f32.mrb[63].mxu0  ;;  %v8434_v34 = vadd.f32 %v804_v62, %v8185_v18  ;;  %6709 = vmatprep.mubr.msk.bf16.mxu1 %vm7750_vm0, %v10028_v1 }
 0x17e   : > { %6490 = vmatmul.mubr.bf16.gmra.mrb[168].mxu0 %v8431_v51 }
 0x17f   : > { %6493 = vmatprep.mubr.msk.bf16.mxu0 %vm7750_vm0, %v10028_v1 }
 0x181   : > { %v809_v15 = vpop.f32.mrb[64].mxu0 }
 0x182   : > { %v6371_v49 = vpop.f32.mrb[65].mxu0  ;;  %v8446_v59 = vadd.f32 %v809_v15, %v8191_v23 }
 0x183   : > { %v812_v18 = vpop.f32.mrb[66].mxu0  ;;  %6710 = vmatmul.mubr.bf16.gmra.mrb[84].mxu1 %v8418_v31 }
 0x184   : > { %v6372_v62 = vpop.f32.mrb[67].mxu0  ;;  %v8453_v8 = vadd.f32 %v812_v18, %v8195_v41  ;;  %6713 = vmatprep.mubr.msk.bf16.mxu1 %vm7750_vm0, %v10028_v1  ;;  %v7610_v18 = vld [vmem:[%s10006_s1 + $0x1c0] sm:$0xff]  }
 0x185   : > { %6806 = vmatpush3.bf16.msra.mxu1 %v7610_v18  ;;  %v7611_v18 = vld [vmem:[%s10006_s1 + $0x1c8] sm:$0xff]  }
 0x186   : > { %6494 = vmatmul.mubr.bf16.gmra.mrb[172].mxu0 %v8450_v9  ;;  %6807 = vmatprep.subr.bf16.mxu1 %v10028_v1 }
 0x187   : > { %6497 = vmatprep.mubr.msk.bf16.mxu0 %vm7750_vm0, %v10028_v1 }
 0x189   : > { %v817_v49 = vpop.f32.mrb[68].mxu0  ;;  %6808 = vmatpush3.bf16.msra.mxu1 %v7611_v18 }
 0x18a   : > { %v6375_v23 = vpop.f32.mrb[69].mxu0  ;;  %v8462_v15 = vadd.f32 %v817_v49, %v8205_v24  ;;  %6809 = vmatprep.subr.bf16.mxu1 %v10028_v1 }
 0x18b   : > { %v820_v20 = vpop.f32.mrb[70].mxu0  ;;  %6714 = vmatmul.mubr.bf16.gmra.mrb[88].mxu1 %v8431_v51 }
 0x18c   : > { %v6376_v62 = vpop.f32.mrb[71].mxu0  ;;  %v8465_v41 = vadd.f32 %v820_v20, %v8211_v28  ;;  %6717 = vmatprep.mubr.msk.bf16.mxu1 %vm7750_vm0, %v10028_v1  ;;  %v7587_v20 = vld [vmem:[%s10006_s1 + $0x100] sm:$0xff]  }
 0x18d   : > { %v8483_v62 = vpop.f32.mrb[0].mxu1 }
 0x18e   : > { %6498 = vmatmul.mubr.bf16.gmra.mrb[176].mxu0 %v8440_v29 }
 0x18f   : > { %6517 = vmatprep.mubr.msk.bf16.mxu0 %vm7750_vm0, %v10028_v1 }
 0x191   : > { %v825_v23 = vpop.f32.mrb[72].mxu0 }
 0x192   : > { %v6379_v24 = vpop.f32.mrb[73].mxu0  ;;  %v8477_v28 = vadd.f32 %v825_v23, %v8223_v40  ;;  %v6535_v40 = vpop.f32.mrb[1].mxu1 }
 0x193   : > { %v828_v49 = vpop.f32.mrb[74].mxu0  ;;  %v8491_v23 = vpop.f32.mrb[2].mxu1  ;;  %6718 = vmatmul.mubr.bf16.gmra.mrb[92].mxu1 %v8450_v9  ;;  %v7591_v40 = vld [vmem:[%s10006_s1 + $0x110] sm:$0xff]  }
 0x194   : > { %v6380_v51 = vpop.f32.mrb[75].mxu0  ;;  %v8489_v24 = vadd.f32 %v828_v49, %v8226_v43  ;;  %v6536_v31 = vpop.f32.mrb[3].mxu1  ;;  %v7612_v43 = vld [vmem:[%s10006_s1 + $0x1d0] sm:$0xff]   ;;  %6721 = vmatprep.mubr.msk.bf16.mxu1 %vm7750_vm0, %v10028_v1 }
 0x195   : > { %v257_v51 = vld [vmem:[%s7812_s29 + $0x7c] sm:$0xf]  ;;  %6810 = vmatpush3.bf16.msra.mxu1 %v7612_v43  ;;  %v8518_v9 = vpop.f32.mrb[4].mxu1 }
 0x196   : > { %6518 = vmatmul.mubr.bf16.vlgmr.msra.gmra.mrb[180].mxu0 %v8217_v36  ;;  %6811 = vmatprep.subr.bf16.mxu1 %v10028_v1  ;;  %v7613_v43 = vld [vmem:[%s10006_s1 + $0x1d8] sm:$0xff]  }
 0x197   : > { %6578 = vmatpush3.bf16.msra.mxu0 %v7587_v20  ;;  %6521 = vmatprep.mubr.msk.bf16.mxu0 %vm7750_vm0, %v10028_v1  ;;  %v8513_v20 = vcombine.low %v8198_v13, %v257_v51  ;;  %v6539_v13 = vpop.f32.mrb[5].mxu1 }
 0x198   : > { %6579 = vmatprep.subr.bf16.mxu0 %v10028_v1  ;;  %v8527_v51 = vpop.f32.mrb[6].mxu1  ;;  %v7595_v13 = vld [vmem:[%s10006_s1 + $0x120] sm:$0xff]  }
 0x199   : > { %v833_v36 = vpop.f32.mrb[76].mxu0  ;;  %10044 = vst [vmem:[#allocation16_spill] sm:$0xff] %v8513_v20  ;;  %6812 = vmatpush3.bf16.msra.mxu1 %v7613_v43 }
 0x19a   : > { %v6383_v31 = vpop.f32.mrb[77].mxu0  ;;  %v8509_v49 = vadd.f32 %v833_v36, %v8244_v58  ;;  %6813 = vmatprep.subr.bf16.mxu1 %v10028_v1  ;;  %v6540_v36 = vpop.f32.mrb[7].mxu1 }
 0x19b   : > { %v836_v18 = vpop.f32.mrb[78].mxu0  ;;  %6580 = vmatpush3.bf16.msra.mxu0 %v7589_v55  ;;  %v8530_v55 = vrot.slane %v8513_v20, 1  ;;  %v8558_v36 = vpop.f32.mrb[8].mxu1 }
 0x19c   : > { %v6384_v31 = vpop.f32.mrb[79].mxu0  ;;  %6581 = vmatprep.subr.bf16.mxu0 %v10028_v1  ;;  %v8525_v58 = vadd.f32 %v836_v18, %v8247_v57 }
 0x19d   : > { %10045 = vst [vmem:[#allocation17_spill] sm:$0xff] %v8530_v55  ;;  %v7593_v31 = vld [vmem:[%s10006_s1 + $0x118] sm:$0xff]   ;;  %v8542_v57 = vsel %vm936_vm2, %v8440_v29, %v8530_v55 }
 0x19e   : > { %6522 = vmatmul.mubr.bf16.gmra.mrb[184].mxu0 %v8237_v50  ;;  %10046 = vst [vmem:[#allocation18_spill] sm:$0xff] %v8542_v57  ;;  %v7617_v50 = vld [vmem:[%s10006_s1 + $0x1e0] sm:$0xff]   ;;  %6722 = vmatmul.mubr.bf16.gmra.mrb[96].mxu1 %v8542_v57 }
 0x19f   : > { %6582 = vmatpush3.bf16.msra.mxu0 %v7591_v40  ;;  %6525 = vmatprep.mubr.msk.bf16.mxu0 %vm7750_vm0, %v10028_v1 }
 0x1a0   : > { %6583 = vmatprep.subr.bf16.mxu0 %v10028_v1  ;;  %6814 = vmatpush3.bf16.msra.mxu1 %v7617_v50  ;;  %v7618_v50 = vld [vmem:[%s10006_s1 + $0x1e8] sm:$0xff]  }
 0x1a1   : > { %v841_v18 = vpop.f32.mrb[80].mxu0  ;;  %6725 = vmatprep.mubr.msk.bf16.mxu1 %vm7750_vm0, %v10028_v1  ;;  %6815 = vmatprep.subr.bf16.mxu1 %v10028_v1 }
 0x1a2   : > { %v6387_v40 = vpop.f32.mrb[81].mxu0  ;;  %v8552_v43 = vadd.f32 %v841_v18, %v8267_v12  ;;  %v6543_v18 = vpop.f32.mrb[9].mxu1 }
 0x1a3   : > { %v844_v29 = vpop.f32.mrb[82].mxu0  ;;  %6584 = vmatpush3.bf16.msra.mxu0 %v7593_v31  ;;  %v8567_v40 = vpop.f32.mrb[10].mxu1 }
 0x1a4   : > { %v6388_v57 = vpop.f32.mrb[83].mxu0  ;;  %6585 = vmatprep.subr.bf16.mxu0 %v10028_v1  ;;  %v8565_v12 = vadd.f32 %v844_v29, %v8270_v21  ;;  %6816 = vmatpush3.bf16.msra.mxu1 %v7618_v50  ;;  %v6544_v31 = vpop.f32.mrb[11].mxu1  ;;  %v7619_v21 = vld [vmem:[%s10006_s1 + $0x1f0] sm:$0xff]  }
 0x1a5   : > { %6817 = vmatprep.subr.bf16.mxu1 %v10028_v1  ;;  %v7599_v50 = vld [vmem:[%s10006_s1 + $0x130] sm:$0xff]   ;;  %v8590_v18 = vpop.f32.mrb[12].mxu1  ;;  %v7620_v31 = vld [vmem:[%s10006_s1 + $0x1f8] sm:$0xff]  }
 0x1a6   : > { %6526 = vmatmul.mubr.bf16.gmra.mrb[188].mxu0 %v8259_v5  ;;  %6726 = vmatmul.mubr.bf16.gmra.mrb[100].mxu1 %v8530_v55  ;;  %v7601_v55 = vld [vmem:[%s10006_s1 + $0x138] sm:$0xff]  }
 0x1a7   : > { %6586 = vmatpush3.bf16.msra.mxu0 %v7595_v13  ;;  %6529 = vmatprep.mubr.msk.bf16.mxu0 %vm7750_vm0, %v10028_v1 }
 0x1a8   : > { %6587 = vmatprep.subr.bf16.mxu0 %v10028_v1  ;;  %6818 = vmatpush3.bf16.msra.mxu1 %v7619_v21 }
 0x1a9   : > { %v849_v5 = vpop.f32.mrb[84].mxu0  ;;  %6821 = vmatprep.mubr.msk.bf16.mxu1 %vm7750_vm0, %v10028_v1  ;;  %6819 = vmatprep.subr.bf16.mxu1 %v10028_v1 }
 0x1aa   : > { %v6391_v57 = vpop.f32.mrb[85].mxu0  ;;  %v8584_v29 = vadd.f32 %v849_v5, %v8293_v26  ;;  %v6547_v5 = vpop.f32.mrb[13].mxu1 }
 0x1ab   : > { %v852_v13 = vpop.f32.mrb[86].mxu0  ;;  %6588 = vmatpush3.bf16.msra.mxu0 %v7597_v2  ;;  %v8599_v57 = vpop.f32.mrb[14].mxu1 }
 0x1ac   : > { %v6392_v21 = vpop.f32.mrb[87].mxu0  ;;  %6589 = vmatprep.subr.bf16.mxu0 %v10028_v1  ;;  %v8597_v26 = vadd.f32 %v852_v13, %v8296_v33  ;;  %6820 = vmatpush3.bf16.msra.mxu1 %v7620_v31  ;;  %v6548_v2 = vpop.f32.mrb[15].mxu1  ;;  %v7603_v31 = vld [vmem:[%s10006_s1 + $0x180] sm:$0xff]  }
 0x1ad   : > { %v8617_v21 = vpop.f32.mrb[16].mxu1 }
 0x1ae   : > { %6530 = vmatmul.mubr.bf16.gmra.mrb[192].mxu0 %v8285_v19  ;;  %v6551_v32 = vpop.f32.mrb[17].mxu1 }
 0x1af   : > { %6590 = vmatpush3.bf16.msra.mxu0 %v7599_v50  ;;  %6593 = vmatprep.mubr.msk.bf16.mxu0 %vm7750_vm0, %v10028_v1  ;;  %v8623_v46 = vpop.f32.mrb[18].mxu1 }
 0x1b0   : > { %6591 = vmatprep.subr.bf16.mxu0 %v10028_v1  ;;  %6822 = vmatmul.mubr.bf16.vlgmr.msra.gmra.mrb[104].mxu1 %v7917_v61  ;;  %10047 = vst [vmem:[#allocation19_spill] sm:$0xff] %v8623_v46 }
 0x1b1   : > { %v857_v33 = vpop.f32.mrb[88].mxu0  ;;  %6825 = vmatprep.mubr.msk.bf16.mxu1 %vm7750_vm0, %v10028_v1 }
 0x1b2   : > { %v6395_v13 = vpop.f32.mrb[89].mxu0  ;;  %v8612_v19 = vadd.f32 %v857_v33, %v8313_v3  ;;  %v6552_v3 = vpop.f32.mrb[19].mxu1 }
 0x1b3   : > { %v860_v50 = vpop.f32.mrb[90].mxu0  ;;  %6592 = vmatpush3.bf16.msra.mxu0 %v7601_v55  ;;  %v7604_v55 = vld [vmem:[%s10006_s1 + $0x188] sm:$0xff]   ;;  %v7605_v13 = vld [vmem:[%s10006_s1 + $0x190] sm:$0xff]  }
 0x1b4   : > { %v6396_v5 = vpop.f32.mrb[91].mxu0  ;;  %6729 = vmatprep.subr.bf16.mxu0 %v10028_v1  ;;  %v8621_v2 = vadd.f32 %v860_v50, %v8317_v48  ;;  %v8641_v50 = vpop.f32.mrb[20].mxu1 }
 0x1b5   : > { %v6555_v3 = vpop.f32.mrb[21].mxu1 }
 0x1b6   : > { %6594 = vmatmul.mubr.bf16.vlgmr.msra.gmra.mrb[196].mxu0 %v7901_v53  ;;  %v8647_v46 = vpop.f32.mrb[22].mxu1 }
 0x1b7   : > { %6730 = vmatpush3.bf16.msra.mxu0 %v7603_v31  ;;  %6597 = vmatprep.mubr.msk.bf16.mxu0 %vm7750_vm0, %v10028_v1  ;;  %10048 = vst [vmem:[#allocation20_spill] sm:$0xff] %v8647_v46 }
 0x1b8   : > { %6731 = vmatprep.subr.bf16.mxu0 %v10028_v1  ;;  %6826 = vmatmul.mubr.bf16.gmra.mrb[108].mxu1 %v7932_v4 }
 0x1b9   : > { %v865_v48 = vpop.f32.mrb[92].mxu0  ;;  %6829 = vmatprep.mubr.msk.bf16.mxu1 %vm7750_vm0, %v10028_v1 }
 0x1ba   : > { %v6399_v32 = vpop.f32.mrb[93].mxu0  ;;  %v8636_v53 = vadd.f32 %v865_v48, %v8329_v60  ;;  %v6556_v60 = vpop.f32.mrb[23].mxu1 }
 0x1bb   : > { %v868_v33 = vpop.f32.mrb[94].mxu0  ;;  %6732 = vmatpush3.bf16.msra.mxu0 %v7604_v55  ;;  %v7606_v55 = vld [vmem:[%s10006_s1 + $0x198] sm:$0xff]  }
 0x1bc   : > { %v6400_v31 = vpop.f32.mrb[95].mxu0  ;;  %6733 = vmatprep.subr.bf16.mxu0 %v10028_v1  ;;  %v8645_v5 = vadd.f32 %v868_v33, %v8333_v11  ;;  %v7607_v33 = vld [vmem:[%s10006_s1 + $0x1a0] sm:$0xff]  }
 0x1be   : > { %6598 = vmatmul.mubr.bf16.gmra.mrb[200].mxu0 %v7917_v61 }
 0x1bf   : > { %6601 = vmatprep.mubr.msk.bf16.mxu0 %vm7750_vm0, %v10028_v1  ;;  %6734 = vmatpush3.bf16.msra.mxu0 %v7605_v13  ;;  %v8665_v13 = vpop.f32.mrb[24].mxu1 }
 0x1c0   : > { %6735 = vmatprep.subr.bf16.mxu0 %v10028_v1  ;;  %6830 = vmatmul.mubr.bf16.gmra.mrb[112].mxu1 %v7946_v10  ;;  %v6559_v60 = vpop.f32.mrb[25].mxu1 }
 0x1c1   : > { %v873_v11 = vpop.f32.mrb[96].mxu0  ;;  %6833 = vmatprep.mubr.msk.bf16.mxu1 %vm7750_vm0, %v10028_v1  ;;  %v8671_v46 = vpop.f32.mrb[26].mxu1 }
 0x1c2   : > { %v6403_v48 = vpop.f32.mrb[97].mxu0  ;;  %v8660_v61 = vadd.f32 %v873_v11, %v8343_v17  ;;  %10049 = vst [vmem:[#allocation21_spill] sm:$0xff] %v8671_v46  ;;  %v6560_v17 = vpop.f32.mrb[27].mxu1 }
 0x1c3   : > { %v876_v32 = vpop.f32.mrb[98].mxu0  ;;  %6736 = vmatpush3.bf16.msra.mxu0 %v7606_v55  ;;  %v7608_v55 = vld [vmem:[%s10006_s1 + $0x1a8] sm:$0xff]  }
 0x1c4   : > { %v6404_v31 = vpop.f32.mrb[99].mxu0  ;;  %6737 = vmatprep.subr.bf16.mxu0 %v10028_v1  ;;  %v8669_v3 = vadd.f32 %v876_v32, %v8347_v52  ;;  %v7609_v32 = vld [vmem:[%s10006_s1 + $0x1b0] sm:$0xff]  }
 0x1c6   : > { %6602 = vmatmul.mubr.bf16.gmra.mrb[204].mxu0 %v7932_v4 }
 0x1c7   : > { %6605 = vmatprep.mubr.msk.bf16.mxu0 %vm7750_vm0, %v10028_v1  ;;  %6738 = vmatpush3.bf16.msra.mxu0 %v7607_v33  ;;  %v8689_v33 = vpop.f32.mrb[28].mxu1 }
 0x1c8   : > { %6739 = vmatprep.subr.bf16.mxu0 %v10028_v1  ;;  %6834 = vmatmul.mubr.bf16.gmra.mrb[116].mxu1 %v7955_v16  ;;  %v6563_v17 = vpop.f32.mrb[29].mxu1 }
 0x1c9   : > { %v881_v52 = vpop.f32.mrb[100].mxu0  ;;  %6837 = vmatprep.mubr.msk.bf16.mxu1 %vm7750_vm0, %v10028_v1  ;;  %v8695_v46 = vpop.f32.mrb[30].mxu1 }
 0x1ca   : > { %v6407_v11 = vpop.f32.mrb[101].mxu0  ;;  %v8684_v4 = vadd.f32 %v881_v52, %v8357_v38  ;;  %10050 = vst [vmem:[#allocation22_spill] sm:$0xff] %v8695_v46  ;;  %v6564_v38 = vpop.f32.mrb[31].mxu1 }
 0x1cb   : > { %v884_v48 = vpop.f32.mrb[102].mxu0  ;;  %6740 = vmatpush3.bf16.msra.mxu0 %v7608_v55  ;;  %v7616_v55 = vld [vmem:[%s10006_s1 + $0x1b8] sm:$0xff]  }
 0x1cc   : > { %v6408_v31 = vpop.f32.mrb[103].mxu0  ;;  %6741 = vmatprep.subr.bf16.mxu0 %v10028_v1  ;;  %v8693_v60 = vadd.f32 %v884_v48, %v8361_v42  ;;  %v8710_v48 = vpop.f32.mrb[32].mxu1 }
 0x1cd   : > { %v6567_v17 = vpop.f32.mrb[33].mxu1 }
 0x1ce   : > { %6606 = vmatmul.mubr.bf16.gmra.mrb[208].mxu0 %v7946_v10  ;;  %v8716_v38 = vpop.f32.mrb[34].mxu1 }
 0x1cf   : > { %6609 = vmatprep.mubr.msk.bf16.mxu0 %vm7750_vm0, %v10028_v1  ;;  %6742 = vmatpush3.bf16.msra.mxu0 %v7609_v32  ;;  %v6568_v46 = vpop.f32.mrb[35].mxu1 }
 0x1d0   : > { %6743 = vmatprep.subr.bf16.mxu0 %v10028_v1  ;;  %6838 = vmatmul.mubr.bf16.gmra.mrb[120].mxu1 %v7964_v22 }
 0x1d1   : > { %v889_v42 = vpop.f32.mrb[104].mxu0  ;;  %6841 = vmatprep.mubr.msk.bf16.mxu1 %vm7750_vm0, %v10028_v1 }
 0x1d2   : > { %v6411_v52 = vpop.f32.mrb[105].mxu0  ;;  %v8708_v10 = vadd.f32 %v889_v42, %v8371_v6 }
 0x1d3   : > { %v892_v11 = vpop.f32.mrb[106].mxu0  ;;  %6744 = vmatpush3.bf16.msra.mxu0 %v7616_v55  ;;  %v8727_v52 = vpop.f32.mrb[36].mxu1 }
 0x1d4   : > { %v6412_v32 = vpop.f32.mrb[107].mxu0  ;;  %6881 = vmatprep.subr.bf16.mxu0 %v10028_v1  ;;  %v8714_v31 = vadd.f32 %v892_v11, %v8375_v14  ;;  %v6571_v46 = vpop.f32.mrb[37].mxu1 }
 0x1d5   : > { %v8732_v32 = vpop.f32.mrb[38].mxu1 }
 0x1d6   : > { %6610 = vmatmul.mubr.bf16.gmra.mrb[212].mxu0 %v7955_v16  ;;  %10051 = vst [vmem:[#allocation23_spill] sm:$0xff] %v8732_v32  ;;  %v6572_v17 = vpop.f32.mrb[39].mxu1 }
 0x1d7   : > { %6613 = vmatprep.mubr.msk.bf16.mxu0 %vm7750_vm0, %v10028_v1 }
 0x1d8   : > { %6842 = vmatmul.mubr.bf16.gmra.mrb[124].mxu1 %v7971_v27 }
 0x1d9   : > { %v897_v6 = vpop.f32.mrb[108].mxu0  ;;  %6845 = vmatprep.mubr.msk.bf16.mxu1 %vm7750_vm0, %v10028_v1 }
 0x1da   : > { %v6415_v55 = vpop.f32.mrb[109].mxu0  ;;  %v8725_v42 = vadd.f32 %v897_v6, %v8385_v39 }
 0x1db   : > { %v900_v14 = vpop.f32.mrb[110].mxu0 }
 0x1dc   : > { %v6416_v11 = vpop.f32.mrb[111].mxu0  ;;  %v8730_v16 = vadd.f32 %v900_v14, %v8389_v7  ;;  %v8743_v14 = vpop.f32.mrb[40].mxu1 }
 0x1dd   : > { %v6575_v46 = vpop.f32.mrb[41].mxu1 }
 0x1de   : > { %6614 = vmatmul.mubr.bf16.gmra.mrb[216].mxu0 %v7964_v22  ;;  %v1429_v17 = vpop.f32.mrb[42].mxu1 }
 0x1df   : > { %6617 = vmatprep.mubr.msk.bf16.mxu0 %vm7750_vm0, %v10028_v1  ;;  %v6576_v32 = vpop.f32.mrb[43].mxu1 }
 0x1e0   : > { %6846 = vmatmul.mubr.bf16.gmra.mrb[128].mxu1 %v7980_v30 }
 0x1e1   : > { %v905_v39 = vpop.f32.mrb[112].mxu0  ;;  %6849 = vmatprep.mubr.msk.bf16.mxu1 %vm7750_vm0, %v10028_v1 }
 0x1e2   : > { %v6419_v6 = vpop.f32.mrb[113].mxu0  ;;  %v8741_v55 = vadd.f32 %v905_v39, %v8399_v63 }
 0x1e3   : > { %v908_v7 = vpop.f32.mrb[114].mxu0 }
 0x1e4   : > { %v6420_v11 = vpop.f32.mrb[115].mxu0  ;;  %v8746_v22 = vadd.f32 %v908_v7, %v8403_v25 }
 0x1e6   : > { %6618 = vmatmul.mubr.bf16.gmra.mrb[220].mxu0 %v7971_v27 }
 0x1e7   : > { %6621 = vmatprep.mubr.msk.bf16.mxu0 %vm7750_vm0, %v10028_v1 }
 0x1e8   : > { %6850 = vmatmul.mubr.bf16.gmra.mrb[132].mxu1 %v7987_v35 }
 0x1e9   : > { %v913_v6 = vpop.f32.mrb[116].mxu0  ;;  %6853 = vmatprep.mubr.msk.bf16.mxu1 %vm7750_vm0, %v10028_v1 }
 0x1ea   : > { %v6423_v63 = vpop.f32.mrb[117].mxu0  ;;  %v8755_v39 = vadd.f32 %v913_v6, %v8413_v45 }
 0x1eb   : > { %v916_v25 = vpop.f32.mrb[118].mxu0 }
 0x1ec   : > { %v6424_v7 = vpop.f32.mrb[119].mxu0 }
 0x1ee   : > { %6622 = vmatmul.mubr.bf16.gmra.mrb[224].mxu0 %v7980_v30 }
 0x1ef   : > { %6625 = vmatprep.mubr.msk.bf16.mxu0 %vm7750_vm0, %v10028_v1 }
 0x1f0   : > { %6854 = vmatmul.mubr.bf16.gmra.mrb[136].mxu1 %v7993_v37 }
 0x1f1   : > { %v1063_v27 = vpop.f32.mrb[120].mxu0  ;;  %6857 = vmatprep.mubr.msk.bf16.mxu1 %vm7750_vm0, %v10028_v1 }
 0x1f2   : > { %v8764_v32 = vadd.f32 %v1063_v27, %v8428_v0  ;;  %v6443_v11 = vpop.f32.mrb[121].mxu0 }
 0x1f3   : > { %v1066_v46 = vpop.f32.mrb[122].mxu0  ;;  %v1482_v11 = vshll.u32 %v8513_v20, 16 }
 0x1f4   : > { %v8767_v45 = vadd.f32 %v1066_v46, %v8434_v34  ;;  %v6444_v17 = vpop.f32.mrb[123].mxu0 }
 0x1f6   : > { %6626 = vmatmul.mubr.bf16.gmra.mrb[228].mxu0 %v7987_v35 }
 0x1f7   : > { %6629 = vmatprep.mubr.msk.bf16.mxu0 %vm7750_vm0, %v10028_v1 }
 0x1f8   : > { %6858 = vmatmul.mubr.bf16.gmra.mrb[140].mxu1 %v8004_v44 }
 0x1f9   : > { %v1071_v30 = vpop.f32.mrb[124].mxu0  ;;  %6861 = vmatprep.mubr.msk.bf16.mxu1 %vm7750_vm0, %v10028_v1 }
 0x1fa   : > { %v8776_v0 = vadd.f32 %v1071_v30, %v8446_v59  ;;  %v6447_v6 = vpop.f32.mrb[125].mxu0  ;;  %v1484_v30 = vrot.slane %v1482_v11, 1 }
 0x1fb   : > { %v1074_v63 = vpop.f32.mrb[126].mxu0 }
 0x1fc   : > { %v8779_v34 = vadd.f32 %v1074_v63, %v8453_v8  ;;  %v6448_v25 = vpop.f32.mrb[127].mxu0 }
 0x1fd   : > { %v8809_v25 = vld [vmem:[%s7812_s29 + $0x80] sm:$0xf] }
 0x1fe   : > { %6630 = vmatmul.mubr.bf16.gmra.mrb[232].mxu0 %v7993_v37  ;;  %10053 = vst [vmem:[#allocation25_spill] sm:$0xff] %v8809_v25 }
 0x1ff   : > { %6633 = vmatprep.mubr.msk.bf16.mxu0 %vm7750_vm0, %v10028_v1 }
 0x200   : > { %6862 = vmatmul.mubr.bf16.gmra.mrb[144].mxu1 %v8013_v47 }
 0x201   : > { %v1079_v35 = vpop.f32.mrb[128].mxu0  ;;  %6865 = vmatprep.mubr.msk.bf16.mxu1 %vm7750_vm0, %v10028_v1 }
 0x202   : > { %v8788_v59 = vadd.f32 %v1079_v35, %v8462_v15  ;;  %v6451_v7 = vpop.f32.mrb[129].mxu0  ;;  %v259_v35 = vld [vmem:[%s7812_s29 + $0x84] sm:$0xf] }
 0x203   : > { %v1082_v27 = vpop.f32.mrb[130].mxu0  ;;  %v8820_v11 = vcombine.low %v8809_v25, %v259_v35 }
 0x204   : > { %v8791_v8 = vadd.f32 %v1082_v27, %v8465_v41  ;;  %v6452_v37 = vpop.f32.mrb[131].mxu0 }
 0x205   : > { %10055 = vst [vmem:[#allocation27_spill] sm:$0xff] %v8820_v11 }
 0x206   : > { %6634 = vmatmul.mubr.bf16.gmra.mrb[236].mxu0 %v8004_v44  ;;  %v8803_v6 = vpop.f32.mrb[44].mxu1 }
 0x207   : > { %6637 = vmatprep.mubr.msk.bf16.mxu0 %vm7750_vm0, %v10028_v1  ;;  %10052 = vst [vmem:[#allocation24_spill] sm:$0xff] %v8803_v6  ;;  %v6671_v7 = vpop.f32.mrb[45].mxu1 }
 0x208   : > { %6866 = vmatmul.mubr.bf16.gmra.mrb[148].mxu1 %v8021_v54  ;;  %v8812_v27 = vpop.f32.mrb[46].mxu1  ;;  %v2242_v7 = vshll.u32 %v8820_v11, 16 }
 0x209   : > { %v1087_v46 = vpop.f32.mrb[132].mxu0  ;;  %6869 = vmatprep.mubr.msk.bf16.mxu1 %vm7750_vm0, %v10028_v1  ;;  %10054 = vst [vmem:[#allocation26_spill] sm:$0xff] %v8812_v27  ;;  %v6672_v37 = vpop.f32.mrb[47].mxu1 }
 0x20a   : > { %v8801_v15 = vadd.f32 %v1087_v46, %v8477_v28  ;;  %v6455_v41 = vpop.f32.mrb[133].mxu0  ;;  %v1485_v28 = vsel %vm368_vm1, %v8027_v56, %v1484_v30  ;;  %v1486_v46 = vshrl.u32 %v8513_v20, 16  ;;  %v2244_v6 = vrot.slane %v2242_v7, 1 }
 0x20b   : > { %v1090_v17 = vpop.f32.mrb[134].mxu0  ;;  %v2246_v7 = vshrl.u32 %v8820_v11, 16  ;;  %v7737_v11 = vld [vmem:[%s7812_s29 + $0x50] sm:$0xff]  }
 0x20c   : > { %v8806_v44 = vadd.f32 %v1090_v17, %v8489_v24  ;;  %v6456_v63 = vpop.f32.mrb[135].mxu0  ;;  %v1488_v27 = vor.u32 %v1486_v46, %v1484_v30 }
 0x20e   : > { %6638 = vmatmul.mubr.bf16.gmra.mrb[240].mxu0 %v8013_v47  ;;  %v8826_v63 = vpop.f32.mrb[48].mxu1 }
 0x20f   : > { %6641 = vmatprep.mubr.msk.bf16.mxu0 %vm7750_vm0, %v10028_v1  ;;  %v6675_v25 = vpop.f32.mrb[49].mxu1 }
 0x210   : > { %6870 = vmatmul.mubr.bf16.gmra.mrb[152].mxu1 %v1485_v28  ;;  %v8833_v20 = vpop.f32.mrb[50].mxu1 }
 0x211   : > { %v1095_v24 = vpop.f32.mrb[136].mxu0  ;;  %6873 = vmatprep.mubr.msk.bf16.mxu1 %vm7750_vm0, %v10028_v1 }
 0x212   : > { %v1189_v41 = vadd.f32 %v1095_v24, %v8509_v49  ;;  %v6459_v47 = vpop.f32.mrb[137].mxu0  ;;  %v6676_v49 = vpop.f32.mrb[51].mxu1  ;;  %v10056_v24 = vmov 0.0  }
 0x213   : > { %v1098_v17 = vpop.f32.mrb[138].mxu0 }
 0x214   : > { %v1190_v56 = vadd.f32 %v1098_v17, %v8525_v58  ;;  %v8831_v35 = vadd.f32 %v8483_v62, %v1189_v41  ;;  %v6460_v37 = vpop.f32.mrb[139].mxu0  ;;  %v2245_v58 = vsel %vm368_vm1, %v1488_v27, %v2244_v6 }
 0x216   : > { %v8836_v1 = vadd.f32 %v8491_v23, %v1190_v56  ;;  %6642 = vmatmul.mubr.bf16.gmra.mrb[244].mxu0 %v8021_v54  ;;  %v8845_v41 = vpop.f32.mrb[52].mxu1 }
 0x217   : > { %6645 = vmatprep.mubr.msk.bf16.mxu0 %vm7750_vm0, %v10056_v24  ;;  %v6679_v17 = vpop.f32.mrb[53].mxu1 }
 0x218   : > { %6874 = vmatmul.mubr.bf16.gmra.mrb[156].mxu1 %v2245_v58  ;;  %v8852_v56 = vpop.f32.mrb[54].mxu1 }
 0x219   : > { %v1103_v62 = vpop.f32.mrb[140].mxu0  ;;  %6877 = vmatprep.mubr.msk.bf16.mxu1 %vm7750_vm0, %v10056_v24  ;;  %v6680_v49 = vpop.f32.mrb[55].mxu1 }
 0x21a   : > { %v1191_v30 = vadd.f32 %v1103_v62, %v8552_v43  ;;  %v6463_v25 = vpop.f32.mrb[141].mxu0  ;;  %v2248_v43 = vor.u32 %v2246_v7, %v2244_v6 }
 0x21b   : > { %v1106_v46 = vpop.f32.mrb[142].mxu0 }
 0x21c   : > { %v1192_v23 = vadd.f32 %v1106_v46, %v8565_v12  ;;  %v8849_v54 = vadd.f32 %v8518_v9, %v1191_v30  ;;  %v6464_v47 = vpop.f32.mrb[143].mxu0 }
 0x21e   : > { %v8855_v37 = vadd.f32 %v8527_v51, %v1192_v23  ;;  %6646 = vmatmul.mubr.bf16.gmra.mrb[248].mxu0 %v1485_v28  ;;  %v8860_v30 = vpop.f32.mrb[56].mxu1 }
 0x21f   : > { %6649 = vmatprep.mubr.msk.bf16.mxu0 %vm7750_vm0, %v10056_v24  ;;  %v6683_v28 = vpop.f32.mrb[57].mxu1 }
 0x220   : > { %6878 = vmatmul.mubr.bf16.gmra.mrb[160].mxu1 %v2248_v43  ;;  %v8866_v6 = vpop.f32.mrb[58].mxu1  ;;  %v7623_v28 = vld [vmem:[%s10006_s1 + $0x210] sm:$0xff]  }
 0x221   : > { %v1111_v12 = vpop.f32.mrb[144].mxu0  ;;  %v6684_v47 = vpop.f32.mrb[59].mxu1 }
 0x222   : > { %v1193_v9 = vadd.f32 %v1111_v12, %v8584_v29  ;;  %v6467_v58 = vpop.f32.mrb[145].mxu0 }
 0x223   : > { %v1114_v62 = vpop.f32.mrb[146].mxu0 }
 0x224   : > { %v1194_v25 = vadd.f32 %v1114_v62, %v8597_v26  ;;  %v8864_v46 = vadd.f32 %v8558_v36, %v1193_v9  ;;  %v6468_v51 = vpop.f32.mrb[147].mxu0  ;;  %v7621_v36 = vld [vmem:[%s10006_s1 + $0x200] sm:$0xff]  }
 0x226   : > { %v8869_v23 = vadd.f32 %v8567_v40, %v1194_v25  ;;  %6650 = vmatmul.mubr.bf16.gmra.mrb[252].mxu0 %v1488_v27  ;;  %v8877_v43 = vpop.f32.mrb[60].mxu1 }
 0x227   : > { %6745 = vmatprep.mubr.msk.bf16.mxu0 %vm7750_vm0, %v10056_v24  ;;  %v6687_v12 = vpop.f32.mrb[61].mxu1 }
 0x228   : > { %v8883_v9 = vpop.f32.mrb[62].mxu1 }
 0x229   : > { %v1119_v29 = vpop.f32.mrb[148].mxu0  ;;  %v6688_v62 = vpop.f32.mrb[63].mxu1 }
 0x22a   : > { %v1195_v17 = vadd.f32 %v1119_v29, %v8612_v19  ;;  %v6471_v26 = vpop.f32.mrb[149].mxu0  ;;  %v7729_v19 = vld [vmem:[%s7812_s29 + $0x10] sm:$0xff]  }
 0x22b   : > { %v1122_v7 = vpop.f32.mrb[150].mxu0 }
 0x22c   : > { %v1196_v40 = vadd.f32 %v1122_v7, %v8621_v2  ;;  %v8881_v49 = vadd.f32 %v8590_v18, %v1195_v17  ;;  %v6472_v27 = vpop.f32.mrb[151].mxu0  ;;  %v7622_v2 = vld [vmem:[%s10006_s1 + $0x208] sm:$0xff]  }
 0x22d   : > { %v7730_v27 = vld [vmem:[%s7812_s29 + $0x18] sm:$0xff]  }
 0x22e   : > { %v8886_v58 = vadd.f32 %v8599_v57, %v1196_v40  ;;  %6746 = vmatmul.mubr.bf16.vlgmr.msra.gmra.mrb[0].mxu0 %v7729_v19  ;;  %v8899_v47 = vpop.f32.mrb[64].mxu1 }
 0x22f   : > { %6882 = vmatpush3.bf16.msra.mxu0 %v7621_v36  ;;  %6749 = vmatprep.mubr.msk.bf16.mxu0 %vm7750_vm0, %v10056_v24  ;;  %v6691_v7 = vpop.f32.mrb[65].mxu1 }
 0x230   : > { %6883 = vmatprep.subr.bf16.mxu0 %v10056_v24  ;;  %v8906_v36 = vpop.f32.mrb[66].mxu1 }
 0x231   : > { %v1127_v18 = vpop.f32.mrb[152].mxu0  ;;  %v6692_v12 = vpop.f32.mrb[67].mxu1 }
 0x232   : > { %v1197_v25 = vadd.f32 %v1127_v18, %v8636_v53  ;;  %v6475_v51 = vpop.f32.mrb[153].mxu0  ;;  %v10057_v53 = vld [vmem:[#allocation19_spill] sm:$0xff]  ;;  %v7625_v18 = vld [vmem:[%s10006_s1 + $0x220] sm:$0xff]  }
 0x233   : > { %v1130_v57 = vpop.f32.mrb[154].mxu0  ;;  %6884 = vmatpush3.bf16.msra.mxu0 %v7622_v2 }
 0x234   : > { %v1198_v29 = vadd.f32 %v1130_v57, %v8645_v5  ;;  %v8903_v17 = vadd.f32 %v8617_v21, %v1197_v25  ;;  %v6476_v26 = vpop.f32.mrb[155].mxu0  ;;  %6885 = vmatprep.subr.bf16.mxu0 %v10056_v24  ;;  %v7624_v21 = vld [vmem:[%s10006_s1 + $0x218] sm:$0xff]  }
 0x236   : > { %v8909_v40 = vadd.f32 %v10057_v53, %v1198_v29  ;;  %6750 = vmatmul.mubr.bf16.gmra.mrb[4].mxu0 %v7730_v27  ;;  %v8922_v25 = vpop.f32.mrb[68].mxu1  ;;  %v7731_v53 = vld [vmem:[%s7812_s29 + $0x20] sm:$0xff]  }
 0x237   : > { %6753 = vmatprep.mubr.msk.bf16.mxu0 %vm7750_vm0, %v10056_v24  ;;  %6886 = vmatpush3.bf16.msra.mxu0 %v7623_v28  ;;  %v6695_v29 = vpop.f32.mrb[69].mxu1 }
 0x238   : > { %6887 = vmatprep.subr.bf16.mxu0 %v10056_v24  ;;  %v8929_v26 = vpop.f32.mrb[70].mxu1 }
 0x239   : > { %v1135_v5 = vpop.f32.mrb[156].mxu0  ;;  %v6696_v27 = vpop.f32.mrb[71].mxu1 }
 0x23a   : > { %v1199_v19 = vadd.f32 %v1135_v5, %v8660_v61  ;;  %v6479_v62 = vpop.f32.mrb[157].mxu0  ;;  %v10058_v61 = vld [vmem:[#allocation20_spill] sm:$0xff] }
 0x23b   : > { %v1138_v2 = vpop.f32.mrb[158].mxu0  ;;  %6888 = vmatpush3.bf16.msra.mxu0 %v7624_v21 }
 0x23c   : > { %v1200_v51 = vadd.f32 %v1138_v2, %v8669_v3  ;;  %v8926_v57 = vadd.f32 %v8641_v50, %v1199_v19  ;;  %v6480_v28 = vpop.f32.mrb[159].mxu0  ;;  %6889 = vmatprep.subr.bf16.mxu0 %v10056_v24  ;;  %v7626_v50 = vld [vmem:[%s10006_s1 + $0x228] sm:$0xff]   ;;  %v7627_v19 = vld [vmem:[%s10006_s1 + $0x230] sm:$0xff]  }
 0x23e   : > { %v8932_v7 = vadd.f32 %v10058_v61, %v1200_v51  ;;  %6754 = vmatmul.mubr.bf16.gmra.mrb[8].mxu0 %v7731_v53  ;;  %v8945_v62 = vpop.f32.mrb[72].mxu1  ;;  %v7732_v53 = vld [vmem:[%s7812_s29 + $0x28] sm:$0xff]  }
 0x23f   : > { %6757 = vmatprep.mubr.msk.bf16.mxu0 %vm7750_vm0, %v10056_v24  ;;  %6890 = vmatpush3.bf16.msra.mxu0 %v7625_v18  ;;  %v6699_v28 = vpop.f32.mrb[73].mxu1 }
 0x240   : > { %6891 = vmatprep.subr.bf16.mxu0 %v10056_v24  ;;  %v8952_v29 = vpop.f32.mrb[74].mxu1 }
 0x241   : > { %v1143_v3 = vpop.f32.mrb[160].mxu0  ;;  %v6700_v27 = vpop.f32.mrb[75].mxu1 }
 0x242   : > { %v1201_v12 = vadd.f32 %v1143_v3, %v8684_v4  ;;  %v6483_v21 = vpop.f32.mrb[161].mxu0  ;;  %v10059_v4 = vld [vmem:[#allocation21_spill] sm:$0xff]  ;;  %v7733_v27 = vld [vmem:[%s7812_s29 + $0x30] sm:$0xff]  }
 0x243   : > { %v1146_v5 = vpop.f32.mrb[162].mxu0  ;;  %6892 = vmatpush3.bf16.msra.mxu0 %v7626_v50 }
 0x244   : > { %v1202_v2 = vadd.f32 %v1146_v5, %v8693_v60  ;;  %v8949_v18 = vadd.f32 %v8665_v13, %v1201_v12  ;;  %v6484_v51 = vpop.f32.mrb[163].mxu0  ;;  %6893 = vmatprep.subr.bf16.mxu0 %v10056_v24  ;;  %v7628_v13 = vld [vmem:[%s10006_s1 + $0x238] sm:$0xff]  }
 0x246   : > { %v8955_v61 = vadd.f32 %v10059_v4, %v1202_v2  ;;  %6758 = vmatmul.mubr.bf16.gmra.mrb[12].mxu0 %v7732_v53  ;;  %v8965_v21 = vpop.f32.mrb[76].mxu1  ;;  %v10060_v4 = vld [vmem:[#allocation22_spill] sm:$0xff] }
 0x247   : > { %6761 = vmatprep.mubr.msk.bf16.mxu0 %vm7750_vm0, %v10056_v24  ;;  %6894 = vmatpush3.bf16.msra.mxu0 %v7627_v19  ;;  %v6703_v51 = vpop.f32.mrb[77].mxu1 }
 0x248   : > { %6895 = vmatprep.subr.bf16.mxu0 %v10056_v24  ;;  %v8971_v28 = vpop.f32.mrb[78].mxu1 }
 0x249   : > { %v1151_v60 = vpop.f32.mrb[164].mxu0 }
 0x24a   : > { %v1203_v50 = vadd.f32 %v1151_v60, %v8708_v10  ;;  %v6487_v3 = vpop.f32.mrb[165].mxu0  ;;  %v6704_v10 = vpop.f32.mrb[79].mxu1 }
 0x24b   : > { %v1154_v12 = vpop.f32.mrb[166].mxu0  ;;  %6896 = vmatpush3.bf16.msra.mxu0 %v7628_v13 }
 0x24c   : > { %v1204_v5 = vadd.f32 %v1154_v12, %v8714_v31  ;;  %v8969_v2 = vadd.f32 %v8689_v33, %v1203_v50  ;;  %v6488_v19 = vpop.f32.mrb[167].mxu0 }
 0x24e   : > { %v8974_v53 = vadd.f32 %v10060_v4, %v1204_v5  ;;  %6762 = vmatmul.mubr.bf16.gmra.mrb[16].mxu0 %v7733_v27  ;;  %v8980_v50 = vpop.f32.mrb[80].mxu1  ;;  %v7734_v27 = vld [vmem:[%s7812_s29 + $0x38] sm:$0xff]  }
 0x24f   : > { %6765 = vmatprep.mubr.msk.bf16.mxu0 %vm7750_vm0, %v10056_v24  ;;  %v6707_v19 = vpop.f32.mrb[81].mxu1 }
 0x250   : > { %v8986_v51 = vpop.f32.mrb[82].mxu1  ;;  %v10062_v19 = vld [vmem:[#allocation23_spill] sm:$0xff] }
 0x251   : > { %v1159_v13 = vpop.f32.mrb[168].mxu0 }
 0x252   : > { %v1205_v31 = vadd.f32 %v1159_v13, %v8725_v42  ;;  %v6491_v60 = vpop.f32.mrb[169].mxu0  ;;  %v6708_v42 = vpop.f32.mrb[83].mxu1 }
 0x253   : > { %v1162_v33 = vpop.f32.mrb[170].mxu0  ;;  %v7735_v42 = vld [vmem:[%s7812_s29 + $0x40] sm:$0xff]  }
 0x254   : > { %v1206_v3 = vadd.f32 %v1162_v33, %v8730_v16  ;;  %v8984_v12 = vadd.f32 %v8710_v48, %v1205_v31  ;;  %v6492_v5 = vpop.f32.mrb[171].mxu0 }
 0x256   : > { %v8989_v4 = vadd.f32 %v8716_v38, %v1206_v3  ;;  %6766 = vmatmul.mubr.bf16.gmra.mrb[20].mxu0 %v7734_v27  ;;  %v8995_v31 = vpop.f32.mrb[84].mxu1 }
 0x257   : > { %6769 = vmatprep.mubr.msk.bf16.mxu0 %vm7750_vm0, %v10056_v24  ;;  %v6711_v3 = vpop.f32.mrb[85].mxu1 }
 0x258   : > { %v9001_v5 = vpop.f32.mrb[86].mxu1 }
 0x259   : > { %v1167_v10 = vpop.f32.mrb[172].mxu0 }
 0x25a   : > { %v1207_v16 = vadd.f32 %v1167_v10, %v8741_v55  ;;  %v6495_v13 = vpop.f32.mrb[173].mxu0  ;;  %v6712_v55 = vpop.f32.mrb[87].mxu1 }
 0x25b   : > { %v1170_v48 = vpop.f32.mrb[174].mxu0 }
 0x25c   : > { %v1208_v60 = vadd.f32 %v1170_v48, %v8746_v22  ;;  %v8999_v33 = vadd.f32 %v8727_v52, %v1207_v16  ;;  %v6496_v38 = vpop.f32.mrb[175].mxu0 }
 0x25e   : > { %10061 = vst [vmem:[#allocation19_spill] sm:$0xff] %v8999_v33  ;;  %v9004_v27 = vadd.f32 %v10062_v19, %v1208_v60  ;;  %6770 = vmatmul.mubr.bf16.gmra.mrb[24].mxu0 %v7735_v42  ;;  %v9010_v16 = vpop.f32.mrb[88].mxu1  ;;  %v7736_v19 = vld [vmem:[%s7812_s29 + $0x48] sm:$0xff]  }
 0x25f   : > { %6773 = vmatprep.mubr.msk.bf16.mxu0 %vm7750_vm0, %v10056_v24  ;;  %v6715_v60 = vpop.f32.mrb[89].mxu1 }
 0x260   : > { %10063 = vst [vmem:[#allocation20_spill] sm:$0xff] %v9004_v27  ;;  %v9015_v3 = vpop.f32.mrb[90].mxu1  ;;  %v7738_v27 = vld [vmem:[%s7812_s29 + $0x58] sm:$0xff]  }
 0x261   : > { %v1175_v10 = vpop.f32.mrb[176].mxu0  ;;  %v6716_v42 = vpop.f32.mrb[91].mxu1 }
 0x262   : > { %v1209_v22 = vadd.f32 %v1175_v10, %v8755_v39  ;;  %v6499_v13 = vpop.f32.mrb[177].mxu0 }
 0x263   : > { %v1178_v52 = vpop.f32.mrb[178].mxu0 }
 0x264   : > { %v9013_v48 = vadd.f32 %v8743_v14, %v1209_v22  ;;  %v6500_v38 = vpop.f32.mrb[179].mxu0 }
 0x266   : > { %10064 = vst [vmem:[#allocation21_spill] sm:$0xff] %v9013_v48  ;;  %6774 = vmatmul.mubr.bf16.gmra.mrb[28].mxu0 %v7736_v19  ;;  %v9021_v52 = vpop.f32.mrb[92].mxu1 }
 0x267   : > { %6777 = vmatprep.mubr.msk.bf16.mxu0 %vm7750_vm0, %v10056_v24  ;;  %10065 = vst [vmem:[#allocation22_spill] sm:$0xff] %v9021_v52  ;;  %v6719_v38 = vpop.f32.mrb[93].mxu1 }
 0x268   : > { %v9024_v60 = vpop.f32.mrb[94].mxu1 }
 0x269   : > { %v1314_v55 = vpop.f32.mrb[180].mxu0  ;;  %10066 = vst [vmem:[#allocation23_spill] sm:$0xff] %v9024_v60  ;;  %v6720_v19 = vpop.f32.mrb[95].mxu1 }
 0x26a   : > { %v1432_v39 = vadd.f32 %v1314_v55, %v8764_v32  ;;  %v6519_v10 = vpop.f32.mrb[181].mxu0 }
 0x26b   : > { %v1317_v13 = vpop.f32.mrb[182].mxu0 }
 0x26c   : > { %v1433_v14 = vadd.f32 %v1317_v13, %v8767_v45  ;;  %v6520_v22 = vpop.f32.mrb[183].mxu0 }
 0x26e   : > { %6778 = vmatmul.mubr.bf16.gmra.mrb[32].mxu0 %v7737_v11 }
 0x26f   : > { %6781 = vmatprep.mubr.msk.bf16.mxu0 %vm7750_vm0, %v10056_v24 }
 0x271   : > { %v1322_v42 = vpop.f32.mrb[184].mxu0  ;;  %v9030_v48 = vpop.f32.mrb[96].mxu1 }
 0x272   : > { %v1434_v32 = vadd.f32 %v1322_v42, %v8776_v0  ;;  %v6523_v55 = vpop.f32.mrb[185].mxu0  ;;  %10067 = vst [vmem:[#allocation28_spill] sm:$0xff] %v9030_v48  ;;  %v6723_v22 = vpop.f32.mrb[97].mxu1 }
 0x273   : > { %v1325_v10 = vpop.f32.mrb[186].mxu0  ;;  %v9033_v38 = vpop.f32.mrb[98].mxu1 }
 0x274   : > { %v1435_v45 = vadd.f32 %v1325_v10, %v8779_v34  ;;  %v6524_v13 = vpop.f32.mrb[187].mxu0  ;;  %10068 = vst [vmem:[#allocation29_spill] sm:$0xff] %v9033_v38  ;;  %v6724_v11 = vpop.f32.mrb[99].mxu1  ;;  %v7739_v38 = vld [vmem:[%s7812_s29 + $0x60] sm:$0xff]  }
 0x276   : > { %6782 = vmatmul.mubr.bf16.gmra.mrb[36].mxu0 %v7738_v27 }
 0x277   : > { %6785 = vmatprep.mubr.msk.bf16.mxu0 %vm7750_vm0, %v10056_v24 }
 0x279   : > { %v1330_v19 = vpop.f32.mrb[188].mxu0  ;;  %v9039_v33 = vpop.f32.mrb[100].mxu1 }
 0x27a   : > { %v1436_v0 = vadd.f32 %v1330_v19, %v8788_v59  ;;  %v6527_v42 = vpop.f32.mrb[189].mxu0  ;;  %10069 = vst [vmem:[#allocation30_spill] sm:$0xff] %v9039_v33  ;;  %v6727_v13 = vpop.f32.mrb[101].mxu1 }
 0x27b   : > { %v1333_v55 = vpop.f32.mrb[190].mxu0  ;;  %v1938_v22 = vpop.f32.mrb[102].mxu1  ;;  %v7740_v13 = vld [vmem:[%s7812_s29 + $0x68] sm:$0xff]  }
 0x27c   : > { %v1437_v34 = vadd.f32 %v1333_v55, %v8791_v8  ;;  %v6528_v10 = vpop.f32.mrb[191].mxu0  ;;  %v6728_v27 = vpop.f32.mrb[103].mxu1 }
 0x27e   : > { %6786 = vmatmul.mubr.bf16.gmra.mrb[40].mxu0 %v7739_v38 }
 0x27f   : > { %6789 = vmatprep.mubr.msk.bf16.mxu0 %vm7750_vm0, %v10056_v24 }
 0x281   : > { %v1338_v11 = vpop.f32.mrb[192].mxu0 }
 0x282   : > { %v1438_v48 = vadd.f32 %v1338_v11, %v8801_v15  ;;  %v6531_v59 = vpop.f32.mrb[193].mxu0 }
 0x283   : > { %v1341_v19 = vpop.f32.mrb[194].mxu0  ;;  %v9046_v42 = vpop.f32.mrb[104].mxu1 }
 0x284   : > { %10070 = vst [vmem:[#allocation31_spill] sm:$0xff] %v9046_v42  ;;  %v1439_v33 = vadd.f32 %v1341_v19, %v8806_v44  ;;  %v6532_v8 = vpop.f32.mrb[195].mxu0  ;;  %v6823_v55 = vpop.f32.mrb[105].mxu1  ;;  %v10072_v42 = vld [vmem:[#allocation24_spill] sm:$0xff] }
 0x285   : > { %v9049_v10 = vpop.f32.mrb[106].mxu1  ;;  %v10073_v55 = vld [vmem:[#allocation26_spill] sm:$0xff] }
 0x286   : > { %10071 = vst [vmem:[#allocation32_spill] sm:$0xff] %v9049_v10  ;;  %6790 = vmatmul.mubr.bf16.gmra.mrb[44].mxu0 %v7740_v13  ;;  %v6824_v38 = vpop.f32.mrb[107].mxu1 }
 0x287   : > { %6793 = vmatprep.mubr.msk.bf16.mxu0 %vm7750_vm0, %v10056_v24  ;;  %v10074_v38 = vld [vmem:[#allocation3_spill] sm:$0xff] }
 0x289   : > { %v1573_v22 = vpop.f32.mrb[196].mxu0 }
 0x28a   : > { %v1691_v27 = vadd.f32 %v1573_v22, %v1432_v39  ;;  %v6595_v60 = vpop.f32.mrb[197].mxu0 }
 0x28b   : > { %v1576_v15 = vpop.f32.mrb[198].mxu0  ;;  %v9054_v11 = vpop.f32.mrb[108].mxu1 }
 0x28c   : > { %v1692_v59 = vadd.f32 %v1576_v15, %v1433_v14  ;;  %v9057_v52 = vadd.f32 %v10072_v42, %v1691_v27  ;;  %v6596_v44 = vpop.f32.mrb[199].mxu0  ;;  %v6827_v19 = vpop.f32.mrb[109].mxu1 }
 0x28d   : > { %v9059_v8 = vpop.f32.mrb[110].mxu1 }
 0x28e   : > { %v9062_v13 = vadd.f32 %v10073_v55, %v1692_v59  ;;  %6794 = vmatmul.mubr.bf16.gmra.mrb[48].mxu0 %v10074_v38  ;;  %v6828_v10 = vpop.f32.mrb[111].mxu1 }
 0x28f   : > { %6797 = vmatprep.mubr.msk.bf16.mxu0 %vm7750_vm0, %v10056_v24  ;;  %v10076_v10 = vld [vmem:[#allocation16_spill] sm:$0xff] }
 0x291   : > { %v1581_v39 = vpop.f32.mrb[200].mxu0 }
 0x292   : > { %v1693_v60 = vadd.f32 %v1581_v39, %v1434_v32  ;;  %v6599_v22 = vpop.f32.mrb[201].mxu0  ;;  %v10077_v39 = vld [vmem:[#allocation25_spill] sm:$0xff] }
 0x293   : > { %v1584_v14 = vpop.f32.mrb[202].mxu0  ;;  %v9067_v15 = vpop.f32.mrb[112].mxu1 }
 0x294   : > { %v1694_v42 = vadd.f32 %v1584_v14, %v1435_v45  ;;  %v9070_v27 = vadd.f32 %v8826_v63, %v1693_v60  ;;  %v6600_v44 = vpop.f32.mrb[203].mxu0  ;;  %v6831_v19 = vpop.f32.mrb[113].mxu1  ;;  %v5466_v45 = vcombine.low %v10077_v39, %v10077_v39 }
 0x295   : > { %v9072_v59 = vpop.f32.mrb[114].mxu1 }
 0x296   : > { %10075 = vst [vmem:[#allocation24_spill] sm:$0xff] %v9072_v59  ;;  %v9075_v55 = vadd.f32 %v8833_v20, %v1694_v42  ;;  %6798 = vmatmul.mubr.bf16.gmra.mrb[52].mxu0 %v10076_v10  ;;  %v6832_v38 = vpop.f32.mrb[115].mxu1 }
 0x297   : > { %6801 = vmatprep.mubr.msk.bf16.mxu0 %vm7750_vm0, %v10056_v24 }
 0x299   : > { %v1589_v32 = vpop.f32.mrb[204].mxu0 }
 0x29a   : > { %v1695_v22 = vadd.f32 %v1589_v32, %v1436_v0  ;;  %v6603_v63 = vpop.f32.mrb[205].mxu0 }
 0x29b   : > { %v1592_v60 = vpop.f32.mrb[206].mxu0  ;;  %v9082_v14 = vpop.f32.mrb[116].mxu1 }
 0x29c   : > { %v1696_v44 = vadd.f32 %v1592_v60, %v1437_v34  ;;  %v9085_v19 = vadd.f32 %v8845_v41, %v1695_v22  ;;  %v6604_v20 = vpop.f32.mrb[207].mxu0  ;;  %v6835_v42 = vpop.f32.mrb[117].mxu1 }
 0x29d   : > { %v9087_v10 = vpop.f32.mrb[118].mxu1 }
 0x29e   : > { %v9090_v38 = vadd.f32 %v8852_v56, %v1696_v44  ;;  %6802 = vmatmul.mubr.bf16.gmra.mrb[56].mxu0 %v5466_v45  ;;  %v6836_v59 = vpop.f32.mrb[119].mxu1 }
 0x29f   : > { %6897 = vmatprep.mubr.msk.bf16.mxu0 %vm7750_vm0, %v10056_v24  ;;  %v10078_v59 = vld [vmem:[#allocation4_spill] sm:$0xff] }
 0x2a1   : > { %v1597_v0 = vpop.f32.mrb[208].mxu0 }
 0x2a2   : > { %v1697_v32 = vadd.f32 %v1597_v0, %v1438_v48  ;;  %v6607_v39 = vpop.f32.mrb[209].mxu0 }
 0x2a3   : > { %v1600_v63 = vpop.f32.mrb[210].mxu0  ;;  %v9094_v34 = vpop.f32.mrb[120].mxu1 }
 0x2a4   : > { %v1698_v41 = vadd.f32 %v1600_v63, %v1439_v33  ;;  %v9097_v22 = vadd.f32 %v8860_v30, %v1697_v32  ;;  %v6608_v60 = vpop.f32.mrb[211].mxu0  ;;  %v6839_v20 = vpop.f32.mrb[121].mxu1 }
 0x2a5   : > { %v9099_v42 = vpop.f32.mrb[122].mxu1  ;;  %v10079_v20 = vld [vmem:[#allocation5_spill] sm:$0xff] }
 0x2a6   : > { %v9102_v56 = vadd.f32 %v8866_v6, %v1698_v41  ;;  %6898 = vmatmul.mubr.bf16.vlgmr.msra.gmra.mrb[60].mxu0 %v10078_v59  ;;  %v6840_v45 = vpop.f32.mrb[123].mxu1 }
 0x2a7   : > { %6901 = vmatprep.mubr.msk.bf16.mxu0 %vm7750_vm0, %v10056_v24 }
 0x2a9   : > { %v1605_v48 = vpop.f32.mrb[212].mxu0 }
 0x2aa   : > { %v1699_v44 = vadd.f32 %v1605_v48, %v8831_v35  ;;  %v6611_v33 = vpop.f32.mrb[213].mxu0 }
 0x2ab   : > { %v1608_v0 = vpop.f32.mrb[214].mxu0  ;;  %v9108_v30 = vpop.f32.mrb[124].mxu1 }
 0x2ac   : > { %v1700_v32 = vadd.f32 %v1608_v0, %v8836_v1  ;;  %v9112_v39 = vadd.f32 %v8877_v43, %v1699_v44  ;;  %v6612_v6 = vpop.f32.mrb[215].mxu0  ;;  %v6843_v63 = vpop.f32.mrb[125].mxu1 }
 0x2ad   : > { %v9114_v41 = vpop.f32.mrb[126].mxu1  ;;  %v10080_v63 = vld [vmem:[#allocation6_spill] sm:$0xff] }
 0x2ae   : > { %v9117_v60 = vadd.f32 %v8883_v9, %v1700_v32  ;;  %6902 = vmatmul.mubr.bf16.gmra.mrb[64].mxu0 %v10079_v20  ;;  %v6844_v59 = vpop.f32.mrb[127].mxu1 }
 0x2af   : > { %6905 = vmatprep.mubr.msk.bf16.mxu0 %vm7750_vm0, %v10056_v24 }
 0x2b1   : > { %v1613_v35 = vpop.f32.mrb[216].mxu0 }
 0x2b2   : > { %v1701_v45 = vadd.f32 %v1613_v35, %v8849_v54  ;;  %v6615_v1 = vpop.f32.mrb[217].mxu0 }
 0x2b3   : > { %v1616_v48 = vpop.f32.mrb[218].mxu0  ;;  %v9123_v43 = vpop.f32.mrb[128].mxu1 }
 0x2b4   : > { %v1702_v44 = vadd.f32 %v1616_v48, %v8855_v37  ;;  %v9127_v33 = vadd.f32 %v8899_v47, %v1701_v45  ;;  %v6616_v9 = vpop.f32.mrb[219].mxu0  ;;  %v6847_v0 = vpop.f32.mrb[129].mxu1 }
 0x2b5   : > { %v9129_v32 = vpop.f32.mrb[130].mxu1  ;;  %v10081_v0 = vld [vmem:[#allocation7_spill] sm:$0xff] }
 0x2b6   : > { %v9132_v6 = vadd.f32 %v8906_v36, %v1702_v44  ;;  %6906 = vmatmul.mubr.bf16.gmra.mrb[68].mxu0 %v10080_v63  ;;  %v6848_v20 = vpop.f32.mrb[131].mxu1 }
 0x2b7   : > { %6909 = vmatprep.mubr.msk.bf16.mxu0 %vm7750_vm0, %v10056_v24 }
 0x2b9   : > { %v1621_v54 = vpop.f32.mrb[220].mxu0 }
 0x2ba   : > { %v1703_v59 = vadd.f32 %v1621_v54, %v8864_v46  ;;  %v6619_v37 = vpop.f32.mrb[221].mxu0 }
 0x2bb   : > { %v1624_v35 = vpop.f32.mrb[222].mxu0  ;;  %v9138_v47 = vpop.f32.mrb[132].mxu1 }
 0x2bc   : > { %v1704_v45 = vadd.f32 %v1624_v35, %v8869_v23  ;;  %v9142_v1 = vadd.f32 %v8922_v25, %v1703_v59  ;;  %v6620_v36 = vpop.f32.mrb[223].mxu0  ;;  %v6851_v48 = vpop.f32.mrb[133].mxu1 }
 0x2bd   : > { %v9144_v44 = vpop.f32.mrb[134].mxu1  ;;  %v10082_v48 = vld [vmem:[#allocation8_spill] sm:$0xff] }
 0x2be   : > { %v9147_v9 = vadd.f32 %v8929_v26, %v1704_v45  ;;  %6910 = vmatmul.mubr.bf16.gmra.mrb[72].mxu0 %v10081_v0  ;;  %v6852_v63 = vpop.f32.mrb[135].mxu1 }
 0x2bf   : > { %6913 = vmatprep.mubr.msk.bf16.mxu0 %vm7750_vm0, %v10056_v24 }
 0x2c1   : > { %v1629_v46 = vpop.f32.mrb[224].mxu0 }
 0x2c2   : > { %v1705_v20 = vadd.f32 %v1629_v46, %v8881_v49  ;;  %v6623_v23 = vpop.f32.mrb[225].mxu0 }
 0x2c3   : > { %v1632_v54 = vpop.f32.mrb[226].mxu0  ;;  %v9153_v25 = vpop.f32.mrb[136].mxu1 }
 0x2c4   : > { %v1706_v59 = vadd.f32 %v1632_v54, %v8886_v58  ;;  %v9157_v37 = vadd.f32 %v8945_v62, %v1705_v20  ;;  %v6624_v26 = vpop.f32.mrb[227].mxu0  ;;  %v6855_v35 = vpop.f32.mrb[137].mxu1 }
 0x2c5   : > { %v9159_v45 = vpop.f32.mrb[138].mxu1  ;;  %v10083_v35 = vld [vmem:[#allocation9_spill] sm:$0xff] }
 0x2c6   : > { %v9162_v36 = vadd.f32 %v8952_v29, %v1706_v59  ;;  %6914 = vmatmul.mubr.bf16.gmra.mrb[76].mxu0 %v10082_v48  ;;  %v6856_v0 = vpop.f32.mrb[139].mxu1 }
 0x2c7   : > { %6917 = vmatprep.mubr.msk.bf16.mxu0 %vm7750_vm0, %v10056_v24 }
 0x2c9   : > { %v1637_v49 = vpop.f32.mrb[228].mxu0 }
 0x2ca   : > { %v1707_v63 = vadd.f32 %v1637_v49, %v8903_v17  ;;  %v6627_v58 = vpop.f32.mrb[229].mxu0 }
 0x2cb   : > { %v1640_v46 = vpop.f32.mrb[230].mxu0  ;;  %v9168_v62 = vpop.f32.mrb[140].mxu1 }
 0x2cc   : > { %v1708_v20 = vadd.f32 %v1640_v46, %v8909_v40  ;;  %v9172_v23 = vadd.f32 %v8965_v21, %v1707_v63  ;;  %v6628_v29 = vpop.f32.mrb[231].mxu0  ;;  %v6859_v54 = vpop.f32.mrb[141].mxu1  ;;  %v7629_v46 = vld [vmem:[%s10008_s3 + $0x40] sm:$0xff]  }
 0x2cd   : > { %v9174_v59 = vpop.f32.mrb[142].mxu1  ;;  %6957 = vmatprep.subr.bf16.mxu1 %v7629_v46 }
 0x2ce   : > { %v9177_v26 = vadd.f32 %v8971_v28, %v1708_v20  ;;  %6918 = vmatmul.mubr.bf16.gmra.mrb[80].mxu0 %v10083_v35  ;;  %v6860_v48 = vpop.f32.mrb[143].mxu1  ;;  %6958 = vmatpush3.bf16.msra.mxu1 %v7629_v46  ;;  %v10085_v46 = vld [vmem:[#allocation11_spill] sm:$0xff] }
 0x2cf   : > { %6921 = vmatprep.mubr.msk.bf16.mxu0 %vm7750_vm0, %v10056_v24 }
 0x2d1   : > { %v1645_v17 = vpop.f32.mrb[232].mxu0 }
 0x2d2   : > { %v1709_v0 = vadd.f32 %v1645_v17, %v8926_v57  ;;  %v6631_v40 = vpop.f32.mrb[233].mxu0  ;;  %v10084_v57 = vld [vmem:[#allocation10_spill] sm:$0xff] }
 0x2d3   : > { %v1648_v49 = vpop.f32.mrb[234].mxu0  ;;  %v9183_v21 = vpop.f32.mrb[144].mxu1 }
 0x2d4   : > { %v1710_v63 = vadd.f32 %v1648_v49, %v8932_v7  ;;  %v9187_v58 = vadd.f32 %v8980_v50, %v1709_v0  ;;  %v6632_v28 = vpop.f32.mrb[235].mxu0  ;;  %v6863_v20 = vpop.f32.mrb[145].mxu1 }
 0x2d5   : > { %v9192_v29 = vpop.f32.mrb[146].mxu1 }
 0x2d6   : > { %v9195_v54 = vadd.f32 %v8986_v51, %v1710_v63  ;;  %6922 = vmatmul.mubr.bf16.gmra.mrb[84].mxu0 %v10084_v57  ;;  %v6864_v35 = vpop.f32.mrb[147].mxu1 }
 0x2d7   : > { %6925 = vmatprep.mubr.msk.bf16.mxu0 %vm7750_vm0, %v10056_v24 }
 0x2d9   : > { %v1653_v7 = vpop.f32.mrb[236].mxu0 }
 0x2da   : > { %v1711_v50 = vadd.f32 %v1653_v7, %v8949_v18  ;;  %v6635_v48 = vpop.f32.mrb[237].mxu0 }
 0x2db   : > { %v1656_v17 = vpop.f32.mrb[238].mxu0  ;;  %v9201_v0 = vpop.f32.mrb[148].mxu1 }
 0x2dc   : > { %v1712_v40 = vadd.f32 %v1656_v17, %v8955_v61  ;;  %v9205_v51 = vadd.f32 %v8995_v31, %v1711_v50  ;;  %v6636_v49 = vpop.f32.mrb[239].mxu0  ;;  %v6867_v63 = vpop.f32.mrb[149].mxu1  ;;  %v7630_v31 = vld [vmem:[%s10008_s3 + $0x48] sm:$0xff]  }
 0x2dd   : > { %v9207_v28 = vpop.f32.mrb[150].mxu1  ;;  %6959 = vmatprep.subr.bf16.mxu1 %v7630_v31  ;;  %v10088_v63 = vld [vmem:[#allocation12_spill] sm:$0xff] }
 0x2de   : > { %v9210_v20 = vadd.f32 %v9001_v5, %v1712_v40  ;;  %6926 = vmatmul.mubr.bf16.gmra.mrb[88].mxu0 %v10085_v46  ;;  %v6868_v57 = vpop.f32.mrb[151].mxu1  ;;  %6960 = vmatpush3.bf16.msra.mxu1 %v7630_v31  ;;  %v10090_v31 = vld [vmem:[#allocation22_spill] sm:$0xff] }
 0x2df   : > { %6929 = vmatprep.mubr.msk.bf16.mxu0 %vm7750_vm0, %v10056_v24 }
 0x2e1   : > { %v1661_v18 = vpop.f32.mrb[240].mxu0 }
 0x2e2   : > { %v1713_v35 = vadd.f32 %v1661_v18, %v8969_v2  ;;  %v6639_v61 = vpop.f32.mrb[241].mxu0 }
 0x2e3   : > { %v1664_v7 = vpop.f32.mrb[242].mxu0  ;;  %v9219_v50 = vpop.f32.mrb[152].mxu1 }
 0x2e4   : > { %10086 = vst [vmem:[#allocation26_spill] sm:$0xff] %v9219_v50  ;;  %v1714_v5 = vadd.f32 %v1664_v7, %v8974_v53  ;;  %v9223_v48 = vadd.f32 %v9010_v16, %v1713_v35  ;;  %v6640_v17 = vpop.f32.mrb[243].mxu0  ;;  %v6871_v40 = vpop.f32.mrb[153].mxu1  ;;  %v10101_v50 = vld [vmem:[#allocation21_spill] sm:$0xff] }
 0x2e5   : > { %v9225_v49 = vpop.f32.mrb[154].mxu1  ;;  %v10092_v40 = vld [vmem:[#allocation23_spill] sm:$0xff] }
 0x2e6   : > { %10087 = vst [vmem:[#allocation3_spill] sm:$0xff] %v9225_v49  ;;  %v9228_v2 = vadd.f32 %v9015_v3, %v1714_v5  ;;  %6930 = vmatmul.mubr.bf16.gmra.mrb[92].mxu0 %v10088_v63  ;;  %v6872_v46 = vpop.f32.mrb[155].mxu1 }
 0x2e7   : > { %6933 = vmatprep.mubr.msk.bf16.mxu0 %vm7750_vm0, %v10056_v24  ;;  %v10093_v46 = vld [vmem:[#allocation13_spill] sm:$0xff] }
 0x2e9   : > { %v1669_v57 = vpop.f32.mrb[244].mxu0 }
 0x2ea   : > { %v1715_v53 = vadd.f32 %v1669_v57, %v8984_v12  ;;  %v6643_v16 = vpop.f32.mrb[245].mxu0  ;;  %v10094_v57 = vld [vmem:[#allocation19_spill] sm:$0xff] }
 0x2eb   : > { %v1672_v18 = vpop.f32.mrb[246].mxu0  ;;  %v9234_v35 = vpop.f32.mrb[156].mxu1 }
 0x2ec   : > { %10089 = vst [vmem:[#allocation16_spill] sm:$0xff] %v9234_v35  ;;  %v1716_v61 = vadd.f32 %v1672_v18, %v8989_v4  ;;  %v9238_v7 = vadd.f32 %v10090_v31, %v1715_v53  ;;  %v6644_v3 = vpop.f32.mrb[247].mxu0  ;;  %v6875_v5 = vpop.f32.mrb[157].mxu1  ;;  %v7631_v53 = vld [vmem:[%s10008_s3 + $0x50] sm:$0xff]   ;;  %v10098_v35 = vld [vmem:[#allocation29_spill] sm:$0xff] }
 0x2ed   : > { %v9240_v17 = vpop.f32.mrb[158].mxu1  ;;  %v10096_v3 = vld [vmem:[#allocation20_spill] sm:$0xff]  ;;  %6961 = vmatprep.subr.bf16.mxu1 %v7631_v53 }
 0x2ee   : > { %10091 = vst [vmem:[#allocation25_spill] sm:$0xff] %v9240_v17  ;;  %v9243_v63 = vadd.f32 %v10092_v40, %v1716_v61  ;;  %6934 = vmatmul.mubr.bf16.gmra.mrb[96].mxu0 %v10093_v46  ;;  %v6876_v49 = vpop.f32.mrb[159].mxu1  ;;  %v10097_v5 = vld [vmem:[#allocation28_spill] sm:$0xff]  ;;  %6962 = vmatpush3.bf16.msra.mxu1 %v7631_v53  ;;  %v10103_v53 = vld [vmem:[#allocation15_spill] sm:$0xff] }
 0x2ef   : > { %6937 = vmatprep.mubr.msk.bf16.mxu0 %vm7750_vm0, %v10056_v24 }
 0x2f1   : > { %v1677_v12 = vpop.f32.mrb[248].mxu0 }
 0x2f2   : > { %v1717_v16 = vadd.f32 %v1677_v12, %v10094_v57  ;;  %v6647_v4 = vpop.f32.mrb[249].mxu0  ;;  %v10100_v57 = vld [vmem:[#allocation14_spill] sm:$0xff] }
 0x2f3   : > { %v1680_v18 = vpop.f32.mrb[250].mxu0  ;;  %v9252_v31 = vpop.f32.mrb[160].mxu1 }
 0x2f4   : > { %10095 = vst [vmem:[#allocation4_spill] sm:$0xff] %v9252_v31  ;;  %v1718_v61 = vadd.f32 %v1680_v18, %v10096_v3  ;;  %v9256_v40 = vadd.f32 %v10097_v5, %v1717_v16  ;;  %v6648_v49 = vpop.f32.mrb[251].mxu0  ;;  %v6879_v46 = vpop.f32.mrb[161].mxu1  ;;  %v10102_v5 = vld [vmem:[#allocation30_spill] sm:$0xff] }
 0x2f5   : > { %v2448_v17 = vpop.f32.mrb[162].mxu1 }
 0x2f6   : > { %v9259_v12 = vadd.f32 %v10098_v35, %v1718_v61  ;;  %6938 = vmatmul.mubr.bf16.gmra.mrb[100].mxu0 %v10100_v57  ;;  %v6880_v4 = vpop.f32.mrb[163].mxu1 }
 0x2f7   : > { %6941 = vmatprep.mubr.msk.bf16.mxu0 %vm7750_vm0, %v10056_v24 }
 0x2f8   : > { %10099 = vst [vmem:[#allocation5_spill] sm:$0xff] %v9259_v12  ;;  %v10104_v12 = vld [vmem:[#allocation31_spill] sm:$0xff] }
 0x2f9   : > { %v1685_v31 = vpop.f32.mrb[252].mxu0 }
 0x2fa   : > { %v1719_v18 = vadd.f32 %v1685_v31, %v10101_v50  ;;  %v6651_v3 = vpop.f32.mrb[253].mxu0 }
 0x2fb   : > { %v1688_v16 = vpop.f32.mrb[254].mxu0  ;;  %v10105_v3 = vld [vmem:[#allocation32_spill] sm:$0xff] }
 0x2fc   : > { %v9266_v49 = vadd.f32 %v10102_v5, %v1719_v18  ;;  %v6652_v46 = vpop.f32.mrb[255].mxu0  ;;  %v7632_v18 = vld [vmem:[%s10008_s3 + $0x58] sm:$0xff]   ;;  %v10106_v5 = vld [vmem:[#allocation18_spill] sm:$0xff] }
 0x2fd   : > { %6963 = vmatprep.subr.bf16.mxu1 %v7632_v18  ;;  %v10107_v46 = vld [vmem:[#allocation27_spill] sm:$0xff] }
 0x2fe   : > { %6942 = vmatmul.mubr.bf16.gmra.mrb[104].mxu0 %v10103_v53  ;;  %6964 = vmatpush3.bf16.msra.mxu1 %v7632_v18 }
 0x2ff   : > { %6945 = vmatprep.mubr.msk.bf16.mxu0 %vm7750_vm0, %v10056_v24 }
 0x301   : > { %v2074_v35 = vpop.f32.mrb[0].mxu0 }
 0x302   : > { %v2192_v17 = vadd.f32 %v2074_v35, %v9057_v52  ;;  %v6747_v61 = vpop.f32.mrb[1].mxu0  ;;  %v2497_v52 = vrot.slane %v10107_v46, 1  ;;  %v10108_v35 = vld [vmem:[#allocation17_spill] sm:$0xff] }
 0x303   : > { %v2077_v57 = vpop.f32.mrb[2].mxu0 }
 0x304   : > { %v2193_v4 = vadd.f32 %v2077_v57, %v9062_v13  ;;  %v9274_v50 = vadd.f32 %v10104_v12, %v2192_v17  ;;  %v6748_v31 = vpop.f32.mrb[3].mxu0  ;;  %v2498_v17 = vsel %vm936_vm2, %v10108_v35, %v2497_v52 }
 0x306   : > { %v9280_v16 = vadd.f32 %v10105_v3, %v2193_v4  ;;  %6946 = vmatmul.mubr.bf16.gmra.mrb[108].mxu0 %v10106_v5 }
 0x307   : > { %6949 = vmatprep.mubr.msk.bf16.mxu0 %vm7750_vm0, %v10056_v24 }
 0x309   : > { %v2082_v13 = vpop.f32.mrb[4].mxu0 }
 0x30a   : > { %v2194_v12 = vadd.f32 %v2082_v13, %v9070_v27  ;;  %v6751_v53 = vpop.f32.mrb[5].mxu0  ;;  %v7633_v27 = vld [vmem:[%s10008_s3 + $0x60] sm:$0xff]  }
 0x30b   : > { %v2085_v61 = vpop.f32.mrb[6].mxu0  ;;  %6965 = vmatprep.subr.bf16.mxu1 %v7633_v27 }
 0x30c   : > { %v2195_v57 = vadd.f32 %v2085_v61, %v9075_v55  ;;  %v9291_v4 = vadd.f32 %v9054_v11, %v2194_v12  ;;  %v6752_v31 = vpop.f32.mrb[7].mxu0  ;;  %6966 = vmatpush3.bf16.msra.mxu1 %v7633_v27  ;;  %v10109_v12 = vld [vmem:[#allocation24_spill] sm:$0xff] }
 0x30e   : > { %v9294_v3 = vadd.f32 %v9059_v8, %v2195_v57  ;;  %6950 = vmatmul.mubr.bf16.gmra.mrb[112].mxu0 %v2498_v17 }
 0x30f   : > { %6953 = vmatprep.mubr.msk.bf16.mxu0 %vm7750_vm0, %v10056_v24  ;;  %v7634_v24 = vld [vmem:[%s10008_s3 + $0x68] sm:$0xff]  }
 0x310   : > { %6967 = vmatprep.subr.bf16.mxu1 %v7634_v24 }
 0x311   : > { %v2090_v18 = vpop.f32.mrb[8].mxu0  ;;  %6968 = vmatpush3.bf16.msra.mxu1 %v7634_v24 }
 0x312   : > { %v2196_v5 = vadd.f32 %v2090_v18, %v9085_v19  ;;  %v6755_v46 = vpop.f32.mrb[9].mxu0  ;;  %v7635_v19 = vld [vmem:[%s10008_s3 + $0x70] sm:$0xff]  }
 0x313   : > { %v2093_v55 = vpop.f32.mrb[10].mxu0  ;;  %6969 = vmatprep.subr.bf16.mxu1 %v7635_v19 }
 0x314   : > { %v2197_v11 = vadd.f32 %v2093_v55, %v9090_v38  ;;  %v9304_v8 = vadd.f32 %v9067_v15, %v2196_v5  ;;  %v6756_v13 = vpop.f32.mrb[11].mxu0 }
 0x315   : > { %6970 = vmatpush3.bf16.msra.mxu1 %v7635_v19 }
 0x316   : > { %v9310_v53 = vadd.f32 %v10109_v12, %v2197_v11  ;;  %6954 = vmatmul.mubr.bf16.gmra.mrb[116].mxu0 %v2497_v52  ;;  %v7638_v52 = vld [vmem:[%s10008_s3 + $0x78] sm:$0xff]  }
 0x317   : > { %6971 = vmatprep.subr.bf16.mxu1 %v7638_v52 }
 0x319   : > { %v2098_v35 = vpop.f32.mrb[12].mxu0  ;;  %6972 = vmatpush3.bf16.msra.mxu1 %v7638_v52 }
 0x31a   : > { %v2198_v38 = vadd.f32 %v2098_v35, %v9097_v22  ;;  %v6759_v15 = vpop.f32.mrb[13].mxu0 }
 0x31b   : > { %v2101_v17 = vpop.f32.mrb[14].mxu0 }
 0x31c   : > { %v2199_v61 = vadd.f32 %v2101_v17, %v9102_v56  ;;  %v9318_v57 = vadd.f32 %v9082_v14, %v2198_v38  ;;  %v6760_v31 = vpop.f32.mrb[15].mxu0 }
 0x31e   : > { %v9324_v27 = vadd.f32 %v9087_v10, %v2199_v61 }
 0x321   : > { %v2106_v22 = vpop.f32.mrb[16].mxu0 }
 0x322   : > { %v2200_v18 = vadd.f32 %v2106_v22, %v9112_v39  ;;  %v6763_v5 = vpop.f32.mrb[17].mxu0 }
 0x323   : > { %v2109_v46 = vpop.f32.mrb[18].mxu0 }
 0x324   : > { %v2201_v56 = vadd.f32 %v2109_v46, %v9117_v60  ;;  %v9329_v14 = vadd.f32 %v9094_v34, %v2200_v18  ;;  %v6764_v55 = vpop.f32.mrb[19].mxu0 }
 0x326   : > { %v9332_v11 = vadd.f32 %v9099_v42, %v2201_v56 }
 0x329   : > { %v2114_v13 = vpop.f32.mrb[20].mxu0 }
 0x32a   : > { %v2202_v10 = vadd.f32 %v2114_v13, %v9127_v33  ;;  %v6767_v24 = vpop.f32.mrb[21].mxu0 }
 0x32b   : > { %v2117_v12 = vpop.f32.mrb[22].mxu0 }
 0x32c   : > { %v2203_v19 = vadd.f32 %v2117_v12, %v9132_v6  ;;  %v9337_v39 = vadd.f32 %v9108_v30, %v2202_v10  ;;  %v6768_v35 = vpop.f32.mrb[23].mxu0 }
 0x32e   : > { %v9340_v60 = vadd.f32 %v9114_v41, %v2203_v19 }
 0x331   : > { %v2122_v34 = vpop.f32.mrb[24].mxu0 }
 0x332   : > { %v2204_v38 = vadd.f32 %v2122_v34, %v9142_v1  ;;  %v6771_v15 = vpop.f32.mrb[25].mxu0 }
 0x333   : > { %v2125_v42 = vpop.f32.mrb[26].mxu0 }
 0x334   : > { %v2205_v17 = vadd.f32 %v2125_v42, %v9147_v9  ;;  %v9345_v33 = vadd.f32 %v9123_v43, %v2204_v38  ;;  %v6772_v61 = vpop.f32.mrb[27].mxu0 }
 0x336   : > { %v9348_v6 = vadd.f32 %v9129_v32, %v2205_v17 }
 0x339   : > { %v2130_v30 = vpop.f32.mrb[28].mxu0 }
 0x33a   : > { %v2206_v31 = vadd.f32 %v2130_v30, %v9157_v37  ;;  %v6775_v52 = vpop.f32.mrb[29].mxu0 }
 0x33b   : > { %v2133_v41 = vpop.f32.mrb[30].mxu0 }
 0x33c   : > { %v2207_v22 = vadd.f32 %v2133_v41, %v9162_v36  ;;  %v9353_v1 = vadd.f32 %v9138_v47, %v2206_v31  ;;  %v6776_v18 = vpop.f32.mrb[31].mxu0 }
 0x33e   : > { %v9356_v9 = vadd.f32 %v9144_v44, %v2207_v22  ;;  %v10110_v22 = vld [vmem:[#allocation26_spill] sm:$0xff] }
 0x341   : > { %v2138_v43 = vpop.f32.mrb[32].mxu0 }
 0x342   : > { %v2208_v5 = vadd.f32 %v2138_v43, %v9172_v23  ;;  %v6779_v46 = vpop.f32.mrb[33].mxu0  ;;  %v10111_v43 = vld [vmem:[#allocation3_spill] sm:$0xff] }
 0x343   : > { %v2141_v32 = vpop.f32.mrb[34].mxu0 }
 0x344   : > { %v2209_v56 = vadd.f32 %v2141_v32, %v9177_v26  ;;  %v9361_v37 = vadd.f32 %v9153_v25, %v2208_v5  ;;  %v6780_v55 = vpop.f32.mrb[35].mxu0  ;;  %v10112_v32 = vld [vmem:[#allocation5_spill] sm:$0xff] }
 0x345   : > { %v10113_v55 = vld [vmem:[#allocation16_spill] sm:$0xff] }
 0x346   : > { %v9364_v36 = vadd.f32 %v9159_v45, %v2209_v56 }
 0x349   : > { %v2146_v47 = vpop.f32.mrb[36].mxu0 }
 0x34a   : > { %v2210_v13 = vadd.f32 %v2146_v47, %v9187_v58  ;;  %v6783_v10 = vpop.f32.mrb[37].mxu0 }
 0x34b   : > { %v2149_v44 = vpop.f32.mrb[38].mxu0 }
 0x34c   : > { %v2211_v24 = vadd.f32 %v2149_v44, %v9195_v54  ;;  %v9369_v23 = vadd.f32 %v9168_v62, %v2210_v13  ;;  %v6784_v12 = vpop.f32.mrb[39].mxu0  ;;  %v9382_v62 = vld [vmem:[%s10008_s3] sm:$0xff]  }
 0x34d   : > { %6997 = vmatprep.subr.bf16.mxu1 %v9382_v62  ;;  %v10114_v13 = vld [vmem:[#allocation25_spill] sm:$0xff] }
 0x34e   : > { %v9372_v26 = vadd.f32 %v9174_v59, %v2211_v24 }
 0x351   : > { %v2154_v25 = vpop.f32.mrb[40].mxu0 }
 0x352   : > { %v2212_v19 = vadd.f32 %v2154_v25, %v9205_v51  ;;  %v6787_v35 = vpop.f32.mrb[41].mxu0  ;;  %v10115_v25 = vld [vmem:[#allocation4_spill] sm:$0xff] }
 0x353   : > { %v2157_v45 = vpop.f32.mrb[42].mxu0 }
 0x354   : > { %v2213_v34 = vadd.f32 %v2157_v45, %v9210_v20  ;;  %v9377_v58 = vadd.f32 %v9183_v21, %v2212_v19  ;;  %v6788_v38 = vpop.f32.mrb[43].mxu0  ;;  %v9419_v45 = vld [vmem:[%s10007_s2] ss:$0 sm:$0xff] }
 0x356   : > { %v9385_v54 = vadd.f32 %v9192_v29, %v2213_v34 }
 0x359   : > { %v2162_v59 = vpop.f32.mrb[44].mxu0 }
 0x35a   : > { %v2214_v51 = vadd.f32 %v2162_v59, %v9223_v48  ;;  %v6791_v15 = vpop.f32.mrb[45].mxu0 }
 0x35b   : > { %v2165_v42 = vpop.f32.mrb[46].mxu0 }
 0x35c   : > { %v2215_v20 = vadd.f32 %v2165_v42, %v9228_v2  ;;  %v9391_v21 = vadd.f32 %v9201_v0, %v2214_v51  ;;  %v6792_v17 = vpop.f32.mrb[47].mxu0 }
 0x35e   : > { %v9394_v61 = vadd.f32 %v9207_v28, %v2215_v20 }
 0x361   : > { %v2170_v30 = vpop.f32.mrb[48].mxu0 }
 0x362   : > { %v2216_v29 = vadd.f32 %v2170_v30, %v9238_v7  ;;  %v6795_v31 = vpop.f32.mrb[49].mxu0 }
 0x363   : > { %v2173_v52 = vpop.f32.mrb[50].mxu0 }
 0x364   : > { %v2217_v41 = vadd.f32 %v2173_v52, %v9243_v63  ;;  %v9399_v48 = vadd.f32 %v10110_v22, %v2216_v29  ;;  %v6796_v18 = vpop.f32.mrb[51].mxu0 }
 0x366   : > { %v9402_v2 = vadd.f32 %v10111_v43, %v2217_v41 }
 0x369   : > { %v2178_v0 = vpop.f32.mrb[52].mxu0 }
 0x36a   : > { %v2218_v5 = vadd.f32 %v2178_v0, %v9256_v40  ;;  %v6799_v46 = vpop.f32.mrb[53].mxu0 }
 0x36b   : > { %v2181_v28 = vpop.f32.mrb[54].mxu0 }
 0x36c   : > { %v2219_v56 = vadd.f32 %v2181_v28, %v10112_v32  ;;  %v9407_v7 = vadd.f32 %v10113_v55, %v2218_v5  ;;  %v6800_v47 = vpop.f32.mrb[55].mxu0 }
 0x36e   : > { %v9410_v63 = vadd.f32 %v10114_v13, %v2219_v56 }
 0x371   : > { %v2186_v10 = vpop.f32.mrb[56].mxu0 }
 0x372   : > { %v2220_v44 = vadd.f32 %v2186_v10, %v9266_v49  ;;  %v6803_v24 = vpop.f32.mrb[57].mxu0 }
 0x373   : > { %v2189_v12 = vpop.f32.mrb[58].mxu0 }
 0x374   : > { %v9414_v19 = vadd.f32 %v10115_v25, %v2220_v44  ;;  %v6804_v40 = vpop.f32.mrb[59].mxu0 }
 0x379   : > { %v2583_v35 = vpop.f32.mrb[60].mxu0 }
 0x37a   : > { %v2701_v34 = vadd.f32 %v2583_v35, %v9274_v50  ;;  %v6899_v38 = vpop.f32.mrb[61].mxu0 }
 0x37b   : > { %v2586_v59 = vpop.f32.mrb[62].mxu0 }
 0x37c   : > { %v2737_v51 = vadd.f32 %v9419_v45, %v2701_v34  ;;  %v2702_v49 = vadd.f32 %v2586_v59, %v9280_v16  ;;  %v6900_v15 = vpop.f32.mrb[63].mxu0 }
 0x37e   : > { %v2738_v42 = vadd.f32 %v9419_v45, %v2702_v49  ;;  %v2766_v20 = vmax.f32 %v2737_v51, 0.0 }
 0x380   : > { %v2767_v17 = vmax.f32 %v2738_v42, 0.0 }
 0x381   : > { %v2591_v30 = vpop.f32.mrb[64].mxu0 }
 0x382   : > { %v5806_v29 = vpack.c.bf16 %v2767_v17, %v2766_v20  ;;  %v2703_v31 = vadd.f32 %v2591_v30, %v9291_v4  ;;  %v6903_v52 = vpop.f32.mrb[65].mxu0 }
 0x383   : > { %v2594_v41 = vpop.f32.mrb[66].mxu0 }
 0x384   : > { %5807 = vst [vmem:[#allocation2] sm:$0xff] %v5806_v29   ;;  %v2739_v50 = vadd.f32 %v9419_v45, %v2703_v31  ;;  %v2704_v22 = vadd.f32 %v2594_v41, %v9294_v3  ;;  %v6904_v18 = vpop.f32.mrb[67].mxu0 }
 0x386   : > { %v2740_v43 = vadd.f32 %v9419_v45, %v2704_v22  ;;  %v2768_v16 = vmax.f32 %v2739_v50, 0.0 }
 0x388   : > { %v2769_v0 = vmax.f32 %v2740_v43, 0.0 }
 0x389   : > { %v2599_v5 = vpop.f32.mrb[68].mxu0 }
 0x38a   : > { %v5811_v46 = vpack.c.bf16 %v2769_v0, %v2768_v16  ;;  %v2705_v28 = vadd.f32 %v2599_v5, %v9304_v8  ;;  %v6907_v32 = vpop.f32.mrb[69].mxu0 }
 0x38b   : > { %v2602_v56 = vpop.f32.mrb[70].mxu0  ;;  %v9430_v55 = vld [vmem:[#allocation2] sm:$0xff]  }
 0x38c   : > { %5873 = vst [vmem:[#allocation2 + $0x8] sm:$0xff] %v5811_v46   ;;  %v2741_v4 = vadd.f32 %v9419_v45, %v2705_v28  ;;  %v2706_v47 = vadd.f32 %v2602_v56, %v9310_v53  ;;  %v6908_v13 = vpop.f32.mrb[71].mxu0  ;;  %v3069_v10 = vshll.u32 %v9430_v55, 16  ;;  %v3067_v49 = vshrl.u32 %v9430_v55, 16 }
 0x38e   : > { %v2742_v3 = vadd.f32 %v9419_v45, %v2706_v47  ;;  %v2770_v44 = vmax.f32 %v2741_v4, 0.0  ;;  %v3071_v35 = vrot.slane %v3069_v10, 1  ;;  %v7646_v4 = vld [vmem:[%s10008_s3 + $0x8] sm:$0xff]  }
 0x390   : > { %v2771_v24 = vmax.f32 %v2742_v3, 0.0  ;;  %v3072_v20 = vor.u32 %v3071_v35, %v3067_v49 }
 0x391   : > { %v2607_v12 = vpop.f32.mrb[72].mxu0 }
 0x392   : > { %v5816_v25 = vpack.c.bf16 %v2771_v24, %v2770_v44  ;;  %v2707_v8 = vadd.f32 %v2607_v12, %v9318_v57  ;;  %v6911_v40 = vpop.f32.mrb[73].mxu0 }
 0x393   : > { %v2610_v34 = vpop.f32.mrb[74].mxu0  ;;  %v9437_v38 = vld [vmem:[#allocation2 + $0x8] sm:$0xff]   ;;  %v7648_v40 = vld [vmem:[%s10008_s3 + $0x10] sm:$0xff]  }
 0x394   : > { %5874 = vst [vmem:[#allocation2 + $0x10] sm:$0xff] %v5816_v25   ;;  %v2743_v59 = vadd.f32 %v9419_v45, %v2707_v8  ;;  %v2708_v53 = vadd.f32 %v2610_v34, %v9324_v27  ;;  %v6912_v51 = vpop.f32.mrb[75].mxu0  ;;  %v3074_v15 = vshll.u32 %v9437_v38, 16  ;;  %v3078_v0 = vshrl.u32 %v9437_v38, 16 }
 0x396   : > { %v2744_v42 = vadd.f32 %v9419_v45, %v2708_v53  ;;  %v3076_v17 = vrot.slane %v3074_v15, 1  ;;  %v2772_v57 = vmax.f32 %v2743_v59, 0.0 }
 0x398   : > { %v2773_v30 = vmax.f32 %v2744_v42, 0.0  ;;  %v3077_v31 = vsel %vm368_vm1, %v3072_v20, %v3076_v17  ;;  %v3080_v28 = vor.u32 %v3078_v0, %v3076_v17 }
 0x399   : > { %v2615_v29 = vpop.f32.mrb[76].mxu0  ;;  %6973 = vmatprep.mubr.bf16.mxu1 %v3077_v31 }
 0x39a   : > { %v5821_v52 = vpack.c.bf16 %v2773_v30, %v2772_v57  ;;  %v2709_v41 = vadd.f32 %v2615_v29, %v9329_v14  ;;  %v6915_v50 = vpop.f32.mrb[77].mxu0 }
 0x39b   : > { %v2618_v27 = vpop.f32.mrb[78].mxu0  ;;  %v9446_v22 = vld [vmem:[#allocation2 + $0x10] sm:$0xff]  }
 0x39c   : > { %5875 = vst [vmem:[#allocation2 + $0x18] sm:$0xff] %v5821_v52   ;;  %v2745_v18 = vadd.f32 %v9419_v45, %v2709_v41  ;;  %v2710_v43 = vadd.f32 %v2618_v27, %v9332_v11  ;;  %v6916_v16 = vpop.f32.mrb[79].mxu0  ;;  %v3082_v5 = vshll.u32 %v9446_v22, 16  ;;  %v7652_v41 = vld [vmem:[%s10008_s3 + $0x20] sm:$0xff]  }
 0x39e   : > { %v2746_v46 = vadd.f32 %v9419_v45, %v2710_v43  ;;  %v3084_v32 = vrot.slane %v3082_v5, 1  ;;  %v2774_v14 = vmax.f32 %v2745_v18, 0.0 }
 0x3a0   : > { %v2775_v56 = vmax.f32 %v2746_v46, 0.0  ;;  %v9457_v13 = vsel %vm368_vm1, %v3080_v28, %v3084_v32 }
 0x3a1   : > { %v2623_v47 = vpop.f32.mrb[80].mxu0  ;;  %6974 = vmatmul.mubr.bf16.vlgmr.msra.gmra.mrb[164].mxu1 %v9457_v13 }
 0x3a2   : > { %v5826_v11 = vpack.c.bf16 %v2775_v56, %v2774_v14  ;;  %v2711_v3 = vadd.f32 %v2623_v47, %v9337_v39  ;;  %v6919_v10 = vpop.f32.mrb[81].mxu0  ;;  %6998 = vmatpush3.bf16.msra.mxu1 %v9382_v62  ;;  %v3086_v39 = vshrl.u32 %v9446_v22, 16 }
 0x3a3   : > { %v2626_v44 = vpop.f32.mrb[82].mxu0  ;;  %v9461_v24 = vld [vmem:[#allocation2 + $0x18] sm:$0xff]   ;;  %6999 = vmatprep.subr.bf16.mxu1 %v7646_v4  ;;  %v7655_v10 = vld [vmem:[%s10008_s3 + $0x30] sm:$0xff]  }
 0x3a4   : > { %5876 = vst [vmem:[#allocation2 + $0x20] sm:$0xff] %v5826_v11   ;;  %v2747_v12 = vadd.f32 %v9419_v45, %v2711_v3  ;;  %v2712_v25 = vadd.f32 %v2626_v44, %v9340_v60  ;;  %v6920_v8 = vpop.f32.mrb[83].mxu0  ;;  %v3090_v35 = vshll.u32 %v9461_v24, 16  ;;  %v3088_v59 = vor.u32 %v3086_v39, %v3084_v32  ;;  %v7650_v60 = vld [vmem:[%s10008_s3 + $0x18] sm:$0xff]  }
 0x3a6   : > { %v2748_v34 = vadd.f32 %v9419_v45, %v2712_v25  ;;  %v3092_v53 = vrot.slane %v3090_v35, 1  ;;  %7000 = vmatpush3.bf16.msra.mxu1 %v7646_v4  ;;  %v2776_v62 = vmax.f32 %v2747_v12, 0.0 }
 0x3a7   : > { %7001 = vmatprep.subr.bf16.mxu1 %v7648_v40 }
 0x3a8   : > { %v2777_v51 = vmax.f32 %v2748_v34, 0.0  ;;  %v9476_v15 = vsel %vm368_vm1, %v3088_v59, %v3092_v53 }
 0x3a9   : > { %v2631_v49 = vpop.f32.mrb[84].mxu0  ;;  %6977 = vmatprep.mubr.bf16.mxu1 %v9476_v15 }
 0x3aa   : > { %v5831_v42 = vpack.c.bf16 %v2777_v51, %v2776_v62  ;;  %v2713_v20 = vadd.f32 %v2631_v49, %v9345_v33  ;;  %v6923_v17 = vpop.f32.mrb[85].mxu0  ;;  %7002 = vmatpush3.bf16.msra.mxu1 %v7648_v40  ;;  %v3094_v33 = vshrl.u32 %v9461_v24, 16 }
 0x3ab   : > { %v2634_v57 = vpop.f32.mrb[86].mxu0  ;;  %v9480_v30 = vld [vmem:[#allocation2 + $0x20] sm:$0xff]   ;;  %7003 = vmatprep.subr.bf16.mxu1 %v7650_v60 }
 0x3ac   : > { %5877 = vst [vmem:[#allocation2 + $0x28] sm:$0xff] %v5831_v42   ;;  %v2749_v29 = vadd.f32 %v9419_v45, %v2713_v20  ;;  %v2714_v31 = vadd.f32 %v2634_v57, %v9348_v6  ;;  %v6924_v52 = vpop.f32.mrb[87].mxu0  ;;  %v3098_v50 = vshll.u32 %v9480_v30, 16  ;;  %v3096_v18 = vor.u32 %v3094_v33, %v3092_v53  ;;  %v7653_v6 = vld [vmem:[%s10008_s3 + $0x28] sm:$0xff]   ;;  %v9523_v17 = vld [vmem:[%s10008_s3 + $0x80] sm:$0xff]  }
 0x3ae   : > { %v2750_v27 = vadd.f32 %v9419_v45, %v2714_v31  ;;  %v3100_v43 = vrot.slane %v3098_v50, 1  ;;  %7004 = vmatpush3.bf16.msra.mxu1 %v7650_v60  ;;  %v2778_v16 = vmax.f32 %v2749_v29, 0.0 }
 0x3af   : > { %7005 = vmatprep.subr.bf16.mxu1 %v7652_v41 }
 0x3b0   : > { %v2779_v0 = vmax.f32 %v2750_v27, 0.0  ;;  %v9494_v46 = vsel %vm368_vm1, %v3096_v18, %v3100_v43 }
 0x3b1   : > { %v2639_v5 = vpop.f32.mrb[88].mxu0  ;;  %6978 = vmatmul.mubr.bf16.gmra.mrb[168].mxu1 %v9494_v46 }
 0x3b2   : > { %v5836_v28 = vpack.c.bf16 %v2779_v0, %v2778_v16  ;;  %v2715_v32 = vadd.f32 %v2639_v5, %v9353_v1  ;;  %v6927_v14 = vpop.f32.mrb[89].mxu0  ;;  %7006 = vmatpush3.bf16.msra.mxu1 %v7652_v41  ;;  %v3102_v1 = vshrl.u32 %v9480_v30, 16 }
 0x3b3   : > { %v2642_v56 = vpop.f32.mrb[90].mxu0  ;;  %v9498_v4 = vld [vmem:[#allocation2 + $0x28] sm:$0xff]   ;;  %7007 = vmatprep.subr.bf16.mxu1 %v7653_v6 }
 0x3b4   : > { %5878 = vst [vmem:[#allocation2 + $0x30] sm:$0xff] %v5836_v28   ;;  %v2751_v47 = vadd.f32 %v9419_v45, %v2715_v32  ;;  %v2716_v11 = vadd.f32 %v2642_v56, %v9356_v9  ;;  %v6928_v3 = vpop.f32.mrb[91].mxu0  ;;  %v3106_v44 = vshll.u32 %v9498_v4, 16  ;;  %v3104_v25 = vor.u32 %v3102_v1, %v3100_v43  ;;  %v7658_v9 = vld [vmem:[%s10008_s3 + $0x38] sm:$0xff]  }
 0x3b6   : > { %v2752_v12 = vadd.f32 %v9419_v45, %v2716_v11  ;;  %v3108_v8 = vrot.slane %v3106_v44, 1  ;;  %7008 = vmatpush3.bf16.msra.mxu1 %v7653_v6  ;;  %v2780_v40 = vmax.f32 %v2751_v47, 0.0 }
 0x3b7   : > { %7009 = vmatprep.subr.bf16.mxu1 %v7655_v10 }
 0x3b8   : > { %v2781_v39 = vmax.f32 %v2752_v12, 0.0  ;;  %v9512_v34 = vsel %vm368_vm1, %v3104_v25, %v3108_v8 }
 0x3b9   : > { %v2647_v35 = vpop.f32.mrb[92].mxu0  ;;  %6981 = vmatprep.mubr.bf16.mxu1 %v9512_v34 }
 0x3ba   : > { %v5841_v59 = vpack.c.bf16 %v2781_v39, %v2780_v40  ;;  %v2717_v53 = vadd.f32 %v2647_v35, %v9361_v37  ;;  %v6931_v62 = vpop.f32.mrb[93].mxu0  ;;  %7010 = vmatpush3.bf16.msra.mxu1 %v7655_v10  ;;  %v3110_v37 = vshrl.u32 %v9498_v4, 16 }
 0x3bb   : > { %v2650_v51 = vpop.f32.mrb[94].mxu0  ;;  %v9516_v60 = vld [vmem:[#allocation2 + $0x30] sm:$0xff]   ;;  %7011 = vmatprep.subr.bf16.mxu1 %v7658_v9 }
 0x3bc   : > { %5879 = vst [vmem:[#allocation2 + $0x38] sm:$0xff] %v5841_v59   ;;  %v2753_v49 = vadd.f32 %v9419_v45, %v2717_v53  ;;  %v2718_v42 = vadd.f32 %v2650_v51, %v9364_v36  ;;  %v6932_v20 = vpop.f32.mrb[95].mxu0  ;;  %v3114_v57 = vshll.u32 %v9516_v60, 16  ;;  %v3112_v31 = vor.u32 %v3110_v37, %v3108_v8 }
 0x3bd   : > { %v3118_v32 = vshrl.u32 %v9516_v60, 16 }
 0x3be   : > { %v2754_v29 = vadd.f32 %v9419_v45, %v2718_v42  ;;  %v3116_v52 = vrot.slane %v3114_v57, 1  ;;  %7012 = vmatpush3.bf16.msra.mxu1 %v7658_v9  ;;  %v2782_v41 = vmax.f32 %v2753_v49, 0.0 }
 0x3bf   : > { %7037 = vmatprep.subr.bf16.mxu1 %v9523_v17 }
 0x3c0   : > { %v2783_v33 = vmax.f32 %v2754_v29, 0.0  ;;  %v9530_v50 = vsel %vm368_vm1, %v3112_v31, %v3116_v52  ;;  %v3120_v47 = vor.u32 %v3118_v32, %v3116_v52 }
 0x3c1   : > { %v2655_v36 = vpop.f32.mrb[96].mxu0  ;;  %6982 = vmatmul.mubr.bf16.gmra.mrb[172].mxu1 %v9530_v50 }
 0x3c2   : > { %v5846_v27 = vpack.c.bf16 %v2783_v33, %v2782_v41  ;;  %v2719_v18 = vadd.f32 %v2655_v36, %v9369_v23  ;;  %v6935_v43 = vpop.f32.mrb[97].mxu0 }
 0x3c3   : > { %v2658_v16 = vpop.f32.mrb[98].mxu0  ;;  %v9534_v0 = vld [vmem:[#allocation2 + $0x38] sm:$0xff]  }
 0x3c4   : > { %5880 = vst [vmem:[#allocation2 + $0x40] sm:$0xff] %v5846_v27   ;;  %v2755_v6 = vadd.f32 %v9419_v45, %v2719_v18  ;;  %v2720_v5 = vadd.f32 %v2658_v16, %v9372_v26  ;;  %v6936_v28 = vpop.f32.mrb[99].mxu0  ;;  %v3122_v14 = vshll.u32 %v9534_v0, 16  ;;  %v3126_v35 = vshrl.u32 %v9534_v0, 16 }
 0x3c6   : > { %v2756_v56 = vadd.f32 %v9419_v45, %v2720_v5  ;;  %v3124_v23 = vrot.slane %v3122_v14, 1  ;;  %v2784_v11 = vmax.f32 %v2755_v6, 0.0 }
 0x3c8   : > { %v2785_v3 = vmax.f32 %v2756_v56, 0.0  ;;  %v9542_v1 = vsel %vm368_vm1, %v3120_v47, %v3124_v23  ;;  %v3128_v62 = vor.u32 %v3126_v35, %v3124_v23 }
 0x3c9   : > { %v2663_v10 = vpop.f32.mrb[100].mxu0  ;;  %6985 = vmatprep.mubr.bf16.mxu1 %v9542_v1 }
 0x3ca   : > { %v5851_v44 = vpack.c.bf16 %v2785_v3, %v2784_v11  ;;  %v2721_v12 = vadd.f32 %v2663_v10, %v9377_v58  ;;  %v6939_v25 = vpop.f32.mrb[101].mxu0 }
 0x3cb   : > { %v2666_v26 = vpop.f32.mrb[102].mxu0  ;;  %v9546_v8 = vld [vmem:[#allocation2 + $0x40] sm:$0xff]  }
 0x3cc   : > { %5881 = vst [vmem:[#allocation2 + $0x48] sm:$0xff] %v5851_v44   ;;  %v2757_v40 = vadd.f32 %v9419_v45, %v2721_v12  ;;  %v2722_v39 = vadd.f32 %v2666_v26, %v9385_v54  ;;  %v6940_v9 = vpop.f32.mrb[103].mxu0  ;;  %v3130_v59 = vshll.u32 %v9546_v8, 16  ;;  %v3134_v36 = vshrl.u32 %v9546_v8, 16 }
 0x3ce   : > { %v2758_v53 = vadd.f32 %v9419_v45, %v2722_v39  ;;  %v3132_v58 = vrot.slane %v3130_v59, 1  ;;  %v2786_v51 = vmax.f32 %v2757_v40, 0.0 }
 0x3d0   : > { %v2787_v49 = vmax.f32 %v2758_v53, 0.0  ;;  %v9554_v20 = vsel %vm368_vm1, %v3128_v62, %v3132_v58  ;;  %v3136_v43 = vor.u32 %v3134_v36, %v3132_v58 }
 0x3d1   : > { %v2671_v42 = vpop.f32.mrb[104].mxu0  ;;  %6986 = vmatmul.mubr.bf16.gmra.mrb[176].mxu1 %v9554_v20 }
 0x3d2   : > { %v5856_v37 = vpack.c.bf16 %v2787_v49, %v2786_v51  ;;  %v2723_v57 = vadd.f32 %v2671_v42, %v9391_v21  ;;  %v6943_v29 = vpop.f32.mrb[105].mxu0 }
 0x3d3   : > { %v2674_v54 = vpop.f32.mrb[106].mxu0  ;;  %v9558_v31 = vld [vmem:[#allocation2 + $0x48] sm:$0xff]  }
 0x3d4   : > { %5882 = vst [vmem:[#allocation2 + $0x50] sm:$0xff] %v5856_v37   ;;  %v2759_v52 = vadd.f32 %v9419_v45, %v2723_v57  ;;  %v2724_v41 = vadd.f32 %v2674_v54, %v9394_v61  ;;  %v6944_v33 = vpop.f32.mrb[107].mxu0  ;;  %v3138_v27 = vshll.u32 %v9558_v31, 16  ;;  %v3142_v10 = vshrl.u32 %v9558_v31, 16 }
 0x3d6   : > { %v2760_v18 = vadd.f32 %v9419_v45, %v2724_v41  ;;  %v3140_v21 = vrot.slane %v3138_v27, 1  ;;  %v2788_v16 = vmax.f32 %v2759_v52, 0.0 }
 0x3d8   : > { %v2789_v6 = vmax.f32 %v2760_v18, 0.0  ;;  %v9566_v28 = vsel %vm368_vm1, %v3136_v43, %v3140_v21  ;;  %v3144_v25 = vor.u32 %v3142_v10, %v3140_v21  ;;  %v7664_v10 = vld [vmem:[%s10008_s3 + $0xa8] sm:$0xff]  }
 0x3d9   : > { %v2679_v5 = vpop.f32.mrb[108].mxu0  ;;  %6989 = vmatprep.mubr.bf16.mxu1 %v9566_v28 }
 0x3da   : > { %v5861_v32 = vpack.c.bf16 %v2789_v6, %v2788_v16  ;;  %v2725_v14 = vadd.f32 %v2679_v5, %v9399_v48  ;;  %v6947_v56 = vpop.f32.mrb[109].mxu0 }
 0x3db   : > { %v2682_v61 = vpop.f32.mrb[110].mxu0  ;;  %v9570_v47 = vld [vmem:[#allocation2 + $0x50] sm:$0xff]  }
 0x3dc   : > { %5883 = vst [vmem:[#allocation2 + $0x58] sm:$0xff] %v5861_v32   ;;  %v2761_v23 = vadd.f32 %v9419_v45, %v2725_v14  ;;  %v2726_v11 = vadd.f32 %v2682_v61, %v9402_v2  ;;  %v6948_v3 = vpop.f32.mrb[111].mxu0  ;;  %v3146_v44 = vshll.u32 %v9570_v47, 16  ;;  %v3150_v42 = vshrl.u32 %v9570_v47, 16 }
 0x3dd   : > { %v7662_v3 = vld [vmem:[%s10008_s3 + $0x98] sm:$0xff]  }
 0x3de   : > { %v2762_v12 = vadd.f32 %v9419_v45, %v2726_v11  ;;  %v3148_v48 = vrot.slane %v3146_v44, 1  ;;  %v2790_v26 = vmax.f32 %v2761_v23, 0.0  ;;  %v7661_v11 = vld [vmem:[%s10008_s3 + $0x90] sm:$0xff]  }
 0x3df   : > { %v7665_v44 = vld [vmem:[%s10008_s3 + $0xb0] sm:$0xff]  }
 0x3e0   : > { %v2791_v40 = vmax.f32 %v2762_v12, 0.0  ;;  %v9578_v9 = vsel %vm368_vm1, %v3144_v25, %v3148_v48  ;;  %v3152_v29 = vor.u32 %v3150_v42, %v3148_v48  ;;  %v7666_v12 = vld [vmem:[%s10008_s3 + $0xb8] sm:$0xff]   ;;  %v7667_v25 = vld [vmem:[%s10008_s3 + $0xc0] sm:$0xff]   ;;  %v3562_v48 = vrot.slane %v9437_v38, 1 }
 0x3e1   : > { %v2687_v39 = vpop.f32.mrb[112].mxu0  ;;  %6990 = vmatmul.mubr.bf16.gmra.mrb[180].mxu1 %v9578_v9 }
 0x3e2   : > { %v5866_v35 = vpack.c.bf16 %v2791_v40, %v2790_v26  ;;  %v2727_v59 = vadd.f32 %v2687_v39, %v9407_v7  ;;  %v6951_v53 = vpop.f32.mrb[113].mxu0  ;;  %v3561_v26 = vrot.slane %v9430_v55, 1  ;;  %v3564_v39 = vrot.slane %v9446_v22, 1 }
 0x3e3   : > { %v2690_v2 = vpop.f32.mrb[114].mxu0  ;;  %v9582_v62 = vld [vmem:[#allocation2 + $0x58] sm:$0xff]  }
 0x3e4   : > { %5884 = vst [vmem:[#allocation2 + $0x60] sm:$0xff] %v5866_v35   ;;  %v2763_v58 = vadd.f32 %v9419_v45, %v2727_v59  ;;  %v2728_v51 = vadd.f32 %v2690_v2, %v9410_v63  ;;  %v6952_v49 = vpop.f32.mrb[115].mxu0  ;;  %v3154_v37 = vshll.u32 %v9582_v62, 16  ;;  %v3158_v32 = vshrl.u32 %v9582_v62, 16  ;;  %v7668_v59 = vld [vmem:[%s10008_s3 + $0xc8] sm:$0xff]   ;;  %v7669_v2 = vld [vmem:[%s10008_s3 + $0xd0] sm:$0xff]  }
 0x3e5   : > { %v3563_v40 = vsel %vm936_vm2, %v3561_v26, %v3562_v48  ;;  %v3566_v35 = vrot.slane %v9461_v24, 1  ;;  %v9653_v53 = vsel %vm936_vm2, %v3562_v48, %v3564_v39  ;;  %v7670_v49 = vld [vmem:[%s10008_s3 + $0xd8] sm:$0xff]   ;;  %v7684_v26 = vld [vmem:[%s10008_s3 + $0x148] sm:$0xff]  }
 0x3e6   : > { %v2764_v57 = vadd.f32 %v9419_v45, %v2728_v51  ;;  %v3156_v7 = vrot.slane %v3154_v37, 1  ;;  %v2792_v54 = vmax.f32 %v2763_v58, 0.0  ;;  %v3568_v58 = vrot.slane %v9480_v30, 1 }
 0x3e7   : > { %v3570_v51 = vrot.slane %v9498_v4, 1 }
 0x3e8   : > { %v2793_v52 = vmax.f32 %v2764_v57, 0.0  ;;  %v9590_v33 = vsel %vm368_vm1, %v3152_v29, %v3156_v7  ;;  %v9603_v56 = vor.u32 %v3158_v32, %v3156_v7  ;;  %v9669_v42 = vsel %vm936_vm2, %v3566_v35, %v3568_v58  ;;  %v7671_v57 = vld [vmem:[%s10008_s3 + $0xe0] sm:$0xff]  }
 0x3e9   : > { %v2695_v41 = vpop.f32.mrb[116].mxu0  ;;  %6993 = vmatprep.mubr.bf16.mxu1 %v9590_v33  ;;  %v9673_v37 = vsel %vm936_vm2, %v3568_v58, %v3570_v51  ;;  %v3572_v29 = vrot.slane %v9516_v60, 1  ;;  %v3574_v7 = vrot.slane %v9534_v0, 1  ;;  %v3580_v32 = vrot.slane %v9570_v47, 1 }
 0x3ea   : > { %v5871_v36 = vpack.c.bf16 %v2793_v52, %v2792_v54  ;;  %v2729_v27 = vadd.f32 %v2695_v41, %v9414_v19  ;;  %v6955_v63 = vpop.f32.mrb[117].mxu0  ;;  %v7672_v54 = vld [vmem:[%s10008_s3 + $0xe8] sm:$0xff]  }
 0x3eb   : > { %v9594_v18 = vld [vmem:[#allocation2 + $0x60] sm:$0xf]  ;;  %v2698_v43 = vpop.f32.mrb[118].mxu0  ;;  %v9685_v52 = vsel %vm936_vm2, %v3570_v51, %v3572_v29  ;;  %v9689_v41 = vsel %vm936_vm2, %v3572_v29, %v3574_v7  ;;  %v3578_v63 = vrot.slane %v9558_v31, 1 }
 0x3ec   : > { %5885 = vst [vmem:[#allocation2 + $0x68] sm:$0xff] %v5871_v36   ;;  %v2765_v21 = vadd.f32 %v9419_v45, %v2729_v27  ;;  %v9599_v16 = vcombine.low %v9594_v18, %v9594_v18  ;;  %v6956_v6 = vpop.f32.mrb[119].mxu0  ;;  %v7660_v45 = vld [vmem:[%s10008_s3 + $0x88] sm:$0xff]   ;;  %v7673_v36 = vld [vmem:[%s10008_s3 + $0xf0] sm:$0xff]   ;;  %v3576_v27 = vrot.slane %v9546_v8, 1  ;;  %v7674_v43 = vld [vmem:[%s10008_s3 + $0xf8] sm:$0xff]  }
 0x3ed   : > { %v7692_v51 = vld [vmem:[%s10008_s3 + $0x180] sm:$0xff]  }
 0x3ee   : > { %v2794_v5 = vmax.f32 %v2765_v21, 0.0  ;;  %v3162_v14 = vshll.u32 %v9599_v16, 16  ;;  %v9701_v21 = vsel %vm936_vm2, %v3574_v7, %v3576_v27  ;;  %v9705_v6 = vsel %vm936_vm2, %v3576_v27, %v3578_v63 }
 0x3f0   : > { %v5802_v19 = vpack.c.bf16 %v2794_v5, %v2794_v5  ;;  %v3164_v61 = vrot.slane %v3162_v14, 1  ;;  %v7675_v5 = vld [vmem:[%s10008_s3 + $0x100] sm:$0xff]   ;;  %v9713_v14 = vrot.slane %v9582_v62, 1 }
 0x3f2   : > { %2940 = vst [vmem:[#allocation2 + $0x70] sm:$0xf] %v5802_v19  ;;  %v3165_v23 = vsel %vm368_vm1, %v9603_v56, %v3164_v61  ;;  %v9716_v19 = vsel %vm936_vm2, %v3578_v63, %v3580_v32  ;;  %v9721_v61 = vsel %vm936_vm2, %v3580_v32, %v9713_v14  ;;  %v7697_v32 = vld [vmem:[%s10008_s3 + $0x1a8] sm:$0xff]  }
 0x3f3   : > { %6994 = vmatmul.mubr.bf16.gmra.mrb[184].mxu1 %v3165_v23  ;;  %v3584_v23 = vrot.slane %v9599_v16, 1  ;;  %v7677_v16 = vld [vmem:[%s10008_s3 + $0x110] sm:$0xff]   ;;  %v9796_v58 = vld [vmem:[#allocation2 + $0x68] sm:$0xf] }
 0x3f4   : > { %7013 = vmatprep.mubr.bf16.mxu1 %v9430_v55  ;;  %v9657_v55 = vsel %vm936_vm2, %v3564_v39, %v3566_v35  ;;  %v7688_v39 = vld [vmem:[%s10008_s3 + $0x168] sm:$0xff]   ;;  %v7689_v35 = vld [vmem:[%s10008_s3 + $0x170] sm:$0xff]  }
 0x3fb   : > { %7014 = vmatmul.mubr.bf16.vlgmr.msra.gmra.mrb[164].mxu1 %v9437_v38 }
 0x3fc   : > { %7017 = vmatprep.mubr.bf16.mxu1 %v9446_v22  ;;  %7038 = vmatpush3.bf16.msra.mxu1 %v9523_v17  ;;  %v7663_v17 = vld [vmem:[%s10008_s3 + $0xa0] sm:$0xff]  }
 0x3fd   : > { %7039 = vmatprep.subr.bf16.mxu1 %v7660_v45 }
 0x400   : > { %7040 = vmatpush3.bf16.msra.mxu1 %v7660_v45  ;;  %v3585_v45 = vsel %vm936_vm2, %v9713_v14, %v3584_v23  ;;  %v7698_v23 = vld [vmem:[%s10008_s3 + $0x1b0] sm:$0xff]  }
 0x401   : > { %7041 = vmatprep.subr.bf16.mxu1 %v7661_v11 }
 0x403   : > { %7018 = vmatmul.mubr.bf16.gmra.mrb[168].mxu1 %v9461_v24 }
 0x404   : > { %7021 = vmatprep.mubr.bf16.mxu1 %v9480_v30  ;;  %7042 = vmatpush3.bf16.msra.mxu1 %v7661_v11  ;;  %v7676_v11 = vld [vmem:[%s10008_s3 + $0x108] sm:$0xff]  }
 0x405   : > { %7043 = vmatprep.subr.bf16.mxu1 %v7662_v3 }
 0x408   : > { %7044 = vmatpush3.bf16.msra.mxu1 %v7662_v3  ;;  %v7679_v3 = vld [vmem:[%s10008_s3 + $0x120] sm:$0xff]  }
 0x409   : > { %7045 = vmatprep.subr.bf16.mxu1 %v7663_v17 }
 0x40b   : > { %7022 = vmatmul.mubr.bf16.gmra.mrb[172].mxu1 %v9498_v4 }
 0x40c   : > { %7025 = vmatprep.mubr.bf16.mxu1 %v9516_v60  ;;  %7046 = vmatpush3.bf16.msra.mxu1 %v7663_v17  ;;  %v7680_v17 = vld [vmem:[%s10008_s3 + $0x128] sm:$0xff]  }
 0x40d   : > { %7047 = vmatprep.subr.bf16.mxu1 %v7664_v10 }
 0x410   : > { %7048 = vmatpush3.bf16.msra.mxu1 %v7664_v10  ;;  %v7681_v10 = vld [vmem:[%s10008_s3 + $0x130] sm:$0xff]  }
 0x411   : > { %7049 = vmatprep.subr.bf16.mxu1 %v7665_v44 }
 0x413   : > { %7026 = vmatmul.mubr.bf16.gmra.mrb[176].mxu1 %v9534_v0 }
 0x414   : > { %7029 = vmatprep.mubr.bf16.mxu1 %v9546_v8  ;;  %7050 = vmatpush3.bf16.msra.mxu1 %v7665_v44  ;;  %v7682_v44 = vld [vmem:[%s10008_s3 + $0x138] sm:$0xff]  }
 0x415   : > { %7051 = vmatprep.subr.bf16.mxu1 %v7666_v12 }
 0x418   : > { %7052 = vmatpush3.bf16.msra.mxu1 %v7666_v12  ;;  %v7683_v12 = vld [vmem:[%s10008_s3 + $0x140] sm:$0xff]  }
 0x419   : > { %7077 = vmatprep.subr.bf16.mxu1 %v7667_v25 }
 0x41b   : > { %7030 = vmatmul.mubr.bf16.gmra.mrb[180].mxu1 %v9558_v31 }
 0x41c   : > { %7033 = vmatprep.mubr.bf16.mxu1 %v9570_v47 }
 0x423   : > { %7034 = vmatmul.mubr.bf16.gmra.mrb[184].mxu1 %v9582_v62 }
 0x424   : > { %7053 = vmatprep.mubr.bf16.mxu1 %v3563_v40  ;;  %v7685_v40 = vld [vmem:[%s10008_s3 + $0x150] sm:$0xff]  }
 0x42b   : > { %7054 = vmatmul.mubr.bf16.vlgmr.msra.gmra.mrb[164].mxu1 %v9653_v53 }
 0x42c   : > { %7057 = vmatprep.mubr.bf16.mxu1 %v9657_v55  ;;  %7078 = vmatpush3.bf16.msra.mxu1 %v7667_v25  ;;  %v2966_v25 = vld [vmem:[#allocation2 + $0x64] sm:$0xf] }
 0x42d   : > { %7079 = vmatprep.subr.bf16.mxu1 %v7668_v59  ;;  %v9763_v48 = vcombine.low %v9594_v18, %v2966_v25  ;;  %v7687_v18 = vld [vmem:[%s10008_s3 + $0x160] sm:$0xff]  }
 0x430   : > { %7080 = vmatpush3.bf16.msra.mxu1 %v7668_v59  ;;  %v7691_v59 = vld [vmem:[%s10008_s3 + $0x178] sm:$0xff]  }
 0x431   : > { %7081 = vmatprep.subr.bf16.mxu1 %v7669_v2 }
 0x433   : > { %7058 = vmatmul.mubr.bf16.gmra.mrb[168].mxu1 %v9669_v42 }
 0x434   : > { %7061 = vmatprep.mubr.bf16.mxu1 %v9673_v37  ;;  %7082 = vmatpush3.bf16.msra.mxu1 %v7669_v2  ;;  %v4042_v2 = vshll.u32 %v9763_v48, 16 }
 0x435   : > { %7083 = vmatprep.subr.bf16.mxu1 %v7670_v49 }
 0x438   : > { %7084 = vmatpush3.bf16.msra.mxu1 %v7670_v49  ;;  %v5664_v49 = vcombine.low %v9796_v58, %v9796_v58 }
 0x439   : > { %7085 = vmatprep.subr.bf16.mxu1 %v7671_v57 }
 0x43a   : > { %v4050_v29 = vshll.u32 %v5664_v49, 16 }
 0x43b   : > { %7062 = vmatmul.mubr.bf16.gmra.mrb[172].mxu1 %v9685_v52 }
 0x43c   : > { %7065 = vmatprep.mubr.bf16.mxu1 %v9689_v41  ;;  %7086 = vmatpush3.bf16.msra.mxu1 %v7671_v57  ;;  %v4044_v57 = vrot.slane %v4042_v2, 1 }
 0x43d   : > { %7087 = vmatprep.subr.bf16.mxu1 %v7672_v54 }
 0x43e   : > { %v9807_v7 = vsel %vm368_vm1, %v9603_v56, %v4044_v57  ;;  %v7694_v56 = vld [vmem:[%s10008_s3 + $0x190] sm:$0xff]  }
 0x440   : > { %7088 = vmatpush3.bf16.msra.mxu1 %v7672_v54  ;;  %v4046_v54 = vshrl.u32 %v9763_v48, 16 }
 0x441   : > { %7089 = vmatprep.subr.bf16.mxu1 %v7673_v36 }
 0x442   : > { %v9811_v27 = vor.u32 %v4046_v54, %v4044_v57 }
 0x443   : > { %7066 = vmatmul.mubr.bf16.gmra.mrb[176].mxu1 %v9701_v21 }
 0x444   : > { %7069 = vmatprep.mubr.bf16.mxu1 %v9705_v6  ;;  %7090 = vmatpush3.bf16.msra.mxu1 %v7673_v36  ;;  %v4052_v36 = vrot.slane %v4050_v29, 1 }
 0x445   : > { %7091 = vmatprep.subr.bf16.mxu1 %v7674_v43 }
 0x446   : > { %v4053_v63 = vsel %vm368_vm1, %v9811_v27, %v4052_v36 }
 0x448   : > { %7092 = vmatpush3.bf16.msra.mxu1 %v7674_v43  ;;  %v7693_v43 = vld [vmem:[%s10008_s3 + $0x188] sm:$0xff]  }
 0x449   : > { %7117 = vmatprep.subr.bf16.mxu1 %v7675_v5 }
 0x44b   : > { %7070 = vmatmul.mubr.bf16.gmra.mrb[180].mxu1 %v9716_v19 }
 0x44c   : > { %7073 = vmatprep.mubr.bf16.mxu1 %v9721_v61 }
 0x453   : > { %7074 = vmatmul.mubr.bf16.gmra.mrb[184].mxu1 %v3585_v45  ;;  %v7699_v45 = vld [vmem:[%s10008_s3 + $0x1b8] sm:$0xff]  }
 0x454   : > { %7093 = vmatprep.mubr.bf16.mxu1 %v9437_v38  ;;  %v7678_v38 = vld [vmem:[%s10008_s3 + $0x118] sm:$0xff]  }
 0x45b   : > { %7094 = vmatmul.mubr.bf16.vlgmr.msra.gmra.mrb[164].mxu1 %v9446_v22 }
 0x45c   : > { %7097 = vmatprep.mubr.bf16.mxu1 %v9461_v24  ;;  %7118 = vmatpush3.bf16.msra.mxu1 %v7675_v5  ;;  %v7696_v5 = vld [vmem:[%s10008_s3 + $0x1a0] sm:$0xff]  }
 0x45d   : > { %7119 = vmatprep.subr.bf16.mxu1 %v7676_v11 }
 0x460   : > { %7120 = vmatpush3.bf16.msra.mxu1 %v7676_v11  ;;  %v7700_v11 = vld [vmem:[%s10008_s3 + $0x1c0] sm:$0xff]  }
 0x461   : > { %7121 = vmatprep.subr.bf16.mxu1 %v7677_v16 }
 0x463   : > { %7098 = vmatmul.mubr.bf16.gmra.mrb[168].mxu1 %v9480_v30 }
 0x464   : > { %7101 = vmatprep.mubr.bf16.mxu1 %v9498_v4  ;;  %7122 = vmatpush3.bf16.msra.mxu1 %v7677_v16  ;;  %v9849_v16 = vrot.slane %v9763_v48, 1 }
 0x465   : > { %7123 = vmatprep.subr.bf16.mxu1 %v7678_v38 }
 0x468   : > { %7124 = vmatpush3.bf16.msra.mxu1 %v7678_v38  ;;  %v9855_v38 = vsel %vm936_vm2, %v9713_v14, %v9849_v16  ;;  %v7702_v14 = vld [vmem:[%s10008_s3 + $0x1d0] sm:$0xff]  }
 0x469   : > { %7125 = vmatprep.subr.bf16.mxu1 %v7679_v3 }
 0x46b   : > { %7102 = vmatmul.mubr.bf16.gmra.mrb[172].mxu1 %v9516_v60 }
 0x46c   : > { %7105 = vmatprep.mubr.bf16.mxu1 %v9534_v0  ;;  %7126 = vmatpush3.bf16.msra.mxu1 %v7679_v3  ;;  %v4276_v3 = vrot.slane %v5664_v49, 1 }
 0x46d   : > { %7127 = vmatprep.subr.bf16.mxu1 %v7680_v17 }
 0x470   : > { %7128 = vmatpush3.bf16.msra.mxu1 %v7680_v17  ;;  %v4277_v17 = vsel %vm936_vm2, %v9849_v16, %v4276_v3 }
 0x471   : > { %7129 = vmatprep.subr.bf16.mxu1 %v7681_v10 }
 0x473   : > { %7106 = vmatmul.mubr.bf16.gmra.mrb[176].mxu1 %v9546_v8 }
 0x474   : > { %7109 = vmatprep.mubr.bf16.mxu1 %v9558_v31  ;;  %7130 = vmatpush3.bf16.msra.mxu1 %v7681_v10  ;;  %v7701_v10 = vld [vmem:[%s10008_s3 + $0x1c8] sm:$0xff]  }
 0x475   : > { %7131 = vmatprep.subr.bf16.mxu1 %v7682_v44 }
 0x478   : > { %7132 = vmatpush3.bf16.msra.mxu1 %v7682_v44 }
 0x479   : > { %7157 = vmatprep.subr.bf16.mxu1 %v7683_v12 }
 0x47b   : > { %7110 = vmatmul.mubr.bf16.gmra.mrb[180].mxu1 %v9570_v47 }
 0x47c   : > { %7113 = vmatprep.mubr.bf16.mxu1 %v9582_v62 }
 0x483   : > { %7114 = vmatmul.mubr.bf16.gmra.mrb[184].mxu1 %v9763_v48 }
 0x484   : > { %7133 = vmatprep.mubr.bf16.mxu1 %v9457_v13  ;;  %v7686_v13 = vld [vmem:[%s10008_s3 + $0x158] sm:$0xff]  }
 0x48b   : > { %7134 = vmatmul.mubr.bf16.vlgmr.msra.gmra.mrb[164].mxu1 %v9476_v15 }
 0x48c   : > { %7137 = vmatprep.mubr.bf16.mxu1 %v9494_v46  ;;  %7158 = vmatpush3.bf16.msra.mxu1 %v7683_v12 }
 0x48d   : > { %7159 = vmatprep.subr.bf16.mxu1 %v7684_v26 }
 0x490   : > { %7160 = vmatpush3.bf16.msra.mxu1 %v7684_v26 }
 0x491   : > { %7161 = vmatprep.subr.bf16.mxu1 %v7685_v40 }
 0x493   : > { %7138 = vmatmul.mubr.bf16.gmra.mrb[168].mxu1 %v9512_v34 }
 0x494   : > { %7141 = vmatprep.mubr.bf16.mxu1 %v9530_v50  ;;  %7162 = vmatpush3.bf16.msra.mxu1 %v7685_v40 }
 0x495   : > { %7163 = vmatprep.subr.bf16.mxu1 %v7686_v13 }
 0x498   : > { %7164 = vmatpush3.bf16.msra.mxu1 %v7686_v13 }
 0x499   : > { %7165 = vmatprep.subr.bf16.mxu1 %v7687_v18 }
 0x49b   : > { %7142 = vmatmul.mubr.bf16.gmra.mrb[172].mxu1 %v9542_v1 }
 0x49c   : > { %7145 = vmatprep.mubr.bf16.mxu1 %v9554_v20  ;;  %7166 = vmatpush3.bf16.msra.mxu1 %v7687_v18 }
 0x49d   : > { %7167 = vmatprep.subr.bf16.mxu1 %v7688_v39 }
 0x4a0   : > { %7168 = vmatpush3.bf16.msra.mxu1 %v7688_v39 }
 0x4a1   : > { %7169 = vmatprep.subr.bf16.mxu1 %v7689_v35 }
 0x4a3   : > { %7146 = vmatmul.mubr.bf16.gmra.mrb[176].mxu1 %v9566_v28 }
 0x4a4   : > { %7149 = vmatprep.mubr.bf16.mxu1 %v9578_v9  ;;  %7170 = vmatpush3.bf16.msra.mxu1 %v7689_v35 }
 0x4a5   : > { %7171 = vmatprep.subr.bf16.mxu1 %v7691_v59 }
 0x4a8   : > { %7172 = vmatpush3.bf16.msra.mxu1 %v7691_v59 }
 0x4a9   : > { %7197 = vmatprep.subr.bf16.mxu1 %v7692_v51 }
 0x4ab   : > { %7150 = vmatmul.mubr.bf16.gmra.mrb[180].mxu1 %v9590_v33 }
 0x4ac   : > { %7153 = vmatprep.mubr.bf16.mxu1 %v9807_v7 }
 0x4b3   : > { %7154 = vmatmul.mubr.bf16.gmra.mrb[184].mxu1 %v4053_v63 }
 0x4b4   : > { %7173 = vmatprep.mubr.bf16.mxu1 %v9653_v53  ;;  %v7695_v53 = vld [vmem:[%s10008_s3 + $0x198] sm:$0xff]  }
 0x4bb   : > { %7174 = vmatmul.mubr.bf16.vlgmr.msra.gmra.mrb[164].mxu1 %v9657_v55 }
 0x4bc   : > { %7177 = vmatprep.mubr.bf16.mxu1 %v9669_v42  ;;  %7198 = vmatpush3.bf16.msra.mxu1 %v7692_v51 }
 0x4bd   : > { %7199 = vmatprep.subr.bf16.mxu1 %v7693_v43 }
 0x4c0   : > { %7200 = vmatpush3.bf16.msra.mxu1 %v7693_v43 }
 0x4c1   : > { %7201 = vmatprep.subr.bf16.mxu1 %v7694_v56 }
 0x4c3   : > { %7178 = vmatmul.mubr.bf16.gmra.mrb[168].mxu1 %v9673_v37 }
 0x4c4   : > { %7181 = vmatprep.mubr.bf16.mxu1 %v9685_v52  ;;  %7202 = vmatpush3.bf16.msra.mxu1 %v7694_v56 }
 0x4c5   : > { %7203 = vmatprep.subr.bf16.mxu1 %v7695_v53 }
 0x4c8   : > { %7204 = vmatpush3.bf16.msra.mxu1 %v7695_v53 }
 0x4c9   : > { %7205 = vmatprep.subr.bf16.mxu1 %v7696_v5 }
 0x4cb   : > { %7182 = vmatmul.mubr.bf16.gmra.mrb[172].mxu1 %v9689_v41 }
 0x4cc   : > { %7185 = vmatprep.mubr.bf16.mxu1 %v9701_v21  ;;  %7206 = vmatpush3.bf16.msra.mxu1 %v7696_v5 }
 0x4cd   : > { %7207 = vmatprep.subr.bf16.mxu1 %v7697_v32 }
 0x4d0   : > { %7208 = vmatpush3.bf16.msra.mxu1 %v7697_v32 }
 0x4d1   : > { %7209 = vmatprep.subr.bf16.mxu1 %v7698_v23 }
 0x4d3   : > { %7186 = vmatmul.mubr.bf16.gmra.mrb[176].mxu1 %v9705_v6 }
 0x4d4   : > { %7189 = vmatprep.mubr.bf16.mxu1 %v9716_v19  ;;  %7210 = vmatpush3.bf16.msra.mxu1 %v7698_v23 }
 0x4d5   : > { %7211 = vmatprep.subr.bf16.mxu1 %v7699_v45 }
 0x4d8   : > { %7212 = vmatpush3.bf16.msra.mxu1 %v7699_v45 }
 0x4d9   : > { %7237 = vmatprep.subr.bf16.mxu1 %v7700_v11 }
 0x4db   : > { %7190 = vmatmul.mubr.bf16.gmra.mrb[180].mxu1 %v9721_v61 }
 0x4dc   : > { %7193 = vmatprep.mubr.bf16.mxu1 %v9855_v38 }
 0x4e3   : > { %7194 = vmatmul.mubr.bf16.gmra.mrb[184].mxu1 %v4277_v17 }
 0x4e4   : > { %7213 = vmatprep.mubr.bf16.mxu1 %v9446_v22  ;;  %v7703_v22 = vld [vmem:[%s10008_s3 + $0x1d8] sm:$0xff]  }
 0x4eb   : > { %7214 = vmatmul.mubr.bf16.vlgmr.msra.gmra.mrb[164].mxu1 %v9461_v24  ;;  %v7704_v24 = vld [vmem:[%s10008_s3 + $0x1e0] sm:$0xff]  }
 0x4ec   : > { %7217 = vmatprep.mubr.bf16.mxu1 %v9480_v30  ;;  %7238 = vmatpush3.bf16.msra.mxu1 %v7700_v11  ;;  %v7705_v30 = vld [vmem:[%s10008_s3 + $0x1e8] sm:$0xff]  }
 0x4ed   : > { %7239 = vmatprep.subr.bf16.mxu1 %v7701_v10 }
 0x4f0   : > { %7240 = vmatpush3.bf16.msra.mxu1 %v7701_v10 }
 0x4f1   : > { %7241 = vmatprep.subr.bf16.mxu1 %v7702_v14 }
 0x4f3   : > { %7218 = vmatmul.mubr.bf16.gmra.mrb[168].mxu1 %v9498_v4  ;;  %v7706_v4 = vld [vmem:[%s10008_s3 + $0x1f0] sm:$0xff]  }
 0x4f4   : > { %7221 = vmatprep.mubr.bf16.mxu1 %v9516_v60  ;;  %7242 = vmatpush3.bf16.msra.mxu1 %v7702_v14  ;;  %v7708_v60 = vld [vmem:[%s10008_s3 + $0x1f8] sm:$0xff]  }
 0x4f5   : > { %7243 = vmatprep.subr.bf16.mxu1 %v7703_v22 }
 0x4f8   : > { %7244 = vmatpush3.bf16.msra.mxu1 %v7703_v22 }
 0x4f9   : > { %7245 = vmatprep.subr.bf16.mxu1 %v7704_v24 }
 0x4fb   : > { %7222 = vmatmul.mubr.bf16.gmra.mrb[172].mxu1 %v9534_v0  ;;  %v7709_v0 = vld [vmem:[%s10008_s3 + $0x200] sm:$0xff]  }
 0x4fc   : > { %7225 = vmatprep.mubr.bf16.mxu1 %v9546_v8  ;;  %7246 = vmatpush3.bf16.msra.mxu1 %v7704_v24  ;;  %v2968_v8 = vld [vmem:[#allocation2 + $0x6c] sm:$0xf] }
 0x4fd   : > { %7247 = vmatprep.subr.bf16.mxu1 %v7705_v30  ;;  %v5713_v44 = vcombine.low %v9796_v58, %v2968_v8 }
 0x500   : > { %7248 = vmatpush3.bf16.msra.mxu1 %v7705_v30 }
 0x501   : > { %7249 = vmatprep.subr.bf16.mxu1 %v7706_v4 }
 0x503   : > { %7226 = vmatmul.mubr.bf16.gmra.mrb[176].mxu1 %v9558_v31  ;;  %v7710_v31 = vld [vmem:[%s10008_s3 + $0x208] sm:$0xff]  }
 0x504   : > { %7229 = vmatprep.mubr.bf16.mxu1 %v9570_v47  ;;  %7250 = vmatpush3.bf16.msra.mxu1 %v7706_v4  ;;  %v7711_v47 = vld [vmem:[%s10008_s3 + $0x210] sm:$0xff]  }
 0x505   : > { %7251 = vmatprep.subr.bf16.mxu1 %v7708_v60 }
 0x508   : > { %7252 = vmatpush3.bf16.msra.mxu1 %v7708_v60 }
 0x509   : > { %7277 = vmatprep.subr.bf16.mxu1 %v7709_v0 }
 0x50b   : > { %7230 = vmatmul.mubr.bf16.gmra.mrb[180].mxu1 %v9582_v62  ;;  %v4724_v62 = vshll.u32 %v5713_v44, 16 }
 0x50c   : > { %7233 = vmatprep.mubr.bf16.mxu1 %v9763_v48  ;;  %v4728_v48 = vshrl.u32 %v5713_v44, 16 }
 0x513   : > { %7234 = vmatmul.mubr.bf16.gmra.mrb[184].mxu1 %v5713_v44 }
 0x514   : > { %7253 = vmatprep.mubr.bf16.mxu1 %v9476_v15  ;;  %v7712_v15 = vld [vmem:[%s10008_s3 + $0x218] sm:$0xff]  }
 0x51b   : > { %7254 = vmatmul.mubr.bf16.vlgmr.msra.gmra.mrb[164].mxu1 %v9494_v46  ;;  %v7713_v46 = vld [vmem:[%s10008_s3 + $0x220] sm:$0xff]  }
 0x51c   : > { %7257 = vmatprep.mubr.bf16.mxu1 %v9512_v34  ;;  %7278 = vmatpush3.bf16.msra.mxu1 %v7709_v0  ;;  %v7714_v34 = vld [vmem:[%s10008_s3 + $0x228] sm:$0xff]  }
 0x51d   : > { %7279 = vmatprep.subr.bf16.mxu1 %v7710_v31 }
 0x520   : > { %7280 = vmatpush3.bf16.msra.mxu1 %v7710_v31 }
 0x521   : > { %7281 = vmatprep.subr.bf16.mxu1 %v7711_v47 }
 0x523   : > { %7258 = vmatmul.mubr.bf16.gmra.mrb[168].mxu1 %v9530_v50  ;;  %v7715_v50 = vld [vmem:[%s10008_s3 + $0x230] sm:$0xff]  }
 0x524   : > { %7261 = vmatprep.mubr.bf16.mxu1 %v9542_v1  ;;  %7282 = vmatpush3.bf16.msra.mxu1 %v7711_v47  ;;  %v7717_v1 = vld [vmem:[%s10008_s3 + $0x238] sm:$0xff]  }
 0x525   : > { %7283 = vmatprep.subr.bf16.mxu1 %v7712_v15 }
 0x528   : > { %7284 = vmatpush3.bf16.msra.mxu1 %v7712_v15 }
 0x529   : > { %7285 = vmatprep.subr.bf16.mxu1 %v7713_v46 }
 0x52b   : > { %7262 = vmatmul.mubr.bf16.gmra.mrb[172].mxu1 %v9554_v20  ;;  %v7716_v20 = vld [vmem:[#allocation2 + $0x70] ss:$0 sps:$4 sm:$0xff]  }
 0x52c   : > { %7265 = vmatprep.mubr.bf16.mxu1 %v9566_v28  ;;  %7286 = vmatpush3.bf16.msra.mxu1 %v7713_v46  ;;  %v4726_v28 = vrot.slane %v4724_v62, 1  ;;  %v4732_v12 = vshll.u32 %v7716_v20, 16 }
 0x52d   : > { %7287 = vmatprep.subr.bf16.mxu1 %v7714_v34 }
 0x52e   : > { %v4727_v25 = vsel %vm368_vm1, %v9811_v27, %v4726_v28  ;;  %v4734_v26 = vrot.slane %v4732_v12, 1  ;;  %v4730_v40 = vor.u32 %v4728_v48, %v4726_v28 }
 0x530   : > { %7288 = vmatpush3.bf16.msra.mxu1 %v7714_v34 }
 0x531   : > { %7289 = vmatprep.subr.bf16.mxu1 %v7715_v50 }
 0x533   : > { %7266 = vmatmul.mubr.bf16.gmra.mrb[176].mxu1 %v9578_v9  ;;  %v4735_v9 = vsel %vm368_vm1, %v4730_v40, %v4734_v26 }
 0x534   : > { %7269 = vmatprep.mubr.bf16.mxu1 %v9590_v33  ;;  %7290 = vmatpush3.bf16.msra.mxu1 %v7715_v50  ;;  %v4956_v33 = vrot.slane %v5713_v44, 1 }
 0x535   : > { %7291 = vmatprep.subr.bf16.mxu1 %v7717_v1 }
 0x538   : > { %7292 = vmatpush3.bf16.msra.mxu1 %v7717_v1 }
 0x53b   : > { %7270 = vmatmul.mubr.bf16.gmra.mrb[180].mxu1 %v9807_v7 }
 0x53c   : > { %7273 = vmatprep.mubr.bf16.mxu1 %v4727_v25 }
 0x543   : > { %7274 = vmatmul.mubr.bf16.gmra.mrb[184].mxu1 %v4735_v9 }
 0x544   : > { %7293 = vmatprep.mubr.bf16.mxu1 %v9657_v55  ;;  %v4957_v55 = vsel %vm936_vm2, %v9849_v16, %v4956_v33 }
 0x54b   : > { %7294 = vmatmul.mubr.bf16.vlgmr.msra.gmra.mrb[164].mxu1 %v9669_v42  ;;  %v4958_v42 = vrot.slane %v7716_v20, 1 }
 0x54c   : > { %7297 = vmatprep.mubr.bf16.mxu1 %v9673_v37 }
 0x54d   : > { %v4959_v37 = vsel %vm936_vm2, %v4956_v33, %v4958_v42 }
 0x553   : > { %7298 = vmatmul.mubr.bf16.gmra.mrb[168].mxu1 %v9685_v52  ;;  %v9947_v52 = vld [vmem:[%s10009_s4] ss:$0 sm:$0xff] }
 0x554   : > { %7301 = vmatprep.mubr.bf16.mxu1 %v9689_v41 }
 0x55b   : > { %7302 = vmatmul.mubr.bf16.gmra.mrb[172].mxu1 %v9701_v21 }
 0x55c   : > { %7305 = vmatprep.mubr.bf16.mxu1 %v9705_v6 }
 0x563   : > { %7306 = vmatmul.mubr.bf16.gmra.mrb[176].mxu1 %v9716_v19 }
 0x564   : > { %7309 = vmatprep.mubr.bf16.mxu1 %v9721_v61 }
 0x56b   : > { %7310 = vmatmul.mubr.bf16.gmra.mrb[180].mxu1 %v9855_v38 }
 0x56c   : > { %7313 = vmatprep.mubr.bf16.mxu1 %v4957_v55 }
 0x573   : > { %7314 = vmatmul.mubr.bf16.gmra.mrb[184].mxu1 %v4959_v37 }
 0x61e   : > { %v7295_v41 = vpop.f32.mrb[164].mxu1 }
 0x61f   : > { %v5172_v21 = vadd.f32 %v7295_v41, %v9947_v52  ;;  %v5044_v6 = vpop.f32.mrb[165].mxu1 }
 0x620   : > { %v5170_v19 = vadd.f32 %v9947_v52, %v5044_v6  ;;  %v7296_v61 = vpop.f32.mrb[166].mxu1 }
 0x621   : > { %v5196_v13 = vmax.f32 %v5172_v21, 0.0  ;;  %v5173_v18 = vadd.f32 %v7296_v61, %v9947_v52  ;;  %v5047_v39 = vpop.f32.mrb[167].mxu1 }
 0x622   : > { %v5194_v35 = vmax.f32 %v5170_v19, 0.0  ;;  %v5171_v59 = vadd.f32 %v9947_v52, %v5047_v39 }
 0x623   : > { %5220 = vst [vmem:[%s9953_s25 + $0x10] sm:$0xff] %v5196_v13  ;;  %v5197_v2 = vmax.f32 %v5173_v18, 0.0 }
 0x624   : > { %5218 = vst [vmem:[%s9953_s25] sm:$0xff] %v5194_v35  ;;  %v5195_v58 = vmax.f32 %v5171_v59, 0.0 }
 0x625   : > { %5221 = vst [vmem:[%s9953_s25 + $0x18] sm:$0xff] %v5197_v2 }
 0x626   : > { %5219 = vst [vmem:[%s9953_s25 + $0x8] sm:$0xff] %v5195_v58  ;;  %v7299_v51 = vpop.f32.mrb[168].mxu1 }
 0x627   : > { %v5176_v49 = vadd.f32 %v7299_v51, %v9947_v52  ;;  %v5060_v57 = vpop.f32.mrb[169].mxu1 }
 0x628   : > { %v5174_v29 = vadd.f32 %v9947_v52, %v5060_v57  ;;  %v7300_v7 = vpop.f32.mrb[170].mxu1 }
 0x629   : > { %v5200_v54 = vmax.f32 %v5176_v49, 0.0  ;;  %v5177_v36 = vadd.f32 %v7300_v7, %v9947_v52  ;;  %v5063_v27 = vpop.f32.mrb[171].mxu1 }
 0x62a   : > { %v5198_v63 = vmax.f32 %v5174_v29, 0.0  ;;  %v5175_v43 = vadd.f32 %v9947_v52, %v5063_v27 }
 0x62b   : > { %5224 = vst [vmem:[%s9953_s25 + $0x30] sm:$0xff] %v5200_v54  ;;  %v5201_v56 = vmax.f32 %v5177_v36, 0.0 }
 0x62c   : > { %5222 = vst [vmem:[%s9953_s25 + $0x20] sm:$0xff] %v5198_v63  ;;  %v5199_v53 = vmax.f32 %v5175_v43, 0.0 }
 0x62d   : > { %5225 = vst [vmem:[%s9953_s25 + $0x38] sm:$0xff] %v5201_v56 }
 0x62e   : > { %5223 = vst [vmem:[%s9953_s25 + $0x28] sm:$0xff] %v5199_v53  ;;  %v7303_v5 = vpop.f32.mrb[172].mxu1 }
 0x62f   : > { %v5180_v32 = vadd.f32 %v7303_v5, %v9947_v52  ;;  %v5076_v23 = vpop.f32.mrb[173].mxu1 }
 0x630   : > { %v5178_v45 = vadd.f32 %v9947_v52, %v5076_v23  ;;  %v7304_v11 = vpop.f32.mrb[174].mxu1 }
 0x631   : > { %v5204_v16 = vmax.f32 %v5180_v32, 0.0  ;;  %v5181_v38 = vadd.f32 %v7304_v11, %v9947_v52  ;;  %v5079_v3 = vpop.f32.mrb[175].mxu1 }
 0x632   : > { %v5202_v17 = vmax.f32 %v5178_v45, 0.0  ;;  %v5179_v10 = vadd.f32 %v9947_v52, %v5079_v3 }
 0x633   : > { %5228 = vst [vmem:[%s9953_s25 + $0x50] sm:$0xff] %v5204_v16  ;;  %v5205_v14 = vmax.f32 %v5181_v38, 0.0 }
 0x634   : > { %5226 = vst [vmem:[%s9953_s25 + $0x40] sm:$0xff] %v5202_v17  ;;  %v5203_v22 = vmax.f32 %v5179_v10, 0.0 }
 0x635   : > { %5229 = vst [vmem:[%s9953_s25 + $0x58] sm:$0xff] %v5205_v14 }
 0x636   : > { %5227 = vst [vmem:[%s9953_s25 + $0x48] sm:$0xff] %v5203_v22  ;;  %v7307_v24 = vpop.f32.mrb[176].mxu1 }
 0x637   : > { %v5184_v30 = vadd.f32 %v7307_v24, %v9947_v52  ;;  %v5092_v4 = vpop.f32.mrb[177].mxu1 }
 0x638   : > { %v5182_v60 = vadd.f32 %v9947_v52, %v5092_v4  ;;  %v7308_v0 = vpop.f32.mrb[178].mxu1 }
 0x639   : > { %v5208_v8 = vmax.f32 %v5184_v30, 0.0  ;;  %v5185_v44 = vadd.f32 %v7308_v0, %v9947_v52  ;;  %v5095_v31 = vpop.f32.mrb[179].mxu1 }
 0x63a   : > { %v5206_v47 = vmax.f32 %v5182_v60, 0.0  ;;  %v5183_v15 = vadd.f32 %v9947_v52, %v5095_v31 }
 0x63b   : > { %5232 = vst [vmem:[%s9953_s25 + $0x70] sm:$0xff] %v5208_v8  ;;  %v5209_v46 = vmax.f32 %v5185_v44, 0.0 }
 0x63c   : > { %5230 = vst [vmem:[%s9953_s25 + $0x60] sm:$0xff] %v5206_v47  ;;  %v5207_v34 = vmax.f32 %v5183_v15, 0.0 }
 0x63d   : > { %5233 = vst [vmem:[%s9953_s25 + $0x78] sm:$0xff] %v5209_v46 }
 0x63e   : > { %5231 = vst [vmem:[%s9953_s25 + $0x68] sm:$0xff] %v5207_v34  ;;  %v7311_v50 = vpop.f32.mrb[180].mxu1 }
 0x63f   : > { %v5188_v1 = vadd.f32 %v7311_v50, %v9947_v52  ;;  %v5108_v62 = vpop.f32.mrb[181].mxu1 }
 0x640   : > { %v5186_v20 = vadd.f32 %v9947_v52, %v5108_v62  ;;  %v7312_v28 = vpop.f32.mrb[182].mxu1 }
 0x641   : > { %v5212_v12 = vmax.f32 %v5188_v1, 0.0  ;;  %v5189_v25 = vadd.f32 %v7312_v28, %v9947_v52  ;;  %v5111_v48 = vpop.f32.mrb[183].mxu1 }
 0x642   : > { %v5210_v26 = vmax.f32 %v5186_v20, 0.0  ;;  %v5187_v40 = vadd.f32 %v9947_v52, %v5111_v48 }
 0x643   : > { %5236 = vst [vmem:[%s9953_s25 + $0x90] sm:$0xff] %v5212_v12  ;;  %v5213_v9 = vmax.f32 %v5189_v25, 0.0 }
 0x644   : > { %5234 = vst [vmem:[%s9953_s25 + $0x80] sm:$0xff] %v5210_v26  ;;  %v5211_v33 = vmax.f32 %v5187_v40, 0.0 }
 0x645   : > { %5237 = vst [vmem:[%s9953_s25 + $0x98] sm:$0xff] %v5213_v9 }
 0x646   : > { %5235 = vst [vmem:[%s9953_s25 + $0x88] sm:$0xff] %v5211_v33  ;;  %v7315_v55 = vpop.f32.mrb[184].mxu1 }
 0x647   : > { %v5192_v42 = vadd.f32 %v7315_v55, %v9947_v52  ;;  %v5124_v37 = vpop.f32.mrb[185].mxu1 }
 0x648   : > { %v5190_v41 = vadd.f32 %v9947_v52, %v5124_v37  ;;  %v7316_v21 = vpop.f32.mrb[186].mxu1 }
 0x649   : > { %v5216_v6 = vmax.f32 %v5192_v42, 0.0  ;;  %v5193_v19 = vadd.f32 %v7316_v21, %v9947_v52  ;;  %v5127_v61 = vpop.f32.mrb[187].mxu1 }
 0x64a   : > { %v5214_v13 = vmax.f32 %v5190_v41, 0.0  ;;  %v5191_v18 = vadd.f32 %v9947_v52, %v5127_v61 }
 0x64b   : > { %5240 = vst [vmem:[%s9953_s25 + $0xb0] sm:$0xff] %v5216_v6  ;;  %v5217_v39 = vmax.f32 %v5193_v19, 0.0 }
 0x64c   : > { %5238 = vst [vmem:[%s9953_s25 + $0xa0] sm:$0xff] %v5214_v13  ;;  %v5215_v35 = vmax.f32 %v5191_v18, 0.0 }
 0x64d   : > { %5241 = vst [vmem:[%s9953_s25 + $0xb8] sm:$0xff] %v5217_v39 }
 0x64e   : > { %5239 = vst [vmem:[%s9953_s25 + $0xa8] sm:$0xff] %v5215_v35 }
 0x64f PF: > { %s15_s18 = sadd.s32 1, %s7747_s18  }
 0x650   : > { %p12_p4 = scmp.ge.s32.totalorder %s15_s18, 4  }
 0x652   :  { %14 = sbr.rel (!%p12_p4) target bundleno = 1 (0x1), region = 86 }

</bundles_post_ra>
